<compile_context>
chip_gen: v7x
topology: tpu7x:2x2x1
jax: 0.10.0
libtpu: 0.0.40
codegen_flags: <defaults>
</compile_context>

<pallas_src>
import numpy as np
import jax
import jax.numpy as jnp
from jax.experimental import pallas as pl
from jax.experimental.pallas import tpu as pltpu

_VMEM_LIMIT = 32 * 1024 * 1024   # plenty here; safe on v5e/v6e (128 MiB) and v7x (64 MiB)


# ----------------------------------------------------------------------------
# Host-side (numpy) construction of the exact spatial operators
# ----------------------------------------------------------------------------
def _conv3x3_shift_ops(H, W, stride):
    """9 operators S[t] of shape (H*W, Ho*Wo):
    (X @ S[t])[c, (ho,wo)] = X[c, (stride*ho+kh-1, stride*wo+kw-1)] with zero
    padding=1, t = kh*3 + kw.  Entries are exact 0/1 (bf16-exact)."""
    Ho = (H + 2 - 3) // stride + 1
    Wo = (W + 2 - 3) // stride + 1
    S = np.zeros((9, H * W, Ho * Wo), np.float32)
    for kh in range(3):
        for kw in range(3):
            t = kh * 3 + kw
            for ho in range(Ho):
                hi = stride * ho + kh - 1
                if hi < 0 or hi >= H:
                    continue
                for wo in range(Wo):
                    wi = stride * wo + kw - 1
                    if wi < 0 or wi >= W:
                        continue
                    S[t, hi * W + wi, ho * Wo + wo] = 1.0
    return S


def _interp_matrix(src, dst):
    """1-D bilinear (align_corners=True) interpolation matrix, shape (dst, src)."""
    A = np.zeros((dst, src), np.float32)
    for p in range(dst):
        s = p * (src - 1) / (dst - 1) if dst > 1 else 0.0
        lo = int(np.floor(s))
        hi = min(lo + 1, src - 1)
        f = s - lo
        A[p, lo] += 1.0 - f
        A[p, hi] += f
    return A


def _bilinear_up_op(Hs, Ws, Hd, Wd):
    """Operator U (Hs*Ws, Hd*Wd): (X @ U) bilinearly upsamples the lane-dense
    (C, Hs*Ws) map to (C, Hd*Wd) with align_corners=True (PyTorch semantics)."""
    Ah = _interp_matrix(Hs, Hd)          # (Hd, Hs)
    Aw = _interp_matrix(Ws, Wd)          # (Wd, Ws)
    return np.einsum('ph,qw->hwpq', Ah, Aw).reshape(Hs * Ws, Hd * Wd)


def _tapstack(w):
    """(3,3,Cin,Cout) HWIO conv weight -> (9*Cout, Cin), rows ordered
    [t*Cout + co] with t = kh*3 + kw (matches _conv3x3_shift_ops)."""
    kh, kw, cin, cout = w.shape
    return jnp.transpose(w, (0, 1, 3, 2)).reshape(kh * kw * cout, cin)


# ----------------------------------------------------------------------------
# Fused module kernel (one batch element per grid step)
# ----------------------------------------------------------------------------
def _make_module_kernel(nb0, nb1):
    f32 = jnp.float32
    bf16 = jnp.bfloat16

    def conv3x3_bn(x, wall, S_ref, scale, bias, *, relu, residual=None):
        # x: (Cin, Min) f32 | wall: (9*Cout, Cin) bf16 | S_ref: (9, Min, Mout) bf16
        cout = wall.shape[0] // 9
        mout = S_ref.shape[-1]
        z = jnp.dot(wall, x.astype(bf16), preferred_element_type=f32)  # (9*Cout, Min)
        zb = z.astype(bf16)
        acc = jnp.zeros((cout, mout), f32)
        for t in range(9):                            # fat-K (K=Min) shift dots
            acc = acc + jnp.dot(zb[t * cout:(t + 1) * cout, :], S_ref[t],
                                preferred_element_type=f32)
        y = acc * scale + bias                        # folded BN, f32 epilogue
        if residual is not None:
            y = y + residual                          # residual stays f32
        if relu:
            y = jnp.maximum(y, 0.0)
        return y

    def basic_blocks(x, nb, w_ref, s_ref, b_ref, S_ref):
        h = x
        for k in range(nb):
            r = h
            h = conv3x3_bn(h, w_ref[2 * k], S_ref, s_ref[2 * k], b_ref[2 * k],
                           relu=True)
            h = conv3x3_bn(h, w_ref[2 * k + 1], S_ref, s_ref[2 * k + 1],
                           b_ref[2 * k + 1], relu=True, residual=r)
        return h

    def kernel(x0_ref, x1_ref, S0_ref, S1_ref, D10_ref, U01_ref,
               w0_ref, s0_ref, b0_ref, w1_ref, s1_ref, b1_ref,
               wf01_ref, sf01_ref, bf01_ref, wf10_ref, sf10_ref, bf10_ref,
               y0_ref, y1_ref):
        x0 = x0_ref[0]                                # (C0, M0) f32, lane-dense
        x1 = x1_ref[0]                                # (C1, M1) f32

        # 1) branches (BasicBlocks, everything stays in VMEM / registers)
        x0b = basic_blocks(x0, nb0, w0_ref, s0_ref, b0_ref, S0_ref)
        x1b = basic_blocks(x1, nb1, w1_ref, s1_ref, b1_ref, S1_ref)

        # 2) fuse i=0:  relu(x0b + upsample(BN(conv1x1(x1b))))
        t = jnp.dot(wf01_ref[...], x1b.astype(bf16), preferred_element_type=f32)
        t = t * sf01_ref[...] + bf01_ref[...]         # (C0, M1) f32
        t_up = jnp.dot(t, U01_ref[...], preferred_element_type=f32)  # (C0, M0)
        y0_ref[0] = jnp.maximum(x0b + t_up, 0.0).astype(y0_ref.dtype)

        # 3) fuse i=1:  relu(BN(conv3x3 stride-2 (x0b)) + x1b)
        y1 = conv3x3_bn(x0b, wf10_ref[...], D10_ref, sf10_ref[...],
                        bf10_ref[...], relu=True, residual=x1b)
        y1_ref[0] = y1.astype(y1_ref.dtype)

    return kernel


# ----------------------------------------------------------------------------
# Module forward wrapper (single pallas_call)
# ----------------------------------------------------------------------------
def high_resolution_module_forward(xs_nchw, params):
    x0_4d, x1_4d = xs_nchw
    N, C0, H0, W0 = x0_4d.shape
    _, C1, H1, W1 = x1_4d.shape
    M0, M1 = H0 * W0, H1 * W1
    nb0 = params["w0"].shape[0] // 2
    nb1 = params["w1"].shape[0] // 2

    # NCHW flattened over (H, W) is already the lane-dense (C, M) layout the
    # kernel uses — these reshapes are metadata-only (no transposes, no copies).
    x0 = x0_4d.reshape(N, C0, M0)
    x1 = x1_4d.reshape(N, C1, M1)

    ins = [x0, x1,
           params["S0"], params["S1"], params["D10"], params["U01"],
           params["w0"], params["s0"], params["b0"],
           params["w1"], params["s1"], params["b1"],
           params["wf01"], params["sf01"], params["bf01"],
           params["wf10"], params["sf10"], params["bf10"]]

    def batched(a):        # per-batch-element block
        return pl.BlockSpec((1,) + a.shape[1:],
                            lambda n, _nd=a.ndim: (n,) + (0,) * (_nd - 1))

    def resident(a):       # full array, constant across the grid (VMEM-resident)
        return pl.BlockSpec(a.shape, lambda n, _nd=a.ndim: (0,) * _nd)

    in_specs = [batched(x0), batched(x1)] + [resident(a) for a in ins[2:]]
    out_shape = (jax.ShapeDtypeStruct((N, C0, M0), jnp.float32),
                 jax.ShapeDtypeStruct((N, C1, M1), jnp.float32))
    out_specs = (pl.BlockSpec((1, C0, M0), lambda n: (n, 0, 0)),
                 pl.BlockSpec((1, C1, M1), lambda n: (n, 0, 0)))

    y0, y1 = pl.pallas_call(
        _make_module_kernel(nb0, nb1),
        grid=(N,),
        out_shape=out_shape,
        in_specs=in_specs,
        out_specs=out_specs,
        compiler_params=pltpu.CompilerParams(
            dimension_semantics=("parallel",),
            vmem_limit_bytes=_VMEM_LIMIT),
    )(*ins)
    return [y0.reshape(N, C0, H0, W0), y1.reshape(N, C1, H1, W1)]


# ----------------------------------------------------------------------------
# Parameter construction (deterministic, synthetic), inference-folded BN
# ----------------------------------------------------------------------------
def bn_fold(gamma, beta, mean, var, eps=1e-5):
    scale = gamma / jnp.sqrt(var + eps)
    bias = beta - mean * scale
    return scale, bias


def make_bn_params(key, c):
    k1, k2, k3, k4 = jax.random.split(key, 4)
    gamma = 1.0 + 0.1 * jax.random.normal(k1, (c,), jnp.float32)
    beta = 0.1 * jax.random.normal(k2, (c,), jnp.float32)
    mean = 0.1 * jax.random.normal(k3, (c,), jnp.float32)
    var = 1.0 + 0.1 * jnp.abs(jax.random.normal(k4, (c,), jnp.float32))
    return bn_fold(gamma, beta, mean, var)


def make_conv_w(key, kh, kw, cin, cout):
    return 0.2 * jax.random.normal(key, (kh, kw, cin, cout), jnp.float32)


def build_params(key, num_blocks, num_inchannels, num_channels, spatial):
    keys = jax.random.split(key, 64)
    kidx = 0

    def nk():
        nonlocal kidx
        k = keys[kidx]
        kidx += 1
        return k

    params = {}
    # Branch BasicBlocks (expansion=1, stride=1; no downsample since
    # num_inchannels[i] == num_channels[i] in this config).
    for i in range(2):
        cin, c = num_inchannels[i], num_channels[i]
        # TODO(synk): support the 1x1 downsample path when cin != c.
        assert cin == c, "BasicBlock downsample path not implemented"
        walls, scales, biases = [], [], []
        for _ in range(num_blocks[i]):
            for _ in range(2):
                w = make_conv_w(nk(), 3, 3, c, c)
                s, b = make_bn_params(nk(), c)
                walls.append(_tapstack(w))
                scales.append(s.reshape(c, 1))
                biases.append(b.reshape(c, 1))
        params[f"w{i}"] = jnp.stack(walls).astype(jnp.bfloat16)   # (2*nb, 9c, c)
        params[f"s{i}"] = jnp.stack(scales)                       # (2*nb, c, 1)
        params[f"b{i}"] = jnp.stack(biases)

    c0, c1 = num_inchannels
    # fuse[0][1]: 1x1 conv C1->C0 + BN (then bilinear upsample to branch-0 size)
    w01 = make_conv_w(nk(), 1, 1, c1, c0)
    s01, b01 = make_bn_params(nk(), c0)
    params["wf01"] = jnp.transpose(w01.reshape(c1, c0)).astype(jnp.bfloat16)
    params["sf01"] = s01.reshape(c0, 1)
    params["bf01"] = b01.reshape(c0, 1)
    # fuse[1][0]: 3x3 stride-2 conv C0->C1 + BN
    w10 = make_conv_w(nk(), 3, 3, c0, c1)
    s10, b10 = make_bn_params(nk(), c1)
    params["wf10"] = _tapstack(w10).astype(jnp.bfloat16)
    params["sf10"] = s10.reshape(c1, 1)
    params["bf10"] = b10.reshape(c1, 1)

    # Exact 0/1 spatial operators (bf16-exact) + f32 bilinear upsample operator.
    (H0, W0), (H1, W1) = spatial
    params["S0"] = jnp.asarray(_conv3x3_shift_ops(H0, W0, 1), jnp.bfloat16)
    params["S1"] = jnp.asarray(_conv3x3_shift_ops(H1, W1, 1), jnp.bfloat16)
    params["D10"] = jnp.asarray(_conv3x3_shift_ops(H0, W0, 2), jnp.bfloat16)
    params["U01"] = jnp.asarray(_bilinear_up_op(H1, W1, H0, W0), jnp.float32)
    return params


# ----------------------------------------------------------------------------
# main
# ----------------------------------------------------------------------------
if __name__ == "__main__":
    # Config: num_branches=2, BasicBlock, num_blocks=[1,1],
    # num_inchannels=[4,8], num_channels=[4,8], fuse_method='SUM',
    # multi_scale_output=True.
    num_blocks = [1, 1]
    num_inchannels = [4, 8]
    num_channels = [4, 8]
    N, H0, W0, H1, W1 = 2, 16, 16, 8, 8

    key = jax.random.PRNGKey(0)
    k_in0, k_in1, k_par = jax.random.split(key, 3)

    # PyTorch-style NCHW inputs: branch0 (2,4,16,16), branch1 (2,8,8,8)
    x0 = jax.random.normal(k_in0, (N, num_inchannels[0], H0, W0), jnp.float32)
    x1 = jax.random.normal(k_in1, (N, num_inchannels[1], H1, W1), jnp.float32)

    params = build_params(k_par, num_blocks, num_inchannels, num_channels,
                          [(H0, W0), (H1, W1)])

    fwd = jax.jit(lambda a, b, p: high_resolution_module_forward([a, b], p))
    outs = fwd(x0, x1, params)
    outs = [jax.block_until_ready(o) for o in outs]

    assert outs[0].shape == (N, num_inchannels[0], H0, W0), outs[0].shape
    assert outs[1].shape == (N, num_inchannels[1], H1, W1), outs[1].shape
    assert all(bool(jnp.all(jnp.isfinite(o))) for o in outs)
    assert all(bool(jnp.all(o >= 0.0)) for o in outs)   # final ReLU
    print("KERNEL_OK")
</pallas_src>

<mosaic_0001>
module attributes {stable_mosaic.version = 11 : i64} {
  func.func @kernel(%arg0: i32, %arg1: memref<1x4x256xf32, #tpu.memory_space<vmem>>, %arg2: memref<1x8x64xf32, #tpu.memory_space<vmem>>, %arg3: memref<9x256x256xbf16, #tpu.memory_space<vmem>>, %arg4: memref<9x64x64xbf16, #tpu.memory_space<vmem>>, %arg5: memref<9x256x64xbf16, #tpu.memory_space<vmem>>, %arg6: memref<64x256xf32, #tpu.memory_space<vmem>>, %arg7: memref<2x36x4xbf16, #tpu.memory_space<vmem>>, %arg8: memref<2x4x1xf32, #tpu.memory_space<vmem>>, %arg9: memref<2x4x1xf32, #tpu.memory_space<vmem>>, %arg10: memref<2x72x8xbf16, #tpu.memory_space<vmem>>, %arg11: memref<2x8x1xf32, #tpu.memory_space<vmem>>, %arg12: memref<2x8x1xf32, #tpu.memory_space<vmem>>, %arg13: memref<4x8xbf16, #tpu.memory_space<vmem>>, %arg14: memref<4x1xf32, #tpu.memory_space<vmem>>, %arg15: memref<4x1xf32, #tpu.memory_space<vmem>>, %arg16: memref<72x4xbf16, #tpu.memory_space<vmem>>, %arg17: memref<8x1xf32, #tpu.memory_space<vmem>>, %arg18: memref<8x1xf32, #tpu.memory_space<vmem>>, %arg19: memref<1x4x256xf32, #tpu.memory_space<vmem>>, %arg20: memref<1x8x64xf32, #tpu.memory_space<vmem>>) attributes {dimension_semantics = [#tpu.dimension_semantics<parallel>], iteration_bounds = array<i64: 2>, scalar_prefetch = 0 : i64, scratch_operands = 0 : i64, tpu.core_type = #tpu.core_type<tc>, window_params = [{transform_indices = @transform_0, window_bounds = array<i64: 1, 4, 256>}, {transform_indices = @transform_1, window_bounds = array<i64: 1, 8, 64>}, {pipeline_mode = #tpu.pipeline_mode<synchronous>, transform_indices = @transform_2, window_bounds = array<i64: 9, 256, 256>}, {pipeline_mode = #tpu.pipeline_mode<synchronous>, transform_indices = @transform_3, window_bounds = array<i64: 9, 64, 64>}, {pipeline_mode = #tpu.pipeline_mode<synchronous>, transform_indices = @transform_4, window_bounds = array<i64: 9, 256, 64>}, {pipeline_mode = #tpu.pipeline_mode<synchronous>, transform_indices = @transform_5, window_bounds = array<i64: 64, 256>}, {pipeline_mode = #tpu.pipeline_mode<synchronous>, transform_indices = @transform_6, window_bounds = array<i64: 2, 36, 4>}, {pipeline_mode = #tpu.pipeline_mode<synchronous>, transform_indices = @transform_7, window_bounds = array<i64: 2, 4, 1>}, {pipeline_mode = #tpu.pipeline_mode<synchronous>, transform_indices = @transform_8, window_bounds = array<i64: 2, 4, 1>}, {pipeline_mode = #tpu.pipeline_mode<synchronous>, transform_indices = @transform_9, window_bounds = array<i64: 2, 72, 8>}, {pipeline_mode = #tpu.pipeline_mode<synchronous>, transform_indices = @transform_10, window_bounds = array<i64: 2, 8, 1>}, {pipeline_mode = #tpu.pipeline_mode<synchronous>, transform_indices = @transform_11, window_bounds = array<i64: 2, 8, 1>}, {pipeline_mode = #tpu.pipeline_mode<synchronous>, transform_indices = @transform_12, window_bounds = array<i64: 4, 8>}, {pipeline_mode = #tpu.pipeline_mode<synchronous>, transform_indices = @transform_13, window_bounds = array<i64: 4, 1>}, {pipeline_mode = #tpu.pipeline_mode<synchronous>, transform_indices = @transform_14, window_bounds = array<i64: 4, 1>}, {pipeline_mode = #tpu.pipeline_mode<synchronous>, transform_indices = @transform_15, window_bounds = array<i64: 72, 4>}, {pipeline_mode = #tpu.pipeline_mode<synchronous>, transform_indices = @transform_16, window_bounds = array<i64: 8, 1>}, {pipeline_mode = #tpu.pipeline_mode<synchronous>, transform_indices = @transform_17, window_bounds = array<i64: 8, 1>}, {transform_indices = @transform_18, window_bounds = array<i64: 1, 4, 256>}, {transform_indices = @transform_19, window_bounds = array<i64: 1, 8, 64>}]} {
    %c0 = arith.constant 0 : index
    %c0_0 = arith.constant 0 : index
    %c0_1 = arith.constant 0 : index
    %0 = vector.load %arg1[%c0, %c0_0, %c0_1] : memref<1x4x256xf32, #tpu.memory_space<vmem>>, vector<1x4x256xf32>
    %1 = vector.shape_cast %0 : vector<1x4x256xf32> to vector<4x256xf32>
    %c0_2 = arith.constant 0 : index
    %c0_3 = arith.constant 0 : index
    %c0_4 = arith.constant 0 : index
    %2 = vector.load %arg2[%c0_2, %c0_3, %c0_4] : memref<1x8x64xf32, #tpu.memory_space<vmem>>, vector<1x8x64xf32>
    %3 = vector.shape_cast %2 : vector<1x8x64xf32> to vector<8x64xf32>
    %c0_5 = arith.constant 0 : index
    %c0_6 = arith.constant 0 : index
    %c0_7 = arith.constant 0 : index
    %4 = vector.load %arg7[%c0_5, %c0_6, %c0_7] : memref<2x36x4xbf16, #tpu.memory_space<vmem>>, vector<1x36x4xbf16>
    %5 = vector.shape_cast %4 : vector<1x36x4xbf16> to vector<36x4xbf16>
    %c0_8 = arith.constant 0 : index
    %c0_9 = arith.constant 0 : index
    %c0_10 = arith.constant 0 : index
    %6 = vector.load %arg8[%c0_8, %c0_9, %c0_10] : memref<2x4x1xf32, #tpu.memory_space<vmem>>, vector<1x4x1xf32>
    %7 = vector.shape_cast %6 : vector<1x4x1xf32> to vector<4x1xf32>
    %c0_11 = arith.constant 0 : index
    %c0_12 = arith.constant 0 : index
    %c0_13 = arith.constant 0 : index
    %8 = vector.load %arg9[%c0_11, %c0_12, %c0_13] : memref<2x4x1xf32, #tpu.memory_space<vmem>>, vector<1x4x1xf32>
    %9 = vector.shape_cast %8 : vector<1x4x1xf32> to vector<4x1xf32>
    %10 = arith.truncf %1 : vector<4x256xf32> to vector<4x256xbf16>
    %cst = arith.constant dense<0.000000e+00> : vector<36x256xf32>
    %11 = tpu.matmul %5, %10, %cst {dimension_numbers = #tpu.dot_dimension_numbers<[1], [0], [0], [1], [0, 0, 1, 1], [], []>} : vector<36x4xbf16>, vector<4x256xbf16>, vector<36x256xf32> -> vector<36x256xf32>
    %12 = arith.truncf %11 : vector<36x256xf32> to vector<36x256xbf16>
    %cst_14 = arith.constant 0.000000e+00 : f32
    %13 = vector.broadcast %cst_14 : f32 to vector<4x256xf32>
    %14 = vector.extract_strided_slice %12 {offsets = [0, 0], sizes = [4, 256], strides = [1, 1]} : vector<36x256xbf16> to vector<4x256xbf16>
    %c0_15 = arith.constant 0 : index
    %c0_16 = arith.constant 0 : index
    %c0_17 = arith.constant 0 : index
    %15 = vector.load %arg3[%c0_15, %c0_16, %c0_17] : memref<9x256x256xbf16, #tpu.memory_space<vmem>>, vector<1x256x256xbf16>
    %16 = vector.shape_cast %15 : vector<1x256x256xbf16> to vector<256x256xbf16>
    %cst_18 = arith.constant dense<0.000000e+00> : vector<4x256xf32>
    %17 = tpu.matmul %14, %16, %cst_18 {dimension_numbers = #tpu.dot_dimension_numbers<[1], [0], [0], [1], [0, 0, 1, 1], [], []>} : vector<4x256xbf16>, vector<256x256xbf16>, vector<4x256xf32> -> vector<4x256xf32>
    %18 = arith.addf %13, %17 : vector<4x256xf32>
    %19 = vector.extract_strided_slice %12 {offsets = [4, 0], sizes = [4, 256], strides = [1, 1]} : vector<36x256xbf16> to vector<4x256xbf16>
    %c1 = arith.constant 1 : index
    %c0_19 = arith.constant 0 : index
    %c0_20 = arith.constant 0 : index
    %20 = vector.load %arg3[%c1, %c0_19, %c0_20] : memref<9x256x256xbf16, #tpu.memory_space<vmem>>, vector<1x256x256xbf16>
    %21 = vector.shape_cast %20 : vector<1x256x256xbf16> to vector<256x256xbf16>
    %cst_21 = arith.constant dense<0.000000e+00> : vector<4x256xf32>
    %22 = tpu.matmul %19, %21, %cst_21 {dimension_numbers = #tpu.dot_dimension_numbers<[1], [0], [0], [1], [0, 0, 1, 1], [], []>} : vector<4x256xbf16>, vector<256x256xbf16>, vector<4x256xf32> -> vector<4x256xf32>
    %23 = arith.addf %18, %22 : vector<4x256xf32>
    %24 = vector.extract_strided_slice %12 {offsets = [8, 0], sizes = [4, 256], strides = [1, 1]} : vector<36x256xbf16> to vector<4x256xbf16>
    %c2 = arith.constant 2 : index
    %c0_22 = arith.constant 0 : index
    %c0_23 = arith.constant 0 : index
    %25 = vector.load %arg3[%c2, %c0_22, %c0_23] : memref<9x256x256xbf16, #tpu.memory_space<vmem>>, vector<1x256x256xbf16>
    %26 = vector.shape_cast %25 : vector<1x256x256xbf16> to vector<256x256xbf16>
    %cst_24 = arith.constant dense<0.000000e+00> : vector<4x256xf32>
    %27 = tpu.matmul %24, %26, %cst_24 {dimension_numbers = #tpu.dot_dimension_numbers<[1], [0], [0], [1], [0, 0, 1, 1], [], []>} : vector<4x256xbf16>, vector<256x256xbf16>, vector<4x256xf32> -> vector<4x256xf32>
    %28 = arith.addf %23, %27 : vector<4x256xf32>
    %29 = vector.extract_strided_slice %12 {offsets = [12, 0], sizes = [4, 256], strides = [1, 1]} : vector<36x256xbf16> to vector<4x256xbf16>
    %c3 = arith.constant 3 : index
    %c0_25 = arith.constant 0 : index
    %c0_26 = arith.constant 0 : index
    %30 = vector.load %arg3[%c3, %c0_25, %c0_26] : memref<9x256x256xbf16, #tpu.memory_space<vmem>>, vector<1x256x256xbf16>
    %31 = vector.shape_cast %30 : vector<1x256x256xbf16> to vector<256x256xbf16>
    %cst_27 = arith.constant dense<0.000000e+00> : vector<4x256xf32>
    %32 = tpu.matmul %29, %31, %cst_27 {dimension_numbers = #tpu.dot_dimension_numbers<[1], [0], [0], [1], [0, 0, 1, 1], [], []>} : vector<4x256xbf16>, vector<256x256xbf16>, vector<4x256xf32> -> vector<4x256xf32>
    %33 = arith.addf %28, %32 : vector<4x256xf32>
    %34 = vector.extract_strided_slice %12 {offsets = [16, 0], sizes = [4, 256], strides = [1, 1]} : vector<36x256xbf16> to vector<4x256xbf16>
    %c4 = arith.constant 4 : index
    %c0_28 = arith.constant 0 : index
    %c0_29 = arith.constant 0 : index
    %35 = vector.load %arg3[%c4, %c0_28, %c0_29] : memref<9x256x256xbf16, #tpu.memory_space<vmem>>, vector<1x256x256xbf16>
    %36 = vector.shape_cast %35 : vector<1x256x256xbf16> to vector<256x256xbf16>
    %cst_30 = arith.constant dense<0.000000e+00> : vector<4x256xf32>
    %37 = tpu.matmul %34, %36, %cst_30 {dimension_numbers = #tpu.dot_dimension_numbers<[1], [0], [0], [1], [0, 0, 1, 1], [], []>} : vector<4x256xbf16>, vector<256x256xbf16>, vector<4x256xf32> -> vector<4x256xf32>
    %38 = arith.addf %33, %37 : vector<4x256xf32>
    %39 = vector.extract_strided_slice %12 {offsets = [20, 0], sizes = [4, 256], strides = [1, 1]} : vector<36x256xbf16> to vector<4x256xbf16>
    %c5 = arith.constant 5 : index
    %c0_31 = arith.constant 0 : index
    %c0_32 = arith.constant 0 : index
    %40 = vector.load %arg3[%c5, %c0_31, %c0_32] : memref<9x256x256xbf16, #tpu.memory_space<vmem>>, vector<1x256x256xbf16>
    %41 = vector.shape_cast %40 : vector<1x256x256xbf16> to vector<256x256xbf16>
    %cst_33 = arith.constant dense<0.000000e+00> : vector<4x256xf32>
    %42 = tpu.matmul %39, %41, %cst_33 {dimension_numbers = #tpu.dot_dimension_numbers<[1], [0], [0], [1], [0, 0, 1, 1], [], []>} : vector<4x256xbf16>, vector<256x256xbf16>, vector<4x256xf32> -> vector<4x256xf32>
    %43 = arith.addf %38, %42 : vector<4x256xf32>
    %44 = vector.extract_strided_slice %12 {offsets = [24, 0], sizes = [4, 256], strides = [1, 1]} : vector<36x256xbf16> to vector<4x256xbf16>
    %c6 = arith.constant 6 : index
    %c0_34 = arith.constant 0 : index
    %c0_35 = arith.constant 0 : index
    %45 = vector.load %arg3[%c6, %c0_34, %c0_35] : memref<9x256x256xbf16, #tpu.memory_space<vmem>>, vector<1x256x256xbf16>
    %46 = vector.shape_cast %45 : vector<1x256x256xbf16> to vector<256x256xbf16>
    %cst_36 = arith.constant dense<0.000000e+00> : vector<4x256xf32>
    %47 = tpu.matmul %44, %46, %cst_36 {dimension_numbers = #tpu.dot_dimension_numbers<[1], [0], [0], [1], [0, 0, 1, 1], [], []>} : vector<4x256xbf16>, vector<256x256xbf16>, vector<4x256xf32> -> vector<4x256xf32>
    %48 = arith.addf %43, %47 : vector<4x256xf32>
    %49 = vector.extract_strided_slice %12 {offsets = [28, 0], sizes = [4, 256], strides = [1, 1]} : vector<36x256xbf16> to vector<4x256xbf16>
    %c7 = arith.constant 7 : index
    %c0_37 = arith.constant 0 : index
    %c0_38 = arith.constant 0 : index
    %50 = vector.load %arg3[%c7, %c0_37, %c0_38] : memref<9x256x256xbf16, #tpu.memory_space<vmem>>, vector<1x256x256xbf16>
    %51 = vector.shape_cast %50 : vector<1x256x256xbf16> to vector<256x256xbf16>
    %cst_39 = arith.constant dense<0.000000e+00> : vector<4x256xf32>
    %52 = tpu.matmul %49, %51, %cst_39 {dimension_numbers = #tpu.dot_dimension_numbers<[1], [0], [0], [1], [0, 0, 1, 1], [], []>} : vector<4x256xbf16>, vector<256x256xbf16>, vector<4x256xf32> -> vector<4x256xf32>
    %53 = arith.addf %48, %52 : vector<4x256xf32>
    %54 = vector.extract_strided_slice %12 {offsets = [32, 0], sizes = [4, 256], strides = [1, 1]} : vector<36x256xbf16> to vector<4x256xbf16>
    %c8 = arith.constant 8 : index
    %c0_40 = arith.constant 0 : index
    %c0_41 = arith.constant 0 : index
    %55 = vector.load %arg3[%c8, %c0_40, %c0_41] : memref<9x256x256xbf16, #tpu.memory_space<vmem>>, vector<1x256x256xbf16>
    %56 = vector.shape_cast %55 : vector<1x256x256xbf16> to vector<256x256xbf16>
    %cst_42 = arith.constant dense<0.000000e+00> : vector<4x256xf32>
    %57 = tpu.matmul %54, %56, %cst_42 {dimension_numbers = #tpu.dot_dimension_numbers<[1], [0], [0], [1], [0, 0, 1, 1], [], []>} : vector<4x256xbf16>, vector<256x256xbf16>, vector<4x256xf32> -> vector<4x256xf32>
    %58 = arith.addf %53, %57 : vector<4x256xf32>
    %59 = vector.broadcast %7 : vector<4x1xf32> to vector<4x256xf32>
    %60 = arith.mulf %58, %59 : vector<4x256xf32>
    %61 = vector.broadcast %9 : vector<4x1xf32> to vector<4x256xf32>
    %62 = arith.addf %60, %61 : vector<4x256xf32>
    %cst_43 = arith.constant 0.000000e+00 : f32
    %63 = vector.broadcast %cst_43 : f32 to vector<4x256xf32>
    %64 = arith.maximumf %62, %63 : vector<4x256xf32>
    %c1_44 = arith.constant 1 : index
    %c0_45 = arith.constant 0 : index
    %c0_46 = arith.constant 0 : index
    %65 = vector.load %arg7[%c1_44, %c0_45, %c0_46] : memref<2x36x4xbf16, #tpu.memory_space<vmem>>, vector<1x36x4xbf16>
    %66 = vector.shape_cast %65 : vector<1x36x4xbf16> to vector<36x4xbf16>
    %c1_47 = arith.constant 1 : index
    %c0_48 = arith.constant 0 : index
    %c0_49 = arith.constant 0 : index
    %67 = vector.load %arg8[%c1_47, %c0_48, %c0_49] : memref<2x4x1xf32, #tpu.memory_space<vmem>>, vector<1x4x1xf32>
    %68 = vector.shape_cast %67 : vector<1x4x1xf32> to vector<4x1xf32>
    %c1_50 = arith.constant 1 : index
    %c0_51 = arith.constant 0 : index
    %c0_52 = arith.constant 0 : index
    %69 = vector.load %arg9[%c1_50, %c0_51, %c0_52] : memref<2x4x1xf32, #tpu.memory_space<vmem>>, vector<1x4x1xf32>
    %70 = vector.shape_cast %69 : vector<1x4x1xf32> to vector<4x1xf32>
    %71 = arith.truncf %64 : vector<4x256xf32> to vector<4x256xbf16>
    %cst_53 = arith.constant dense<0.000000e+00> : vector<36x256xf32>
    %72 = tpu.matmul %66, %71, %cst_53 {dimension_numbers = #tpu.dot_dimension_numbers<[1], [0], [0], [1], [0, 0, 1, 1], [], []>} : vector<36x4xbf16>, vector<4x256xbf16>, vector<36x256xf32> -> vector<36x256xf32>
    %73 = arith.truncf %72 : vector<36x256xf32> to vector<36x256xbf16>
    %cst_54 = arith.constant 0.000000e+00 : f32
    %74 = vector.broadcast %cst_54 : f32 to vector<4x256xf32>
    %75 = vector.extract_strided_slice %73 {offsets = [0, 0], sizes = [4, 256], strides = [1, 1]} : vector<36x256xbf16> to vector<4x256xbf16>
    %c0_55 = arith.constant 0 : index
    %c0_56 = arith.constant 0 : index
    %c0_57 = arith.constant 0 : index
    %76 = vector.load %arg3[%c0_55, %c0_56, %c0_57] : memref<9x256x256xbf16, #tpu.memory_space<vmem>>, vector<1x256x256xbf16>
    %77 = vector.shape_cast %76 : vector<1x256x256xbf16> to vector<256x256xbf16>
    %cst_58 = arith.constant dense<0.000000e+00> : vector<4x256xf32>
    %78 = tpu.matmul %75, %77, %cst_58 {dimension_numbers = #tpu.dot_dimension_numbers<[1], [0], [0], [1], [0, 0, 1, 1], [], []>} : vector<4x256xbf16>, vector<256x256xbf16>, vector<4x256xf32> -> vector<4x256xf32>
    %79 = arith.addf %74, %78 : vector<4x256xf32>
    %80 = vector.extract_strided_slice %73 {offsets = [4, 0], sizes = [4, 256], strides = [1, 1]} : vector<36x256xbf16> to vector<4x256xbf16>
    %c1_59 = arith.constant 1 : index
    %c0_60 = arith.constant 0 : index
    %c0_61 = arith.constant 0 : index
    %81 = vector.load %arg3[%c1_59, %c0_60, %c0_61] : memref<9x256x256xbf16, #tpu.memory_space<vmem>>, vector<1x256x256xbf16>
    %82 = vector.shape_cast %81 : vector<1x256x256xbf16> to vector<256x256xbf16>
    %cst_62 = arith.constant dense<0.000000e+00> : vector<4x256xf32>
    %83 = tpu.matmul %80, %82, %cst_62 {dimension_numbers = #tpu.dot_dimension_numbers<[1], [0], [0], [1], [0, 0, 1, 1], [], []>} : vector<4x256xbf16>, vector<256x256xbf16>, vector<4x256xf32> -> vector<4x256xf32>
    %84 = arith.addf %79, %83 : vector<4x256xf32>
    %85 = vector.extract_strided_slice %73 {offsets = [8, 0], sizes = [4, 256], strides = [1, 1]} : vector<36x256xbf16> to vector<4x256xbf16>
    %c2_63 = arith.constant 2 : index
    %c0_64 = arith.constant 0 : index
    %c0_65 = arith.constant 0 : index
    %86 = vector.load %arg3[%c2_63, %c0_64, %c0_65] : memref<9x256x256xbf16, #tpu.memory_space<vmem>>, vector<1x256x256xbf16>
    %87 = vector.shape_cast %86 : vector<1x256x256xbf16> to vector<256x256xbf16>
    %cst_66 = arith.constant dense<0.000000e+00> : vector<4x256xf32>
    %88 = tpu.matmul %85, %87, %cst_66 {dimension_numbers = #tpu.dot_dimension_numbers<[1], [0], [0], [1], [0, 0, 1, 1], [], []>} : vector<4x256xbf16>, vector<256x256xbf16>, vector<4x256xf32> -> vector<4x256xf32>
    %89 = arith.addf %84, %88 : vector<4x256xf32>
    %90 = vector.extract_strided_slice %73 {offsets = [12, 0], sizes = [4, 256], strides = [1, 1]} : vector<36x256xbf16> to vector<4x256xbf16>
    %c3_67 = arith.constant 3 : index
    %c0_68 = arith.constant 0 : index
    %c0_69 = arith.constant 0 : index
    %91 = vector.load %arg3[%c3_67, %c0_68, %c0_69] : memref<9x256x256xbf16, #tpu.memory_space<vmem>>, vector<1x256x256xbf16>
    %92 = vector.shape_cast %91 : vector<1x256x256xbf16> to vector<256x256xbf16>
    %cst_70 = arith.constant dense<0.000000e+00> : vector<4x256xf32>
    %93 = tpu.matmul %90, %92, %cst_70 {dimension_numbers = #tpu.dot_dimension_numbers<[1], [0], [0], [1], [0, 0, 1, 1], [], []>} : vector<4x256xbf16>, vector<256x256xbf16>, vector<4x256xf32> -> vector<4x256xf32>
    %94 = arith.addf %89, %93 : vector<4x256xf32>
    %95 = vector.extract_strided_slice %73 {offsets = [16, 0], sizes = [4, 256], strides = [1, 1]} : vector<36x256xbf16> to vector<4x256xbf16>
    %c4_71 = arith.constant 4 : index
    %c0_72 = arith.constant 0 : index
    %c0_73 = arith.constant 0 : index
    %96 = vector.load %arg3[%c4_71, %c0_72, %c0_73] : memref<9x256x256xbf16, #tpu.memory_space<vmem>>, vector<1x256x256xbf16>
    %97 = vector.shape_cast %96 : vector<1x256x256xbf16> to vector<256x256xbf16>
    %cst_74 = arith.constant dense<0.000000e+00> : vector<4x256xf32>
    %98 = tpu.matmul %95, %97, %cst_74 {dimension_numbers = #tpu.dot_dimension_numbers<[1], [0], [0], [1], [0, 0, 1, 1], [], []>} : vector<4x256xbf16>, vector<256x256xbf16>, vector<4x256xf32> -> vector<4x256xf32>
    %99 = arith.addf %94, %98 : vector<4x256xf32>
    %100 = vector.extract_strided_slice %73 {offsets = [20, 0], sizes = [4, 256], strides = [1, 1]} : vector<36x256xbf16> to vector<4x256xbf16>
    %c5_75 = arith.constant 5 : index
    %c0_76 = arith.constant 0 : index
    %c0_77 = arith.constant 0 : index
    %101 = vector.load %arg3[%c5_75, %c0_76, %c0_77] : memref<9x256x256xbf16, #tpu.memory_space<vmem>>, vector<1x256x256xbf16>
    %102 = vector.shape_cast %101 : vector<1x256x256xbf16> to vector<256x256xbf16>
    %cst_78 = arith.constant dense<0.000000e+00> : vector<4x256xf32>
    %103 = tpu.matmul %100, %102, %cst_78 {dimension_numbers = #tpu.dot_dimension_numbers<[1], [0], [0], [1], [0, 0, 1, 1], [], []>} : vector<4x256xbf16>, vector<256x256xbf16>, vector<4x256xf32> -> vector<4x256xf32>
    %104 = arith.addf %99, %103 : vector<4x256xf32>
    %105 = vector.extract_strided_slice %73 {offsets = [24, 0], sizes = [4, 256], strides = [1, 1]} : vector<36x256xbf16> to vector<4x256xbf16>
    %c6_79 = arith.constant 6 : index
    %c0_80 = arith.constant 0 : index
    %c0_81 = arith.constant 0 : index
    %106 = vector.load %arg3[%c6_79, %c0_80, %c0_81] : memref<9x256x256xbf16, #tpu.memory_space<vmem>>, vector<1x256x256xbf16>
    %107 = vector.shape_cast %106 : vector<1x256x256xbf16> to vector<256x256xbf16>
    %cst_82 = arith.constant dense<0.000000e+00> : vector<4x256xf32>
    %108 = tpu.matmul %105, %107, %cst_82 {dimension_numbers = #tpu.dot_dimension_numbers<[1], [0], [0], [1], [0, 0, 1, 1], [], []>} : vector<4x256xbf16>, vector<256x256xbf16>, vector<4x256xf32> -> vector<4x256xf32>
    %109 = arith.addf %104, %108 : vector<4x256xf32>
    %110 = vector.extract_strided_slice %73 {offsets = [28, 0], sizes = [4, 256], strides = [1, 1]} : vector<36x256xbf16> to vector<4x256xbf16>
    %c7_83 = arith.constant 7 : index
    %c0_84 = arith.constant 0 : index
    %c0_85 = arith.constant 0 : index
    %111 = vector.load %arg3[%c7_83, %c0_84, %c0_85] : memref<9x256x256xbf16, #tpu.memory_space<vmem>>, vector<1x256x256xbf16>
    %112 = vector.shape_cast %111 : vector<1x256x256xbf16> to vector<256x256xbf16>
    %cst_86 = arith.constant dense<0.000000e+00> : vector<4x256xf32>
    %113 = tpu.matmul %110, %112, %cst_86 {dimension_numbers = #tpu.dot_dimension_numbers<[1], [0], [0], [1], [0, 0, 1, 1], [], []>} : vector<4x256xbf16>, vector<256x256xbf16>, vector<4x256xf32> -> vector<4x256xf32>
    %114 = arith.addf %109, %113 : vector<4x256xf32>
    %115 = vector.extract_strided_slice %73 {offsets = [32, 0], sizes = [4, 256], strides = [1, 1]} : vector<36x256xbf16> to vector<4x256xbf16>
    %c8_87 = arith.constant 8 : index
    %c0_88 = arith.constant 0 : index
    %c0_89 = arith.constant 0 : index
    %116 = vector.load %arg3[%c8_87, %c0_88, %c0_89] : memref<9x256x256xbf16, #tpu.memory_space<vmem>>, vector<1x256x256xbf16>
    %117 = vector.shape_cast %116 : vector<1x256x256xbf16> to vector<256x256xbf16>
    %cst_90 = arith.constant dense<0.000000e+00> : vector<4x256xf32>
    %118 = tpu.matmul %115, %117, %cst_90 {dimension_numbers = #tpu.dot_dimension_numbers<[1], [0], [0], [1], [0, 0, 1, 1], [], []>} : vector<4x256xbf16>, vector<256x256xbf16>, vector<4x256xf32> -> vector<4x256xf32>
    %119 = arith.addf %114, %118 : vector<4x256xf32>
    %120 = vector.broadcast %68 : vector<4x1xf32> to vector<4x256xf32>
    %121 = arith.mulf %119, %120 : vector<4x256xf32>
    %122 = vector.broadcast %70 : vector<4x1xf32> to vector<4x256xf32>
    %123 = arith.addf %121, %122 : vector<4x256xf32>
    %124 = arith.addf %123, %1 : vector<4x256xf32>
    %cst_91 = arith.constant 0.000000e+00 : f32
    %125 = vector.broadcast %cst_91 : f32 to vector<4x256xf32>
    %126 = arith.maximumf %124, %125 : vector<4x256xf32>
    %c0_92 = arith.constant 0 : index
    %c0_93 = arith.constant 0 : index
    %c0_94 = arith.constant 0 : index
    %127 = vector.load %arg10[%c0_92, %c0_93, %c0_94] : memref<2x72x8xbf16, #tpu.memory_space<vmem>>, vector<1x72x8xbf16>
    %128 = vector.shape_cast %127 : vector<1x72x8xbf16> to vector<72x8xbf16>
    %c0_95 = arith.constant 0 : index
    %c0_96 = arith.constant 0 : index
    %c0_97 = arith.constant 0 : index
    %129 = vector.load %arg11[%c0_95, %c0_96, %c0_97] : memref<2x8x1xf32, #tpu.memory_space<vmem>>, vector<1x8x1xf32>
    %130 = vector.shape_cast %129 : vector<1x8x1xf32> to vector<8x1xf32>
    %c0_98 = arith.constant 0 : index
    %c0_99 = arith.constant 0 : index
    %c0_100 = arith.constant 0 : index
    %131 = vector.load %arg12[%c0_98, %c0_99, %c0_100] : memref<2x8x1xf32, #tpu.memory_space<vmem>>, vector<1x8x1xf32>
    %132 = vector.shape_cast %131 : vector<1x8x1xf32> to vector<8x1xf32>
    %133 = arith.truncf %3 : vector<8x64xf32> to vector<8x64xbf16>
    %cst_101 = arith.constant dense<0.000000e+00> : vector<72x64xf32>
    %134 = tpu.matmul %128, %133, %cst_101 {dimension_numbers = #tpu.dot_dimension_numbers<[1], [0], [0], [1], [0, 0, 1, 1], [], []>} : vector<72x8xbf16>, vector<8x64xbf16>, vector<72x64xf32> -> vector<72x64xf32>
    %135 = arith.truncf %134 : vector<72x64xf32> to vector<72x64xbf16>
    %cst_102 = arith.constant 0.000000e+00 : f32
    %136 = vector.broadcast %cst_102 : f32 to vector<8x64xf32>
    %137 = vector.extract_strided_slice %135 {offsets = [0, 0], sizes = [8, 64], strides = [1, 1]} : vector<72x64xbf16> to vector<8x64xbf16>
    %c0_103 = arith.constant 0 : index
    %c0_104 = arith.constant 0 : index
    %c0_105 = arith.constant 0 : index
    %138 = vector.load %arg4[%c0_103, %c0_104, %c0_105] : memref<9x64x64xbf16, #tpu.memory_space<vmem>>, vector<1x64x64xbf16>
    %139 = vector.shape_cast %138 : vector<1x64x64xbf16> to vector<64x64xbf16>
    %cst_106 = arith.constant dense<0.000000e+00> : vector<8x64xf32>
    %140 = tpu.matmul %137, %139, %cst_106 {dimension_numbers = #tpu.dot_dimension_numbers<[1], [0], [0], [1], [0, 0, 1, 1], [], []>} : vector<8x64xbf16>, vector<64x64xbf16>, vector<8x64xf32> -> vector<8x64xf32>
    %141 = arith.addf %136, %140 : vector<8x64xf32>
    %142 = vector.extract_strided_slice %135 {offsets = [8, 0], sizes = [8, 64], strides = [1, 1]} : vector<72x64xbf16> to vector<8x64xbf16>
    %c1_107 = arith.constant 1 : index
    %c0_108 = arith.constant 0 : index
    %c0_109 = arith.constant 0 : index
    %143 = vector.load %arg4[%c1_107, %c0_108, %c0_109] : memref<9x64x64xbf16, #tpu.memory_space<vmem>>, vector<1x64x64xbf16>
    %144 = vector.shape_cast %143 : vector<1x64x64xbf16> to vector<64x64xbf16>
    %cst_110 = arith.constant dense<0.000000e+00> : vector<8x64xf32>
    %145 = tpu.matmul %142, %144, %cst_110 {dimension_numbers = #tpu.dot_dimension_numbers<[1], [0], [0], [1], [0, 0, 1, 1], [], []>} : vector<8x64xbf16>, vector<64x64xbf16>, vector<8x64xf32> -> vector<8x64xf32>
    %146 = arith.addf %141, %145 : vector<8x64xf32>
    %147 = vector.extract_strided_slice %135 {offsets = [16, 0], sizes = [8, 64], strides = [1, 1]} : vector<72x64xbf16> to vector<8x64xbf16>
    %c2_111 = arith.constant 2 : index
    %c0_112 = arith.constant 0 : index
    %c0_113 = arith.constant 0 : index
    %148 = vector.load %arg4[%c2_111, %c0_112, %c0_113] : memref<9x64x64xbf16, #tpu.memory_space<vmem>>, vector<1x64x64xbf16>
    %149 = vector.shape_cast %148 : vector<1x64x64xbf16> to vector<64x64xbf16>
    %cst_114 = arith.constant dense<0.000000e+00> : vector<8x64xf32>
    %150 = tpu.matmul %147, %149, %cst_114 {dimension_numbers = #tpu.dot_dimension_numbers<[1], [0], [0], [1], [0, 0, 1, 1], [], []>} : vector<8x64xbf16>, vector<64x64xbf16>, vector<8x64xf32> -> vector<8x64xf32>
    %151 = arith.addf %146, %150 : vector<8x64xf32>
    %152 = vector.extract_strided_slice %135 {offsets = [24, 0], sizes = [8, 64], strides = [1, 1]} : vector<72x64xbf16> to vector<8x64xbf16>
    %c3_115 = arith.constant 3 : index
    %c0_116 = arith.constant 0 : index
    %c0_117 = arith.constant 0 : index
    %153 = vector.load %arg4[%c3_115, %c0_116, %c0_117] : memref<9x64x64xbf16, #tpu.memory_space<vmem>>, vector<1x64x64xbf16>
    %154 = vector.shape_cast %153 : vector<1x64x64xbf16> to vector<64x64xbf16>
    %cst_118 = arith.constant dense<0.000000e+00> : vector<8x64xf32>
    %155 = tpu.matmul %152, %154, %cst_118 {dimension_numbers = #tpu.dot_dimension_numbers<[1], [0], [0], [1], [0, 0, 1, 1], [], []>} : vector<8x64xbf16>, vector<64x64xbf16>, vector<8x64xf32> -> vector<8x64xf32>
    %156 = arith.addf %151, %155 : vector<8x64xf32>
    %157 = vector.extract_strided_slice %135 {offsets = [32, 0], sizes = [8, 64], strides = [1, 1]} : vector<72x64xbf16> to vector<8x64xbf16>
    %c4_119 = arith.constant 4 : index
    %c0_120 = arith.constant 0 : index
    %c0_121 = arith.constant 0 : index
    %158 = vector.load %arg4[%c4_119, %c0_120, %c0_121] : memref<9x64x64xbf16, #tpu.memory_space<vmem>>, vector<1x64x64xbf16>
    %159 = vector.shape_cast %158 : vector<1x64x64xbf16> to vector<64x64xbf16>
    %cst_122 = arith.constant dense<0.000000e+00> : vector<8x64xf32>
    %160 = tpu.matmul %157, %159, %cst_122 {dimension_numbers = #tpu.dot_dimension_numbers<[1], [0], [0], [1], [0, 0, 1, 1], [], []>} : vector<8x64xbf16>, vector<64x64xbf16>, vector<8x64xf32> -> vector<8x64xf32>
    %161 = arith.addf %156, %160 : vector<8x64xf32>
    %162 = vector.extract_strided_slice %135 {offsets = [40, 0], sizes = [8, 64], strides = [1, 1]} : vector<72x64xbf16> to vector<8x64xbf16>
    %c5_123 = arith.constant 5 : index
    %c0_124 = arith.constant 0 : index
    %c0_125 = arith.constant 0 : index
    %163 = vector.load %arg4[%c5_123, %c0_124, %c0_125] : memref<9x64x64xbf16, #tpu.memory_space<vmem>>, vector<1x64x64xbf16>
    %164 = vector.shape_cast %163 : vector<1x64x64xbf16> to vector<64x64xbf16>
    %cst_126 = arith.constant dense<0.000000e+00> : vector<8x64xf32>
    %165 = tpu.matmul %162, %164, %cst_126 {dimension_numbers = #tpu.dot_dimension_numbers<[1], [0], [0], [1], [0, 0, 1, 1], [], []>} : vector<8x64xbf16>, vector<64x64xbf16>, vector<8x64xf32> -> vector<8x64xf32>
    %166 = arith.addf %161, %165 : vector<8x64xf32>
    %167 = vector.extract_strided_slice %135 {offsets = [48, 0], sizes = [8, 64], strides = [1, 1]} : vector<72x64xbf16> to vector<8x64xbf16>
    %c6_127 = arith.constant 6 : index
    %c0_128 = arith.constant 0 : index
    %c0_129 = arith.constant 0 : index
    %168 = vector.load %arg4[%c6_127, %c0_128, %c0_129] : memref<9x64x64xbf16, #tpu.memory_space<vmem>>, vector<1x64x64xbf16>
    %169 = vector.shape_cast %168 : vector<1x64x64xbf16> to vector<64x64xbf16>
    %cst_130 = arith.constant dense<0.000000e+00> : vector<8x64xf32>
    %170 = tpu.matmul %167, %169, %cst_130 {dimension_numbers = #tpu.dot_dimension_numbers<[1], [0], [0], [1], [0, 0, 1, 1], [], []>} : vector<8x64xbf16>, vector<64x64xbf16>, vector<8x64xf32> -> vector<8x64xf32>
    %171 = arith.addf %166, %170 : vector<8x64xf32>
    %172 = vector.extract_strided_slice %135 {offsets = [56, 0], sizes = [8, 64], strides = [1, 1]} : vector<72x64xbf16> to vector<8x64xbf16>
    %c7_131 = arith.constant 7 : index
    %c0_132 = arith.constant 0 : index
    %c0_133 = arith.constant 0 : index
    %173 = vector.load %arg4[%c7_131, %c0_132, %c0_133] : memref<9x64x64xbf16, #tpu.memory_space<vmem>>, vector<1x64x64xbf16>
    %174 = vector.shape_cast %173 : vector<1x64x64xbf16> to vector<64x64xbf16>
    %cst_134 = arith.constant dense<0.000000e+00> : vector<8x64xf32>
    %175 = tpu.matmul %172, %174, %cst_134 {dimension_numbers = #tpu.dot_dimension_numbers<[1], [0], [0], [1], [0, 0, 1, 1], [], []>} : vector<8x64xbf16>, vector<64x64xbf16>, vector<8x64xf32> -> vector<8x64xf32>
    %176 = arith.addf %171, %175 : vector<8x64xf32>
    %177 = vector.extract_strided_slice %135 {offsets = [64, 0], sizes = [8, 64], strides = [1, 1]} : vector<72x64xbf16> to vector<8x64xbf16>
    %c8_135 = arith.constant 8 : index
    %c0_136 = arith.constant 0 : index
    %c0_137 = arith.constant 0 : index
    %178 = vector.load %arg4[%c8_135, %c0_136, %c0_137] : memref<9x64x64xbf16, #tpu.memory_space<vmem>>, vector<1x64x64xbf16>
    %179 = vector.shape_cast %178 : vector<1x64x64xbf16> to vector<64x64xbf16>
    %cst_138 = arith.constant dense<0.000000e+00> : vector<8x64xf32>
    %180 = tpu.matmul %177, %179, %cst_138 {dimension_numbers = #tpu.dot_dimension_numbers<[1], [0], [0], [1], [0, 0, 1, 1], [], []>} : vector<8x64xbf16>, vector<64x64xbf16>, vector<8x64xf32> -> vector<8x64xf32>
    %181 = arith.addf %176, %180 : vector<8x64xf32>
    %182 = vector.broadcast %130 : vector<8x1xf32> to vector<8x64xf32>
    %183 = arith.mulf %181, %182 : vector<8x64xf32>
    %184 = vector.broadcast %132 : vector<8x1xf32> to vector<8x64xf32>
    %185 = arith.addf %183, %184 : vector<8x64xf32>
    %cst_139 = arith.constant 0.000000e+00 : f32
    %186 = vector.broadcast %cst_139 : f32 to vector<8x64xf32>
    %187 = arith.maximumf %185, %186 : vector<8x64xf32>
    %c1_140 = arith.constant 1 : index
    %c0_141 = arith.constant 0 : index
    %c0_142 = arith.constant 0 : index
    %188 = vector.load %arg10[%c1_140, %c0_141, %c0_142] : memref<2x72x8xbf16, #tpu.memory_space<vmem>>, vector<1x72x8xbf16>
    %189 = vector.shape_cast %188 : vector<1x72x8xbf16> to vector<72x8xbf16>
    %c1_143 = arith.constant 1 : index
    %c0_144 = arith.constant 0 : index
    %c0_145 = arith.constant 0 : index
    %190 = vector.load %arg11[%c1_143, %c0_144, %c0_145] : memref<2x8x1xf32, #tpu.memory_space<vmem>>, vector<1x8x1xf32>
    %191 = vector.shape_cast %190 : vector<1x8x1xf32> to vector<8x1xf32>
    %c1_146 = arith.constant 1 : index
    %c0_147 = arith.constant 0 : index
    %c0_148 = arith.constant 0 : index
    %192 = vector.load %arg12[%c1_146, %c0_147, %c0_148] : memref<2x8x1xf32, #tpu.memory_space<vmem>>, vector<1x8x1xf32>
    %193 = vector.shape_cast %192 : vector<1x8x1xf32> to vector<8x1xf32>
    %194 = arith.truncf %187 : vector<8x64xf32> to vector<8x64xbf16>
    %cst_149 = arith.constant dense<0.000000e+00> : vector<72x64xf32>
    %195 = tpu.matmul %189, %194, %cst_149 {dimension_numbers = #tpu.dot_dimension_numbers<[1], [0], [0], [1], [0, 0, 1, 1], [], []>} : vector<72x8xbf16>, vector<8x64xbf16>, vector<72x64xf32> -> vector<72x64xf32>
    %196 = arith.truncf %195 : vector<72x64xf32> to vector<72x64xbf16>
    %cst_150 = arith.constant 0.000000e+00 : f32
    %197 = vector.broadcast %cst_150 : f32 to vector<8x64xf32>
    %198 = vector.extract_strided_slice %196 {offsets = [0, 0], sizes = [8, 64], strides = [1, 1]} : vector<72x64xbf16> to vector<8x64xbf16>
    %c0_151 = arith.constant 0 : index
    %c0_152 = arith.constant 0 : index
    %c0_153 = arith.constant 0 : index
    %199 = vector.load %arg4[%c0_151, %c0_152, %c0_153] : memref<9x64x64xbf16, #tpu.memory_space<vmem>>, vector<1x64x64xbf16>
    %200 = vector.shape_cast %199 : vector<1x64x64xbf16> to vector<64x64xbf16>
    %cst_154 = arith.constant dense<0.000000e+00> : vector<8x64xf32>
    %201 = tpu.matmul %198, %200, %cst_154 {dimension_numbers = #tpu.dot_dimension_numbers<[1], [0], [0], [1], [0, 0, 1, 1], [], []>} : vector<8x64xbf16>, vector<64x64xbf16>, vector<8x64xf32> -> vector<8x64xf32>
    %202 = arith.addf %197, %201 : vector<8x64xf32>
    %203 = vector.extract_strided_slice %196 {offsets = [8, 0], sizes = [8, 64], strides = [1, 1]} : vector<72x64xbf16> to vector<8x64xbf16>
    %c1_155 = arith.constant 1 : index
    %c0_156 = arith.constant 0 : index
    %c0_157 = arith.constant 0 : index
    %204 = vector.load %arg4[%c1_155, %c0_156, %c0_157] : memref<9x64x64xbf16, #tpu.memory_space<vmem>>, vector<1x64x64xbf16>
    %205 = vector.shape_cast %204 : vector<1x64x64xbf16> to vector<64x64xbf16>
    %cst_158 = arith.constant dense<0.000000e+00> : vector<8x64xf32>
    %206 = tpu.matmul %203, %205, %cst_158 {dimension_numbers = #tpu.dot_dimension_numbers<[1], [0], [0], [1], [0, 0, 1, 1], [], []>} : vector<8x64xbf16>, vector<64x64xbf16>, vector<8x64xf32> -> vector<8x64xf32>
    %207 = arith.addf %202, %206 : vector<8x64xf32>
    %208 = vector.extract_strided_slice %196 {offsets = [16, 0], sizes = [8, 64], strides = [1, 1]} : vector<72x64xbf16> to vector<8x64xbf16>
    %c2_159 = arith.constant 2 : index
    %c0_160 = arith.constant 0 : index
    %c0_161 = arith.constant 0 : index
    %209 = vector.load %arg4[%c2_159, %c0_160, %c0_161] : memref<9x64x64xbf16, #tpu.memory_space<vmem>>, vector<1x64x64xbf16>
    %210 = vector.shape_cast %209 : vector<1x64x64xbf16> to vector<64x64xbf16>
    %cst_162 = arith.constant dense<0.000000e+00> : vector<8x64xf32>
    %211 = tpu.matmul %208, %210, %cst_162 {dimension_numbers = #tpu.dot_dimension_numbers<[1], [0], [0], [1], [0, 0, 1, 1], [], []>} : vector<8x64xbf16>, vector<64x64xbf16>, vector<8x64xf32> -> vector<8x64xf32>
    %212 = arith.addf %207, %211 : vector<8x64xf32>
    %213 = vector.extract_strided_slice %196 {offsets = [24, 0], sizes = [8, 64], strides = [1, 1]} : vector<72x64xbf16> to vector<8x64xbf16>
    %c3_163 = arith.constant 3 : index
    %c0_164 = arith.constant 0 : index
    %c0_165 = arith.constant 0 : index
    %214 = vector.load %arg4[%c3_163, %c0_164, %c0_165] : memref<9x64x64xbf16, #tpu.memory_space<vmem>>, vector<1x64x64xbf16>
    %215 = vector.shape_cast %214 : vector<1x64x64xbf16> to vector<64x64xbf16>
    %cst_166 = arith.constant dense<0.000000e+00> : vector<8x64xf32>
    %216 = tpu.matmul %213, %215, %cst_166 {dimension_numbers = #tpu.dot_dimension_numbers<[1], [0], [0], [1], [0, 0, 1, 1], [], []>} : vector<8x64xbf16>, vector<64x64xbf16>, vector<8x64xf32> -> vector<8x64xf32>
    %217 = arith.addf %212, %216 : vector<8x64xf32>
    %218 = vector.extract_strided_slice %196 {offsets = [32, 0], sizes = [8, 64], strides = [1, 1]} : vector<72x64xbf16> to vector<8x64xbf16>
    %c4_167 = arith.constant 4 : index
    %c0_168 = arith.constant 0 : index
    %c0_169 = arith.constant 0 : index
    %219 = vector.load %arg4[%c4_167, %c0_168, %c0_169] : memref<9x64x64xbf16, #tpu.memory_space<vmem>>, vector<1x64x64xbf16>
    %220 = vector.shape_cast %219 : vector<1x64x64xbf16> to vector<64x64xbf16>
    %cst_170 = arith.constant dense<0.000000e+00> : vector<8x64xf32>
    %221 = tpu.matmul %218, %220, %cst_170 {dimension_numbers = #tpu.dot_dimension_numbers<[1], [0], [0], [1], [0, 0, 1, 1], [], []>} : vector<8x64xbf16>, vector<64x64xbf16>, vector<8x64xf32> -> vector<8x64xf32>
    %222 = arith.addf %217, %221 : vector<8x64xf32>
    %223 = vector.extract_strided_slice %196 {offsets = [40, 0], sizes = [8, 64], strides = [1, 1]} : vector<72x64xbf16> to vector<8x64xbf16>
    %c5_171 = arith.constant 5 : index
    %c0_172 = arith.constant 0 : index
    %c0_173 = arith.constant 0 : index
    %224 = vector.load %arg4[%c5_171, %c0_172, %c0_173] : memref<9x64x64xbf16, #tpu.memory_space<vmem>>, vector<1x64x64xbf16>
    %225 = vector.shape_cast %224 : vector<1x64x64xbf16> to vector<64x64xbf16>
    %cst_174 = arith.constant dense<0.000000e+00> : vector<8x64xf32>
    %226 = tpu.matmul %223, %225, %cst_174 {dimension_numbers = #tpu.dot_dimension_numbers<[1], [0], [0], [1], [0, 0, 1, 1], [], []>} : vector<8x64xbf16>, vector<64x64xbf16>, vector<8x64xf32> -> vector<8x64xf32>
    %227 = arith.addf %222, %226 : vector<8x64xf32>
    %228 = vector.extract_strided_slice %196 {offsets = [48, 0], sizes = [8, 64], strides = [1, 1]} : vector<72x64xbf16> to vector<8x64xbf16>
    %c6_175 = arith.constant 6 : index
    %c0_176 = arith.constant 0 : index
    %c0_177 = arith.constant 0 : index
    %229 = vector.load %arg4[%c6_175, %c0_176, %c0_177] : memref<9x64x64xbf16, #tpu.memory_space<vmem>>, vector<1x64x64xbf16>
    %230 = vector.shape_cast %229 : vector<1x64x64xbf16> to vector<64x64xbf16>
    %cst_178 = arith.constant dense<0.000000e+00> : vector<8x64xf32>
    %231 = tpu.matmul %228, %230, %cst_178 {dimension_numbers = #tpu.dot_dimension_numbers<[1], [0], [0], [1], [0, 0, 1, 1], [], []>} : vector<8x64xbf16>, vector<64x64xbf16>, vector<8x64xf32> -> vector<8x64xf32>
    %232 = arith.addf %227, %231 : vector<8x64xf32>
    %233 = vector.extract_strided_slice %196 {offsets = [56, 0], sizes = [8, 64], strides = [1, 1]} : vector<72x64xbf16> to vector<8x64xbf16>
    %c7_179 = arith.constant 7 : index
    %c0_180 = arith.constant 0 : index
    %c0_181 = arith.constant 0 : index
    %234 = vector.load %arg4[%c7_179, %c0_180, %c0_181] : memref<9x64x64xbf16, #tpu.memory_space<vmem>>, vector<1x64x64xbf16>
    %235 = vector.shape_cast %234 : vector<1x64x64xbf16> to vector<64x64xbf16>
    %cst_182 = arith.constant dense<0.000000e+00> : vector<8x64xf32>
    %236 = tpu.matmul %233, %235, %cst_182 {dimension_numbers = #tpu.dot_dimension_numbers<[1], [0], [0], [1], [0, 0, 1, 1], [], []>} : vector<8x64xbf16>, vector<64x64xbf16>, vector<8x64xf32> -> vector<8x64xf32>
    %237 = arith.addf %232, %236 : vector<8x64xf32>
    %238 = vector.extract_strided_slice %196 {offsets = [64, 0], sizes = [8, 64], strides = [1, 1]} : vector<72x64xbf16> to vector<8x64xbf16>
    %c8_183 = arith.constant 8 : index
    %c0_184 = arith.constant 0 : index
    %c0_185 = arith.constant 0 : index
    %239 = vector.load %arg4[%c8_183, %c0_184, %c0_185] : memref<9x64x64xbf16, #tpu.memory_space<vmem>>, vector<1x64x64xbf16>
    %240 = vector.shape_cast %239 : vector<1x64x64xbf16> to vector<64x64xbf16>
    %cst_186 = arith.constant dense<0.000000e+00> : vector<8x64xf32>
    %241 = tpu.matmul %238, %240, %cst_186 {dimension_numbers = #tpu.dot_dimension_numbers<[1], [0], [0], [1], [0, 0, 1, 1], [], []>} : vector<8x64xbf16>, vector<64x64xbf16>, vector<8x64xf32> -> vector<8x64xf32>
    %242 = arith.addf %237, %241 : vector<8x64xf32>
    %243 = vector.broadcast %191 : vector<8x1xf32> to vector<8x64xf32>
    %244 = arith.mulf %242, %243 : vector<8x64xf32>
    %245 = vector.broadcast %193 : vector<8x1xf32> to vector<8x64xf32>
    %246 = arith.addf %244, %245 : vector<8x64xf32>
    %247 = arith.addf %246, %3 : vector<8x64xf32>
    %cst_187 = arith.constant 0.000000e+00 : f32
    %248 = vector.broadcast %cst_187 : f32 to vector<8x64xf32>
    %249 = arith.maximumf %247, %248 : vector<8x64xf32>
    %c0_188 = arith.constant 0 : index
    %c0_189 = arith.constant 0 : index
    %250 = vector.load %arg13[%c0_188, %c0_189] : memref<4x8xbf16, #tpu.memory_space<vmem>>, vector<4x8xbf16>
    %251 = arith.truncf %249 : vector<8x64xf32> to vector<8x64xbf16>
    %cst_190 = arith.constant dense<0.000000e+00> : vector<4x64xf32>
    %252 = tpu.matmul %250, %251, %cst_190 {dimension_numbers = #tpu.dot_dimension_numbers<[1], [0], [0], [1], [0, 0, 1, 1], [], []>} : vector<4x8xbf16>, vector<8x64xbf16>, vector<4x64xf32> -> vector<4x64xf32>
    %c0_191 = arith.constant 0 : index
    %c0_192 = arith.constant 0 : index
    %253 = vector.load %arg14[%c0_191, %c0_192] : memref<4x1xf32, #tpu.memory_space<vmem>>, vector<4x1xf32>
    %254 = vector.broadcast %253 : vector<4x1xf32> to vector<4x64xf32>
    %255 = arith.mulf %252, %254 : vector<4x64xf32>
    %c0_193 = arith.constant 0 : index
    %c0_194 = arith.constant 0 : index
    %256 = vector.load %arg15[%c0_193, %c0_194] : memref<4x1xf32, #tpu.memory_space<vmem>>, vector<4x1xf32>
    %257 = vector.broadcast %256 : vector<4x1xf32> to vector<4x64xf32>
    %258 = arith.addf %255, %257 : vector<4x64xf32>
    %c0_195 = arith.constant 0 : index
    %c0_196 = arith.constant 0 : index
    %259 = vector.load %arg6[%c0_195, %c0_196] : memref<64x256xf32, #tpu.memory_space<vmem>>, vector<64x256xf32>
    %cst_197 = arith.constant dense<0.000000e+00> : vector<4x256xf32>
    %260 = tpu.matmul %258, %259, %cst_197 {dimension_numbers = #tpu.dot_dimension_numbers<[1], [0], [0], [1], [0, 0, 1, 1], [], []>} : vector<4x64xf32>, vector<64x256xf32>, vector<4x256xf32> -> vector<4x256xf32>
    %261 = arith.addf %126, %260 : vector<4x256xf32>
    %cst_198 = arith.constant 0.000000e+00 : f32
    %262 = vector.broadcast %cst_198 : f32 to vector<4x256xf32>
    %263 = arith.maximumf %261, %262 : vector<4x256xf32>
    %c0_199 = arith.constant 0 : index
    %c0_200 = arith.constant 0 : index
    %c0_201 = arith.constant 0 : index
    %264 = vector.load %arg19[%c0_199, %c0_200, %c0_201] : memref<1x4x256xf32, #tpu.memory_space<vmem>>, vector<1x4x256xf32>
    %265 = vector.shape_cast %264 : vector<1x4x256xf32> to vector<4x256xf32>
    %266 = vector.shape_cast %263 : vector<4x256xf32> to vector<1x4x256xf32>
    tpu.vector_store %arg19[%c0_199, %c0_200, %c0_201], %266 {strides = array<i32>} : memref<1x4x256xf32, #tpu.memory_space<vmem>>, vector<1x4x256xf32>,
    %c0_202 = arith.constant 0 : index
    %c0_203 = arith.constant 0 : index
    %267 = vector.load %arg16[%c0_202, %c0_203] : memref<72x4xbf16, #tpu.memory_space<vmem>>, vector<72x4xbf16>
    %c0_204 = arith.constant 0 : index
    %c0_205 = arith.constant 0 : index
    %268 = vector.load %arg17[%c0_204, %c0_205] : memref<8x1xf32, #tpu.memory_space<vmem>>, vector<8x1xf32>
    %c0_206 = arith.constant 0 : index
    %c0_207 = arith.constant 0 : index
    %269 = vector.load %arg18[%c0_206, %c0_207] : memref<8x1xf32, #tpu.memory_space<vmem>>, vector<8x1xf32>
    %270 = arith.truncf %126 : vector<4x256xf32> to vector<4x256xbf16>
    %cst_208 = arith.constant dense<0.000000e+00> : vector<72x256xf32>
    %271 = tpu.matmul %267, %270, %cst_208 {dimension_numbers = #tpu.dot_dimension_numbers<[1], [0], [0], [1], [0, 0, 1, 1], [], []>} : vector<72x4xbf16>, vector<4x256xbf16>, vector<72x256xf32> -> vector<72x256xf32>
    %272 = arith.truncf %271 : vector<72x256xf32> to vector<72x256xbf16>
    %cst_209 = arith.constant 0.000000e+00 : f32
    %273 = vector.broadcast %cst_209 : f32 to vector<8x64xf32>
    %274 = vector.extract_strided_slice %272 {offsets = [0, 0], sizes = [8, 256], strides = [1, 1]} : vector<72x256xbf16> to vector<8x256xbf16>
    %c0_210 = arith.constant 0 : index
    %c0_211 = arith.constant 0 : index
    %c0_212 = arith.constant 0 : index
    %275 = vector.load %arg5[%c0_210, %c0_211, %c0_212] : memref<9x256x64xbf16, #tpu.memory_space<vmem>>, vector<1x256x64xbf16>
    %276 = vector.shape_cast %275 : vector<1x256x64xbf16> to vector<256x64xbf16>
    %cst_213 = arith.constant dense<0.000000e+00> : vector<8x64xf32>
    %277 = tpu.matmul %274, %276, %cst_213 {dimension_numbers = #tpu.dot_dimension_numbers<[1], [0], [0], [1], [0, 0, 1, 1], [], []>} : vector<8x256xbf16>, vector<256x64xbf16>, vector<8x64xf32> -> vector<8x64xf32>
    %278 = arith.addf %273, %277 : vector<8x64xf32>
    %279 = vector.extract_strided_slice %272 {offsets = [8, 0], sizes = [8, 256], strides = [1, 1]} : vector<72x256xbf16> to vector<8x256xbf16>
    %c1_214 = arith.constant 1 : index
    %c0_215 = arith.constant 0 : index
    %c0_216 = arith.constant 0 : index
    %280 = vector.load %arg5[%c1_214, %c0_215, %c0_216] : memref<9x256x64xbf16, #tpu.memory_space<vmem>>, vector<1x256x64xbf16>
    %281 = vector.shape_cast %280 : vector<1x256x64xbf16> to vector<256x64xbf16>
    %cst_217 = arith.constant dense<0.000000e+00> : vector<8x64xf32>
    %282 = tpu.matmul %279, %281, %cst_217 {dimension_numbers = #tpu.dot_dimension_numbers<[1], [0], [0], [1], [0, 0, 1, 1], [], []>} : vector<8x256xbf16>, vector<256x64xbf16>, vector<8x64xf32> -> vector<8x64xf32>
    %283 = arith.addf %278, %282 : vector<8x64xf32>
    %284 = vector.extract_strided_slice %272 {offsets = [16, 0], sizes = [8, 256], strides = [1, 1]} : vector<72x256xbf16> to vector<8x256xbf16>
    %c2_218 = arith.constant 2 : index
    %c0_219 = arith.constant 0 : index
    %c0_220 = arith.constant 0 : index
    %285 = vector.load %arg5[%c2_218, %c0_219, %c0_220] : memref<9x256x64xbf16, #tpu.memory_space<vmem>>, vector<1x256x64xbf16>
    %286 = vector.shape_cast %285 : vector<1x256x64xbf16> to vector<256x64xbf16>
    %cst_221 = arith.constant dense<0.000000e+00> : vector<8x64xf32>
    %287 = tpu.matmul %284, %286, %cst_221 {dimension_numbers = #tpu.dot_dimension_numbers<[1], [0], [0], [1], [0, 0, 1, 1], [], []>} : vector<8x256xbf16>, vector<256x64xbf16>, vector<8x64xf32> -> vector<8x64xf32>
    %288 = arith.addf %283, %287 : vector<8x64xf32>
    %289 = vector.extract_strided_slice %272 {offsets = [24, 0], sizes = [8, 256], strides = [1, 1]} : vector<72x256xbf16> to vector<8x256xbf16>
    %c3_222 = arith.constant 3 : index
    %c0_223 = arith.constant 0 : index
    %c0_224 = arith.constant 0 : index
    %290 = vector.load %arg5[%c3_222, %c0_223, %c0_224] : memref<9x256x64xbf16, #tpu.memory_space<vmem>>, vector<1x256x64xbf16>
    %291 = vector.shape_cast %290 : vector<1x256x64xbf16> to vector<256x64xbf16>
    %cst_225 = arith.constant dense<0.000000e+00> : vector<8x64xf32>
    %292 = tpu.matmul %289, %291, %cst_225 {dimension_numbers = #tpu.dot_dimension_numbers<[1], [0], [0], [1], [0, 0, 1, 1], [], []>} : vector<8x256xbf16>, vector<256x64xbf16>, vector<8x64xf32> -> vector<8x64xf32>
    %293 = arith.addf %288, %292 : vector<8x64xf32>
    %294 = vector.extract_strided_slice %272 {offsets = [32, 0], sizes = [8, 256], strides = [1, 1]} : vector<72x256xbf16> to vector<8x256xbf16>
    %c4_226 = arith.constant 4 : index
    %c0_227 = arith.constant 0 : index
    %c0_228 = arith.constant 0 : index
    %295 = vector.load %arg5[%c4_226, %c0_227, %c0_228] : memref<9x256x64xbf16, #tpu.memory_space<vmem>>, vector<1x256x64xbf16>
    %296 = vector.shape_cast %295 : vector<1x256x64xbf16> to vector<256x64xbf16>
    %cst_229 = arith.constant dense<0.000000e+00> : vector<8x64xf32>
    %297 = tpu.matmul %294, %296, %cst_229 {dimension_numbers = #tpu.dot_dimension_numbers<[1], [0], [0], [1], [0, 0, 1, 1], [], []>} : vector<8x256xbf16>, vector<256x64xbf16>, vector<8x64xf32> -> vector<8x64xf32>
    %298 = arith.addf %293, %297 : vector<8x64xf32>
    %299 = vector.extract_strided_slice %272 {offsets = [40, 0], sizes = [8, 256], strides = [1, 1]} : vector<72x256xbf16> to vector<8x256xbf16>
    %c5_230 = arith.constant 5 : index
    %c0_231 = arith.constant 0 : index
    %c0_232 = arith.constant 0 : index
    %300 = vector.load %arg5[%c5_230, %c0_231, %c0_232] : memref<9x256x64xbf16, #tpu.memory_space<vmem>>, vector<1x256x64xbf16>
    %301 = vector.shape_cast %300 : vector<1x256x64xbf16> to vector<256x64xbf16>
    %cst_233 = arith.constant dense<0.000000e+00> : vector<8x64xf32>
    %302 = tpu.matmul %299, %301, %cst_233 {dimension_numbers = #tpu.dot_dimension_numbers<[1], [0], [0], [1], [0, 0, 1, 1], [], []>} : vector<8x256xbf16>, vector<256x64xbf16>, vector<8x64xf32> -> vector<8x64xf32>
    %303 = arith.addf %298, %302 : vector<8x64xf32>
    %304 = vector.extract_strided_slice %272 {offsets = [48, 0], sizes = [8, 256], strides = [1, 1]} : vector<72x256xbf16> to vector<8x256xbf16>
    %c6_234 = arith.constant 6 : index
    %c0_235 = arith.constant 0 : index
    %c0_236 = arith.constant 0 : index
    %305 = vector.load %arg5[%c6_234, %c0_235, %c0_236] : memref<9x256x64xbf16, #tpu.memory_space<vmem>>, vector<1x256x64xbf16>
    %306 = vector.shape_cast %305 : vector<1x256x64xbf16> to vector<256x64xbf16>
    %cst_237 = arith.constant dense<0.000000e+00> : vector<8x64xf32>
    %307 = tpu.matmul %304, %306, %cst_237 {dimension_numbers = #tpu.dot_dimension_numbers<[1], [0], [0], [1], [0, 0, 1, 1], [], []>} : vector<8x256xbf16>, vector<256x64xbf16>, vector<8x64xf32> -> vector<8x64xf32>
    %308 = arith.addf %303, %307 : vector<8x64xf32>
    %309 = vector.extract_strided_slice %272 {offsets = [56, 0], sizes = [8, 256], strides = [1, 1]} : vector<72x256xbf16> to vector<8x256xbf16>
    %c7_238 = arith.constant 7 : index
    %c0_239 = arith.constant 0 : index
    %c0_240 = arith.constant 0 : index
    %310 = vector.load %arg5[%c7_238, %c0_239, %c0_240] : memref<9x256x64xbf16, #tpu.memory_space<vmem>>, vector<1x256x64xbf16>
    %311 = vector.shape_cast %310 : vector<1x256x64xbf16> to vector<256x64xbf16>
    %cst_241 = arith.constant dense<0.000000e+00> : vector<8x64xf32>
    %312 = tpu.matmul %309, %311, %cst_241 {dimension_numbers = #tpu.dot_dimension_numbers<[1], [0], [0], [1], [0, 0, 1, 1], [], []>} : vector<8x256xbf16>, vector<256x64xbf16>, vector<8x64xf32> -> vector<8x64xf32>
    %313 = arith.addf %308, %312 : vector<8x64xf32>
    %314 = vector.extract_strided_slice %272 {offsets = [64, 0], sizes = [8, 256], strides = [1, 1]} : vector<72x256xbf16> to vector<8x256xbf16>
    %c8_242 = arith.constant 8 : index
    %c0_243 = arith.constant 0 : index
    %c0_244 = arith.constant 0 : index
    %315 = vector.load %arg5[%c8_242, %c0_243, %c0_244] : memref<9x256x64xbf16, #tpu.memory_space<vmem>>, vector<1x256x64xbf16>
    %316 = vector.shape_cast %315 : vector<1x256x64xbf16> to vector<256x64xbf16>
    %cst_245 = arith.constant dense<0.000000e+00> : vector<8x64xf32>
    %317 = tpu.matmul %314, %316, %cst_245 {dimension_numbers = #tpu.dot_dimension_numbers<[1], [0], [0], [1], [0, 0, 1, 1], [], []>} : vector<8x256xbf16>, vector<256x64xbf16>, vector<8x64xf32> -> vector<8x64xf32>
    %318 = arith.addf %313, %317 : vector<8x64xf32>
    %319 = vector.broadcast %268 : vector<8x1xf32> to vector<8x64xf32>
    %320 = arith.mulf %318, %319 : vector<8x64xf32>
    %321 = vector.broadcast %269 : vector<8x1xf32> to vector<8x64xf32>
    %322 = arith.addf %320, %321 : vector<8x64xf32>
    %323 = arith.addf %322, %249 : vector<8x64xf32>
    %cst_246 = arith.constant 0.000000e+00 : f32
    %324 = vector.broadcast %cst_246 : f32 to vector<8x64xf32>
    %325 = arith.maximumf %323, %324 : vector<8x64xf32>
    %c0_247 = arith.constant 0 : index
    %c0_248 = arith.constant 0 : index
    %c0_249 = arith.constant 0 : index
    %326 = vector.load %arg20[%c0_247, %c0_248, %c0_249] : memref<1x8x64xf32, #tpu.memory_space<vmem>>, vector<1x8x64xf32>
    %327 = vector.shape_cast %326 : vector<1x8x64xf32> to vector<8x64xf32>
    %328 = vector.shape_cast %325 : vector<8x64xf32> to vector<1x8x64xf32>
    tpu.vector_store %arg20[%c0_247, %c0_248, %c0_249], %328 {strides = array<i32>} : memref<1x8x64xf32, #tpu.memory_space<vmem>>, vector<1x8x64xf32>,
    return
  }
  func.func @transform_0(%arg0: i32) -> (i32, i32, i32) {
    %c0_i32 = arith.constant 0 : i32
    %c0_i32_0 = arith.constant 0 : i32
    %c0_i32_1 = arith.constant 0 : i32
    return %arg0, %c0_i32, %c0_i32_0 : i32, i32, i32
  }
  func.func @transform_1(%arg0: i32) -> (i32, i32, i32) {
    %c0_i32 = arith.constant 0 : i32
    %c0_i32_0 = arith.constant 0 : i32
    %c0_i32_1 = arith.constant 0 : i32
    return %arg0, %c0_i32, %c0_i32_0 : i32, i32, i32
  }
  func.func @transform_2(%arg0: i32) -> (i32, i32, i32) {
    %c0_i32 = arith.constant 0 : i32
    %c0_i32_0 = arith.constant 0 : i32
    %c0_i32_1 = arith.constant 0 : i32
    %c0_i32_2 = arith.constant 0 : i32
    return %c0_i32, %c0_i32_0, %c0_i32_1 : i32, i32, i32
  }
  func.func @transform_3(%arg0: i32) -> (i32, i32, i32) {
    %c0_i32 = arith.constant 0 : i32
    %c0_i32_0 = arith.constant 0 : i32
    %c0_i32_1 = arith.constant 0 : i32
    %c0_i32_2 = arith.constant 0 : i32
    return %c0_i32, %c0_i32_0, %c0_i32_1 : i32, i32, i32
  }
  func.func @transform_4(%arg0: i32) -> (i32, i32, i32) {
    %c0_i32 = arith.constant 0 : i32
    %c0_i32_0 = arith.constant 0 : i32
    %c0_i32_1 = arith.constant 0 : i32
    %c0_i32_2 = arith.constant 0 : i32
    return %c0_i32, %c0_i32_0, %c0_i32_1 : i32, i32, i32
  }
  func.func @transform_5(%arg0: i32) -> (i32, i32) {
    %c0_i32 = arith.constant 0 : i32
    %c0_i32_0 = arith.constant 0 : i32
    %c0_i32_1 = arith.constant 0 : i32
    return %c0_i32, %c0_i32_0 : i32, i32
  }
  func.func @transform_6(%arg0: i32) -> (i32, i32, i32) {
    %c0_i32 = arith.constant 0 : i32
    %c0_i32_0 = arith.constant 0 : i32
    %c0_i32_1 = arith.constant 0 : i32
    %c0_i32_2 = arith.constant 0 : i32
    return %c0_i32, %c0_i32_0, %c0_i32_1 : i32, i32, i32
  }
  func.func @transform_7(%arg0: i32) -> (i32, i32, i32) {
    %c0_i32 = arith.constant 0 : i32
    %c0_i32_0 = arith.constant 0 : i32
    %c0_i32_1 = arith.constant 0 : i32
    %c0_i32_2 = arith.constant 0 : i32
    return %c0_i32, %c0_i32_0, %c0_i32_1 : i32, i32, i32
  }
  func.func @transform_8(%arg0: i32) -> (i32, i32, i32) {
    %c0_i32 = arith.constant 0 : i32
    %c0_i32_0 = arith.constant 0 : i32
    %c0_i32_1 = arith.constant 0 : i32
    %c0_i32_2 = arith.constant 0 : i32
    return %c0_i32, %c0_i32_0, %c0_i32_1 : i32, i32, i32
  }
  func.func @transform_9(%arg0: i32) -> (i32, i32, i32) {
    %c0_i32 = arith.constant 0 : i32
    %c0_i32_0 = arith.constant 0 : i32
    %c0_i32_1 = arith.constant 0 : i32
    %c0_i32_2 = arith.constant 0 : i32
    return %c0_i32, %c0_i32_0, %c0_i32_1 : i32, i32, i32
  }
  func.func @transform_10(%arg0: i32) -> (i32, i32, i32) {
    %c0_i32 = arith.constant 0 : i32
    %c0_i32_0 = arith.constant 0 : i32
    %c0_i32_1 = arith.constant 0 : i32
    %c0_i32_2 = arith.constant 0 : i32
    return %c0_i32, %c0_i32_0, %c0_i32_1 : i32, i32, i32
  }
  func.func @transform_11(%arg0: i32) -> (i32, i32, i32) {
    %c0_i32 = arith.constant 0 : i32
    %c0_i32_0 = arith.constant 0 : i32
    %c0_i32_1 = arith.constant 0 : i32
    %c0_i32_2 = arith.constant 0 : i32
    return %c0_i32, %c0_i32_0, %c0_i32_1 : i32, i32, i32
  }
  func.func @transform_12(%arg0: i32) -> (i32, i32) {
    %c0_i32 = arith.constant 0 : i32
    %c0_i32_0 = arith.constant 0 : i32
    %c0_i32_1 = arith.constant 0 : i32
    return %c0_i32, %c0_i32_0 : i32, i32
  }
  func.func @transform_13(%arg0: i32) -> (i32, i32) {
    %c0_i32 = arith.constant 0 : i32
    %c0_i32_0 = arith.constant 0 : i32
    %c0_i32_1 = arith.constant 0 : i32
    return %c0_i32, %c0_i32_0 : i32, i32
  }
  func.func @transform_14(%arg0: i32) -> (i32, i32) {
    %c0_i32 = arith.constant 0 : i32
    %c0_i32_0 = arith.constant 0 : i32
    %c0_i32_1 = arith.constant 0 : i32
    return %c0_i32, %c0_i32_0 : i32, i32
  }
  func.func @transform_15(%arg0: i32) -> (i32, i32) {
    %c0_i32 = arith.constant 0 : i32
    %c0_i32_0 = arith.constant 0 : i32
    %c0_i32_1 = arith.constant 0 : i32
    return %c0_i32, %c0_i32_0 : i32, i32
  }
  func.func @transform_16(%arg0: i32) -> (i32, i32) {
    %c0_i32 = arith.constant 0 : i32
    %c0_i32_0 = arith.constant 0 : i32
    %c0_i32_1 = arith.constant 0 : i32
    return %c0_i32, %c0_i32_0 : i32, i32
  }
  func.func @transform_17(%arg0: i32) -> (i32, i32) {
    %c0_i32 = arith.constant 0 : i32
    %c0_i32_0 = arith.constant 0 : i32
    %c0_i32_1 = arith.constant 0 : i32
    return %c0_i32, %c0_i32_0 : i32, i32
  }
  func.func @transform_18(%arg0: i32) -> (i32, i32, i32) {
    %c0_i32 = arith.constant 0 : i32
    %c0_i32_0 = arith.constant 0 : i32
    %c0_i32_1 = arith.constant 0 : i32
    return %arg0, %c0_i32, %c0_i32_0 : i32, i32, i32
  }
  func.func @transform_19(%arg0: i32) -> (i32, i32, i32) {
    %c0_i32 = arith.constant 0 : i32
    %c0_i32_0 = arith.constant 0 : i32
    %c0_i32_1 = arith.constant 0 : i32
    return %arg0, %c0_i32, %c0_i32_0 : i32, i32, i32
  }
}

</mosaic_0001>

<bundles_post_ra>
// kernel: _lambda_.1
= control target key start
LH: loop header
LB: loop body
LE: loop exit
PB: predicated region body
PF: predicated region fallthrough
CT: control target
= control target key end

     0   :  { %s11134_s0 = inlined_call_operand.vmem [shape: f32[2,4,256], index: 0, kind: input, shape index: {}]   ;;  %s11135_s1 = inlined_call_operand.vmem [shape: f32[2,8,64], index: 1, kind: input, shape index: {}]   ;;  %s11136_s2 = inlined_call_operand.hbm [shape: bf16[9,256,256], index: 2, kind: input, shape index: {}]   ;;  %s11137_s3 = inlined_call_operand.vmem [shape: bf16[9,64,64], index: 3, kind: input, shape index: {}]   ;;  %s11138_s4 = inlined_call_operand.vmem [shape: bf16[9,256,64], index: 4, kind: input, shape index: {}]   ;;  %s11139_s5 = inlined_call_operand.vmem [shape: f32[64,256], index: 5, kind: input, shape index: {}]   ;;  %s11140_s6 = inlined_call_operand.vmem [shape: bf16[2,36,4], index: 6, kind: input, shape index: {}]   ;;  %s11141_s7 = inlined_call_operand.vmem [shape: f32[2,4,1], index: 7, kind: input, shape index: {}]   ;;  %s11142_s8 = inlined_call_operand.vmem [shape: f32[2,4,1], index: 8, kind: input, shape index: {}]   ;;  %s11143_s9 = inlined_call_operand.vmem [shape: bf16[2,72,8], index: 9, kind: input, shape index: {}]   ;;  %s11144_s10 = inlined_call_operand.vmem [shape: f32[2,8,1], index: 10, kind: input, shape index: {}]   ;;  %s11145_s11 = inlined_call_operand.vmem [shape: f32[2,8,1], index: 11, kind: input, shape index: {}]   ;;  %s11146_s12 = inlined_call_operand.vmem [shape: bf16[4,8], index: 12, kind: input, shape index: {}]   ;;  %s11147_s13 = inlined_call_operand.vmem [shape: f32[4,1], index: 13, kind: input, shape index: {}]   ;;  %s11148_s14 = inlined_call_operand.vmem [shape: f32[4,1], index: 14, kind: input, shape index: {}]   ;;  %s11149_s15 = inlined_call_operand.vmem [shape: bf16[72,4], index: 15, kind: input, shape index: {}]   ;;  %s11150_s16 = inlined_call_operand.vmem [shape: f32[8,1], index: 16, kind: input, shape index: {}]   ;;  %s11151_s17 = inlined_call_operand.vmem [shape: f32[8,1], index: 17, kind: input, shape index: {}]   ;;  %s11152_s18 = inlined_call_operand.vmem [shape: f32[2,4,256], index: 18, kind: output, shape index: {0}]   ;;  %s11153_s19 = inlined_call_operand.vmem [shape: f32[2,8,64], index: 19, kind: output, shape index: {1}]  }
   0x1   :  { %11228 = sst [smem:[#allocation73_spill]] %s11134_s0 }
   0x2   :  { %11229 = sst [smem:[#allocation74_spill]] %s11135_s1 }
   0x3   :  { %11230 = sst [smem:[#allocation75_spill]] %s11136_s2 }
   0x4   :  { %11231 = sst [smem:[#allocation76_spill]] %s11137_s3 }
   0x5   :  { %25 = vsyncpa [#allocation3], 0  ;;  %s9418_s0 = smov 0  }
   0x6 LB: > { %s9424_s30 = sadd.s32 4294967295, %s9310_s0   ;;  %p6837_p0 = scmp.ge.s32.totalorder %s9310_s0, 1  ;;  %s9310_s0 = sphi %s9418_s0, %s31_s0  }
   0x7   : > { %p476_p1 = scmp.lt.s32.totalorder %s9310_s0, 3  ;;  %s9312_s20 = smov [#allocation2]  }
   0x8   : > { %s488_s21 = sshll.u32 %s9312_s20, 4  ;;  %p11156_p3 = scmp.eq.s32.totalorder %s9424_s30, 0  ;;  %s489_s21 = int_to_ptr.vmem [resolvable:$true] %s488_s21 }
   0x9   : > { %p9428_p2 = pnand %p6837_p0, %p476_p1  ;;  %s11234_s24 = sld [smem:[#allocation75_spill]] }
   0xb   : > { %s11232_s1 = scalar_select %p9428_p2, 1, 0 }
   0xc   : > { %p8439_p4 = pneg %p9428_p2 }
   0xe   : > { %p9437_p5 = pnand %p11156_p3, %p8439_p4 }
   0xf   : > { %s9272_s25 = scalar_lea.hbm %s11234_s24, 36864 }
  0x10   : > { %p9273_p6 = scmp.ne.s32.totalorder %s11234_s24, %s9272_s25  ;;  %p9274_p7 = pneg %p9437_p5 }
  0x11   : > { %p9279_p10 = scmp.lt.u32.totalorder %s9272_s25, %s11234_s24 }
  0x12   : > { %p9275_p8 = pnand %p9274_p7, %p9273_p6 }
  0x14   : > { %p9276_p9 = pneg %p9275_p8 }
  0x16   : > { %p9281_p11 = pnand %p9279_p10, %p9276_p9 }
  0x18   : > { %9284 = shalt.err (!%p9281_p11)
}
  0x19   : > { %s9285_s29 = scalar_lea.vmem %s489_s21, 36864  ;;  %p9293_p1 = scmp.lt.s32.totalorder %s489_s21, %s489_s21 }
  0x1a   : > { %p9286_p12 = scmp.ne.s32.totalorder %s489_s21, %s9285_s29  ;;  %p9294_p4 = scmp.lt.s32.totalorder %s9285_s29, %s9285_s29 }
  0x1c   : > { %p9288_p13 = pnand %p9286_p12, %p9274_p7  ;;  %p9295_p3 = por %p9294_p4, %p9293_p1 }
  0x1e   : > { %p9289_p0 = pneg %p9288_p13 }
  0x20   : > { %p9296_p2 = pnand %p9295_p3, %p9289_p0 }
  0x22   : > { %9299 = shalt.err (!%p9296_p2)
}
  0x23   : > { %s9313_s20 = smov 128   ;;  %s9314_s2 = smov 8  }
  0x24   : > { %8442 = dma.hbm_to_vmem [thread:$0]  (!%p9437_p5), %s11234_s24, 36864, %s489_s21, [#allocation3], %s9313_s20, %s9313_s20, %s9314_s2  }
  0x25   : > { %p11235_p6 = scmp.ne.s32.totalorder %s11232_s1, 0 }
  0x27   : > { %564 = sbr.rel (%p11235_p6) target bundleno = 3488 (0xda0), region = 92 }
  0x2e   : > { %p11236_p8 = scmp.eq.s32.totalorder %s9424_s30, 0 }
  0x30   : > { %9305 = dma.done.wait (%p11236_p8), [#allocation3], 36864   ;;  %p11237_p7 = pmov %p11236_p8 }
  0x31   : > { %p628_p2 = scmp.lt.s32.totalorder %s9424_s30, 1  ;;  %v11158_v0 = vmov 0   ;;  %s11238_s25 = sld [smem:[#allocation73_spill]]  ;;  %vm684_vm0 = vcmask 1041408   ;;  %v8465_v6 = vld [vmem:[#allocation2 + $0x104] ss:$8 sps:$4 sm:$0xff]  }
  0x32   : > { %9307 = vsyncadd (%p11237_p7), [#allocation3], 4294930432  ;;  %723 = vmatprep.mubr.bf16.mxu1 %v11158_v0  ;;  %8459 = vset.pattern.permute.xlu0 %v11158_v0  ;;  %v8462_v7 = vld [vmem:[%s11140_s6] sm:$0xff]   ;;  %vm674_vm1 = vcmask 31744   ;;  %v8468_v9 = vld [vmem:[#allocation2 + $0x114] ss:$8 sps:$4 sm:$0xff]  }
  0x33   : > { %s11380_s30 = smov (!%p628_p2, %s9424_s30), 1  ;;  %2993 = vmatprep.mubr.bf16.mxu0 %v11158_v0  ;;  %8460 = vset.pattern.permute.xlu1 %v11158_v0  ;;  %v8463_v8 = vld [vmem:[#allocation2 + $0x100] ss:$8 sps:$4 sm:$0xff]   ;;  %v8466_v10 = vld [vmem:[#allocation2 + $0x110] ss:$8 sps:$4 sm:$0xff]   ;;  %s11308_s20 = sld [smem:[#allocation74_spill]] }
  0x34   : > { %s9469_s21 = sshll.u32 %s11380_s30, 3  ;;  %v8471_v11 = vld [vmem:[#allocation2 + $0x124] ss:$8 sps:$4 sm:$0xff]   ;;  %v8469_v12 = vld [vmem:[#allocation2 + $0x120] ss:$8 sps:$4 sm:$0xff]   ;;  %vm3508_vm2 = vcmask 1043456  }
  0x35   : > { %v8474_v13 = vld [vmem:[#allocation2 + $0x134] ss:$8 sps:$4 sm:$0xff]   ;;  %v8472_v14 = vld [vmem:[#allocation2 + $0x130] ss:$8 sps:$4 sm:$0xff]   ;;  %v8499_v15 = vld [vmem:[%s11140_s6 + $0x8] sm:$0xff]   ;;  %vm9317_vm3 = vmmov 0   ;;  %s641_s1 = scalar_lea.vmem %s11152_s18, %s9469_s21  ;;  %s645_s30 = scalar_lea.vmem %s11153_s19, %s9469_s21 }
  0x36   : > { %v8477_v16 = vld [vmem:[#allocation2 + $0x144] ss:$8 sps:$4 sm:$0xff]   ;;  %v8475_v17 = vld [vmem:[#allocation2 + $0x140] ss:$8 sps:$4 sm:$0xff]   ;;  %v8480_v18 = vld [vmem:[#allocation2 + $0x154] ss:$8 sps:$4 sm:$0xff]  }
  0x37   : > { %s9475_s26 = scalar_lea.vmem %s11238_s25, %s9469_s21  ;;  %v8506_v19 = vld [vmem:[%s11140_s6 + $0x10] ss:$0 sps:$4 sm:$0x33]   ;;  %v8483_v21 = vld [vmem:[#allocation2 + $0x164] ss:$8 sps:$4 sm:$0xff]   ;;  %vm3492_vm4 = vcmask 64512  }
  0x38   : > { %v647_v1 = vld [vmem:[%s9475_s26] sm:$0xff]  ;;  %v8478_v20 = vld [vmem:[#allocation2 + $0x150] ss:$8 sps:$4 sm:$0xff]   ;;  %v8486_v23 = vld [vmem:[#allocation2 + $0x174] ss:$8 sps:$4 sm:$0xff]   ;;  %s11375_s23 = sld [smem:[#allocation76_spill]] }
  0x39   : > { %v9478_v2 = vcombine.high %v647_v1, %v647_v1  ;;  %v659_v3 = vpack.c.bf16 %v647_v1, %v647_v1  ;;  %v8481_v22 = vld [vmem:[#allocation2 + $0x160] ss:$8 sps:$4 sm:$0xff]   ;;  %v8484_v24 = vld [vmem:[#allocation2 + $0x170] ss:$8 sps:$4 sm:$0xff]   ;;  %v8489_v25 = vld [vmem:[#allocation2 + $0x184] ss:$8 sps:$4 sm:$0xff]   ;;  %s9926_s2 = scalar_lea.vmem %s11308_s20, %s9469_s21 }
  0x3a   : > { %v8487_v26 = vld [vmem:[#allocation2 + $0x180] ss:$8 sps:$4 sm:$0xff]   ;;  %v8492_v27 = vld [vmem:[#allocation2 + $0x194] ss:$8 sps:$4 sm:$0xff]   ;;  %v8490_v28 = vld [vmem:[#allocation2 + $0x190] ss:$8 sps:$4 sm:$0xff]  }
  0x3b   : > { %11239 = vst [vmem:[#allocation5_spill] sm:$0xff] %v9478_v2  ;;  %v660_v4 = vpack.c.bf16 %v9478_v2, %v9478_v2  ;;  %v686_v5 = vsel %vm684_vm0, %v659_v3, 0  ;;  %v8495_v29 = vld [vmem:[#allocation2 + $0x1a4] ss:$8 sps:$4 sm:$0xff]   ;;  %v8493_v30 = vld [vmem:[#allocation2 + $0x1a0] ss:$8 sps:$4 sm:$0xff]  }
  0x3c   : > { %v8498_v31 = vld [vmem:[#allocation2 + $0x1b4] ss:$8 sps:$4 sm:$0xff]   ;;  %v8496_v32 = vld [vmem:[#allocation2 + $0x1b0] ss:$8 sps:$4 sm:$0xff]   ;;  %v8502_v33 = vld [vmem:[#allocation2 + $0x1c4] ss:$8 sps:$4 sm:$0xff]  }
  0x3d   : > { %6851 = vmatprep.subr.msk.bf16.mxu1 %vm684_vm0, %v660_v4  ;;  %v8500_v34 = vld [vmem:[#allocation2 + $0x1c0] ss:$8 sps:$4 sm:$0xff]   ;;  %v8505_v35 = vld [vmem:[#allocation2 + $0x1d4] ss:$8 sps:$4 sm:$0xff]   ;;  %v8503_v36 = vld [vmem:[#allocation2 + $0x1d0] ss:$8 sps:$4 sm:$0xff]  }
  0x3e   : > { %692 = vmatpush1.bf16.msra.mxu1 %v686_v5  ;;  %v8509_v37 = vld [vmem:[#allocation2 + $0x1e4] ss:$8 sps:$4 sm:$0xff]   ;;  %v8507_v38 = vld [vmem:[#allocation2 + $0x1e0] ss:$8 sps:$4 sm:$0xff]   ;;  %v8512_v39 = vld [vmem:[#allocation2 + $0x1f4] ss:$8 sps:$4 sm:$0xff]  }
  0x3f   : > { %989 = vmatprep.subr.bf16.mxu1 %v8465_v6  ;;  %v8510_v40 = vld [vmem:[#allocation2 + $0x1f0] ss:$8 sps:$4 sm:$0xff]   ;;  %v8515_v41 = vld [vmem:[#allocation2 + $0x4] ss:$8 sps:$4 sm:$0xff]   ;;  %v8513_v48 = vld [vmem:[#allocation2] ss:$8 sps:$4 sm:$0xff]  }
  0x40   : > { %v8518_v50 = vld [vmem:[#allocation2 + $0x14] ss:$8 sps:$4 sm:$0xff]   ;;  %v8516_v52 = vld [vmem:[#allocation2 + $0x10] ss:$8 sps:$4 sm:$0xff]   ;;  %v8521_v53 = vld [vmem:[#allocation2 + $0x24] ss:$8 sps:$4 sm:$0xff]  }
  0x41   : > { %6852 = vmatmul.mubr.msk.bf16.vlgmr.msra.gmra.mrb[0].mxu1 %vm674_vm1, %v8462_v7  ;;  %v8519_v54 = vld [vmem:[#allocation2 + $0x20] ss:$8 sps:$4 sm:$0xff]   ;;  %v8524_v55 = vld [vmem:[#allocation2 + $0x34] ss:$8 sps:$4 sm:$0xff]   ;;  %v8522_v56 = vld [vmem:[#allocation2 + $0x30] ss:$8 sps:$4 sm:$0xff]  }
  0x42   : > { %990 = vmatpush1.bf16.msra.mxu1 %v8463_v8  ;;  %733 = vmatprep.mubr.bf16.mxu1 %v11158_v0  ;;  %v8527_v57 = vld [vmem:[#allocation2 + $0x44] ss:$8 sps:$4 sm:$0xff]   ;;  %v8525_v58 = vld [vmem:[#allocation2 + $0x40] ss:$8 sps:$4 sm:$0xff]   ;;  %v8530_v59 = vld [vmem:[#allocation2 + $0x54] ss:$8 sps:$4 sm:$0xff]  }
  0x43   : > { %991 = vmatprep.subr.bf16.mxu1 %v8468_v9  ;;  %v8528_v60 = vld [vmem:[#allocation2 + $0x50] ss:$8 sps:$4 sm:$0xff]   ;;  %v8533_v61 = vld [vmem:[#allocation2 + $0x64] ss:$8 sps:$4 sm:$0xff]   ;;  %v8531_v62 = vld [vmem:[#allocation2 + $0x60] ss:$8 sps:$4 sm:$0xff]  }
  0x44   : > { %v8536_v63 = vld [vmem:[#allocation2 + $0x74] ss:$8 sps:$4 sm:$0xff]   ;;  %v8534_v1 = vld [vmem:[#allocation2 + $0x70] ss:$8 sps:$4 sm:$0xff]   ;;  %v8539_v3 = vld [vmem:[#allocation2 + $0x84] ss:$8 sps:$4 sm:$0xff]  }
  0x45   : > { %v8537_v4 = vld [vmem:[#allocation2 + $0x80] ss:$8 sps:$4 sm:$0xff]   ;;  %v8542_v5 = vld [vmem:[#allocation2 + $0x94] ss:$8 sps:$4 sm:$0xff]   ;;  %v8540_v6 = vld [vmem:[#allocation2 + $0x90] ss:$8 sps:$4 sm:$0xff]  }
  0x46   : > { %992 = vmatpush1.bf16.msra.mxu1 %v8466_v10  ;;  %v8545_v7 = vld [vmem:[#allocation2 + $0xa4] ss:$8 sps:$4 sm:$0xff]   ;;  %v8543_v8 = vld [vmem:[#allocation2 + $0xa0] ss:$8 sps:$4 sm:$0xff]   ;;  %v8548_v9 = vld [vmem:[#allocation2 + $0xb4] ss:$8 sps:$4 sm:$0xff]  }
  0x47   : > { %993 = vmatprep.subr.bf16.mxu1 %v8471_v11  ;;  %v8546_v10 = vld [vmem:[#allocation2 + $0xb0] ss:$8 sps:$4 sm:$0xff]   ;;  %v8551_v11 = vld [vmem:[#allocation2 + $0xc4] ss:$8 sps:$4 sm:$0xff]   ;;  %vm3632_vm5 = vcmask 523264  }
  0x48   : > { %v7148_v2 = vld [vmem:[%s11141_s7 + $0x4] sm:$0xf] }
  0x49   : > { %6853 = vmatmul.mubr.msk.bf16.gmra.mrb[4].mxu1 %vm674_vm1, %v8499_v15  ;;  %v8557_v15 = vld [vmem:[#allocation2 + $0xe4] ss:$8 sps:$4 sm:$0xff]  }
  0x4a   : > { %994 = vmatpush1.bf16.msra.mxu1 %v8469_v12  ;;  %743 = vmatprep.mubr.bf16.mxu1 %v11158_v0  ;;  %v8549_v12 = vld [vmem:[#allocation2 + $0xc0] ss:$8 sps:$4 sm:$0xff]   ;;  %v9704_v0 = vld [vmem:[#allocation2 + $0x744] ss:$8 sps:$4 sm:$0xff]  }
  0x4b   : > { %995 = vmatprep.subr.bf16.mxu1 %v8474_v13  ;;  %v8554_v13 = vld [vmem:[#allocation2 + $0xd4] ss:$8 sps:$4 sm:$0xff]   ;;  %11250 = vst [vmem:[#allocation16_spill] sm:$0xff] %v9704_v0 }
  0x4e   : > { %996 = vmatpush1.bf16.msra.mxu1 %v8472_v14  ;;  %v8552_v14 = vld [vmem:[#allocation2 + $0xd0] ss:$8 sps:$4 sm:$0xff]  }
  0x4f   : > { %997 = vmatprep.subr.bf16.mxu1 %v8477_v16  ;;  %v8555_v16 = vld [vmem:[#allocation2 + $0xe0] ss:$8 sps:$4 sm:$0xff]  }
  0x51   : > { %6854 = vmatmul.mubr.msk.bf16.gmra.mrb[8].mxu1 %vm674_vm1, %v8506_v19  ;;  %v8563_v19 = vld [vmem:[#allocation2 + $0x204] ss:$8 sps:$4 sm:$0xff]  }
  0x52   : > { %998 = vmatpush1.bf16.msra.mxu1 %v8475_v17  ;;  %v8560_v17 = vld [vmem:[#allocation2 + $0xf4] ss:$8 sps:$4 sm:$0xff]  }
  0x53   : > { %999 = vmatprep.subr.bf16.mxu1 %v8480_v18  ;;  %v8558_v18 = vld [vmem:[#allocation2 + $0xf0] ss:$8 sps:$4 sm:$0xff]  }
  0x56   : > { %1000 = vmatpush1.bf16.msra.mxu1 %v8478_v20  ;;  %v8561_v20 = vld [vmem:[#allocation2 + $0x200] ss:$8 sps:$4 sm:$0xff]  }
  0x57   : > { %1001 = vmatprep.subr.bf16.mxu1 %v8483_v21  ;;  %v8566_v21 = vld [vmem:[#allocation2 + $0x214] ss:$8 sps:$4 sm:$0xff]  }
  0x5a   : > { %1002 = vmatpush1.bf16.msra.mxu1 %v8481_v22 }
  0x5b   : > { %1003 = vmatprep.subr.bf16.mxu1 %v8486_v23 }
  0x5e   : > { %1004 = vmatpush1.bf16.msra.mxu1 %v8484_v24  ;;  %v8564_v24 = vld [vmem:[#allocation2 + $0x210] ss:$8 sps:$4 sm:$0xff]  }
  0x5f   : > { %1005 = vmatprep.subr.bf16.mxu1 %v8489_v25 }
  0x62   : > { %1006 = vmatpush1.bf16.msra.mxu1 %v8487_v26  ;;  %v8569_v26 = vld [vmem:[#allocation2 + $0x224] ss:$8 sps:$4 sm:$0xff]  }
  0x63   : > { %1007 = vmatprep.subr.bf16.mxu1 %v8492_v27 }
  0x66   : > { %1008 = vmatpush1.bf16.msra.mxu1 %v8490_v28 }
  0x67   : > { %1009 = vmatprep.subr.bf16.mxu1 %v8495_v29 }
  0x6a   : > { %1010 = vmatpush1.bf16.msra.mxu1 %v8493_v30 }
  0x6b   : > { %1011 = vmatprep.subr.bf16.mxu1 %v8498_v31  ;;  %v8567_v31 = vld [vmem:[#allocation2 + $0x220] ss:$8 sps:$4 sm:$0xff]  }
  0x6e   : > { %1012 = vmatpush1.bf16.msra.mxu1 %v8496_v32  ;;  %v8572_v32 = vld [vmem:[#allocation2 + $0x234] ss:$8 sps:$4 sm:$0xff]  }
  0x6f   : > { %1013 = vmatprep.subr.bf16.mxu1 %v8502_v33 }
  0x72   : > { %1014 = vmatpush1.bf16.msra.mxu1 %v8500_v34  ;;  %v8570_v34 = vld [vmem:[#allocation2 + $0x230] ss:$8 sps:$4 sm:$0xff]  }
  0x73   : > { %1015 = vmatprep.subr.bf16.mxu1 %v8505_v35 }
  0x76   : > { %1016 = vmatpush1.bf16.msra.mxu1 %v8503_v36  ;;  %v8575_v36 = vld [vmem:[#allocation2 + $0x244] ss:$8 sps:$4 sm:$0xff]  }
  0x77   : > { %1017 = vmatprep.subr.bf16.mxu1 %v8509_v37 }
  0x7a   : > { %1018 = vmatpush1.bf16.msra.mxu1 %v8507_v38 }
  0x7b   : > { %1019 = vmatprep.subr.bf16.mxu1 %v8512_v39  ;;  %v8573_v39 = vld [vmem:[#allocation2 + $0x240] ss:$8 sps:$4 sm:$0xff]  }
  0x7e   : > { %1020 = vmatpush1.bf16.msra.mxu1 %v8510_v40  ;;  %v8578_v40 = vld [vmem:[#allocation2 + $0x254] ss:$8 sps:$4 sm:$0xff]  }
  0x7f   : > { %1190 = vmatprep.subr.bf16.mxu1 %v8515_v41  ;;  %v8576_v41 = vld [vmem:[#allocation2 + $0x250] ss:$8 sps:$4 sm:$0xff]  }
 0x114   : > { %v725_v42 = vpop.f32.mrb[0].mxu1 }
 0x115   : > { %v727_v43 = vpop.f32.mrb[1].mxu1 }
 0x116   : > { %v729_v44 = vpop.f32.mrb[2].mxu1 }
 0x117   : > { %v9498_v45 = vpack.c.bf16 %v729_v44, %v725_v42  ;;  %v731_v46 = vpop.f32.mrb[3].mxu1  ;;  %v8581_v42 = vld [vmem:[#allocation2 + $0x264] ss:$8 sps:$4 sm:$0xff]   ;;  %v8584_v44 = vld [vmem:[#allocation2 + $0x274] ss:$8 sps:$4 sm:$0xff]  }
 0x118   : > { %v9500_v47 = vpack.c.bf16 %v731_v46, %v727_v43  ;;  %v8579_v43 = vld [vmem:[#allocation2 + $0x260] ss:$8 sps:$4 sm:$0xff]   ;;  %v8582_v46 = vld [vmem:[#allocation2 + $0x270] ss:$8 sps:$4 sm:$0xff]  }
 0x119   : > { %v825_v51 = vrot.slane %v9498_v45, 2 }
 0x11a   : > { %v826_v49 = vrot.slane %v9500_v47, 2  ;;  %v1265_v22 = vrot.slane %v9500_v47, 4 }
 0x11c   : > { %1021 = vmatprep.mubr.bf16.mxu1 %v826_v49  ;;  %v735_v23 = vpop.f32.mrb[4].mxu1  ;;  %v8585_v49 = vld [vmem:[#allocation2 + $0x280] ss:$8 sps:$4 sm:$0xff]  }
 0x11d   : > { %1022 = vmatmul.mubr.bf16.vlgmr.msra.gmra.mrb[12].mxu1 %v825_v51  ;;  %v737_v25 = vpop.f32.mrb[5].mxu1  ;;  %v8588_v51 = vld [vmem:[#allocation2 + $0x290] ss:$8 sps:$4 sm:$0xff]  }
 0x11e   : > { %1191 = vmatpush1.bf16.msra.mxu1 %v8513_v48  ;;  %1222 = vmatprep.mubr.bf16.mxu1 %v9500_v47  ;;  %v739_v27 = vpop.f32.mrb[6].mxu1  ;;  %v8587_v48 = vld [vmem:[#allocation2 + $0x284] ss:$8 sps:$4 sm:$0xff]  }
 0x11f   : > { %1192 = vmatprep.subr.bf16.mxu1 %v8518_v50  ;;  %v9507_v28 = vpack.c.bf16 %v739_v27, %v735_v23  ;;  %v741_v29 = vpop.f32.mrb[7].mxu1  ;;  %v8590_v50 = vld [vmem:[#allocation2 + $0x294] ss:$8 sps:$4 sm:$0xff]   ;;  %v8641_v23 = vld [vmem:[#allocation2 + $0x3a4] ss:$8 sps:$4 sm:$0xff]  }
 0x120   : > { %v9509_v30 = vpack.c.bf16 %v741_v29, %v737_v25  ;;  %v8644_v25 = vld [vmem:[#allocation2 + $0x3b4] ss:$8 sps:$4 sm:$0xff]   ;;  %v8647_v27 = vld [vmem:[#allocation2 + $0x3c4] ss:$8 sps:$4 sm:$0xff]   ;;  %v8645_v29 = vld [vmem:[#allocation2 + $0x3c0] ss:$8 sps:$4 sm:$0xff]  }
 0x122   : > { %1193 = vmatpush1.bf16.msra.mxu1 %v8516_v52  ;;  %v8593_v52 = vld [vmem:[#allocation2 + $0x2a4] ss:$8 sps:$4 sm:$0xff]  }
 0x123   : > { %1194 = vmatprep.subr.bf16.mxu1 %v8521_v53  ;;  %v8591_v53 = vld [vmem:[#allocation2 + $0x2a0] ss:$8 sps:$4 sm:$0xff]  }
 0x124   : > { %v9511_v33 = vpop.f32.mrb[8].mxu1 }
 0x125   : > { %v9513_v35 = vpop.f32.mrb[9].mxu1 }
 0x126   : > { %1195 = vmatpush1.bf16.msra.mxu1 %v8519_v54  ;;  %v749_v37 = vpop.f32.mrb[10].mxu1  ;;  %v8596_v54 = vld [vmem:[#allocation2 + $0x2b4] ss:$8 sps:$4 sm:$0xff]  }
 0x127   : > { %1196 = vmatprep.subr.bf16.mxu1 %v8524_v55  ;;  %v750_v38 = vpop.f32.mrb[11].mxu1  ;;  %v8594_v55 = vld [vmem:[#allocation2 + $0x2b0] ss:$8 sps:$4 sm:$0xff]   ;;  %v8656_v37 = vld [vmem:[#allocation2 + $0x3f4] ss:$8 sps:$4 sm:$0xff]  }
 0x128   : > { %v8654_v38 = vld [vmem:[#allocation2 + $0x3f0] ss:$8 sps:$4 sm:$0xff]  }
 0x12a   : > { %1197 = vmatpush1.bf16.msra.mxu1 %v8522_v56  ;;  %v8599_v56 = vld [vmem:[#allocation2 + $0x2c4] ss:$8 sps:$4 sm:$0xff]  }
 0x12b   : > { %1198 = vmatprep.subr.bf16.mxu1 %v8527_v57  ;;  %v8597_v57 = vld [vmem:[#allocation2 + $0x2c0] ss:$8 sps:$4 sm:$0xff]  }
 0x12e   : > { %1199 = vmatpush1.bf16.msra.mxu1 %v8525_v58  ;;  %v8602_v58 = vld [vmem:[#allocation2 + $0x2d4] ss:$8 sps:$4 sm:$0xff]  }
 0x12f   : > { %1200 = vmatprep.subr.bf16.mxu1 %v8530_v59  ;;  %v8600_v59 = vld [vmem:[#allocation2 + $0x2d0] ss:$8 sps:$4 sm:$0xff]  }
 0x132   : > { %1201 = vmatpush1.bf16.msra.mxu1 %v8528_v60  ;;  %v8605_v60 = vld [vmem:[#allocation2 + $0x2e4] ss:$8 sps:$4 sm:$0xff]  }
 0x133   : > { %1202 = vmatprep.subr.bf16.mxu1 %v8533_v61  ;;  %v8603_v61 = vld [vmem:[#allocation2 + $0x2e0] ss:$8 sps:$4 sm:$0xff]  }
 0x136   : > { %1203 = vmatpush1.bf16.msra.mxu1 %v8531_v62  ;;  %v8608_v62 = vld [vmem:[#allocation2 + $0x2f4] ss:$8 sps:$4 sm:$0xff]  }
 0x137   : > { %1204 = vmatprep.subr.bf16.mxu1 %v8536_v63  ;;  %v8606_v63 = vld [vmem:[#allocation2 + $0x2f0] ss:$8 sps:$4 sm:$0xff]  }
 0x13a   : > { %1205 = vmatpush1.bf16.msra.mxu1 %v8534_v1  ;;  %v8611_v1 = vld [vmem:[#allocation2 + $0x304] ss:$8 sps:$4 sm:$0xff]  }
 0x13b   : > { %1206 = vmatprep.subr.bf16.mxu1 %v8539_v3  ;;  %v8609_v3 = vld [vmem:[#allocation2 + $0x300] ss:$8 sps:$4 sm:$0xff]  }
 0x13e   : > { %1207 = vmatpush1.bf16.msra.mxu1 %v8537_v4  ;;  %v1264_v4 = vrot.slane %v9498_v45, 4 }
 0x13f   : > { %1208 = vmatprep.subr.bf16.mxu1 %v8542_v5  ;;  %v8614_v5 = vld [vmem:[#allocation2 + $0x314] ss:$8 sps:$4 sm:$0xff]  }
 0x142   : > { %1209 = vmatpush1.bf16.msra.mxu1 %v8540_v6  ;;  %v1505_v6 = vrot.slane %v9500_v47, 6  ;;  %v8624_v47 = vld [vmem:[#allocation2 + $0x350] ss:$8 sps:$4 sm:$0xff]  }
 0x143   : > { %1210 = vmatprep.subr.bf16.mxu1 %v8545_v7  ;;  %v8612_v7 = vld [vmem:[#allocation2 + $0x310] ss:$8 sps:$4 sm:$0xff]  }
 0x146   : > { %1211 = vmatpush1.bf16.msra.mxu1 %v8543_v8  ;;  %v8617_v8 = vld [vmem:[#allocation2 + $0x324] ss:$8 sps:$4 sm:$0xff]  }
 0x147   : > { %1212 = vmatprep.subr.bf16.mxu1 %v8548_v9  ;;  %v8615_v9 = vld [vmem:[#allocation2 + $0x320] ss:$8 sps:$4 sm:$0xff]  }
 0x14a   : > { %1213 = vmatpush1.bf16.msra.mxu1 %v8546_v10  ;;  %v8620_v10 = vld [vmem:[#allocation2 + $0x334] ss:$8 sps:$4 sm:$0xff]  }
 0x14b   : > { %1214 = vmatprep.subr.bf16.mxu1 %v8551_v11  ;;  %v8618_v11 = vld [vmem:[#allocation2 + $0x330] ss:$8 sps:$4 sm:$0xff]  }
 0x14e   : > { %1215 = vmatpush1.bf16.msra.mxu1 %v8549_v12  ;;  %v8623_v12 = vld [vmem:[#allocation2 + $0x344] ss:$8 sps:$4 sm:$0xff]  }
 0x14f   : > { %1216 = vmatprep.subr.bf16.mxu1 %v8554_v13  ;;  %v8621_v13 = vld [vmem:[#allocation2 + $0x340] ss:$8 sps:$4 sm:$0xff]  }
 0x152   : > { %1217 = vmatpush1.bf16.msra.mxu1 %v8552_v14  ;;  %v8626_v14 = vld [vmem:[#allocation2 + $0x354] ss:$8 sps:$4 sm:$0xff]  }
 0x153   : > { %1218 = vmatprep.subr.bf16.mxu1 %v8557_v15  ;;  %v8629_v15 = vld [vmem:[#allocation2 + $0x364] ss:$8 sps:$4 sm:$0xff]  }
 0x156   : > { %1219 = vmatpush1.bf16.msra.mxu1 %v8555_v16  ;;  %v8627_v16 = vld [vmem:[#allocation2 + $0x360] ss:$8 sps:$4 sm:$0xff]  }
 0x157   : > { %1220 = vmatprep.subr.bf16.mxu1 %v8560_v17  ;;  %v8632_v17 = vld [vmem:[#allocation2 + $0x374] ss:$8 sps:$4 sm:$0xff]  }
 0x15a   : > { %1221 = vmatpush1.bf16.msra.mxu1 %v8558_v18  ;;  %v8630_v18 = vld [vmem:[#allocation2 + $0x370] ss:$8 sps:$4 sm:$0xff]  }
 0x15b   : > { %1428 = vmatprep.subr.bf16.mxu1 %v8563_v19  ;;  %v8635_v19 = vld [vmem:[#allocation2 + $0x384] ss:$8 sps:$4 sm:$0xff]  }
 0x15d   : > { %1223 = vmatmul.mubr.bf16.vlgmr.msra.gmra.mrb[12].mxu1 %v9498_v45 }
 0x15e   : > { %1429 = vmatpush1.bf16.msra.mxu1 %v8561_v20  ;;  %1460 = vmatprep.mubr.bf16.mxu1 %v1265_v22  ;;  %v8633_v20 = vld [vmem:[#allocation2 + $0x380] ss:$8 sps:$4 sm:$0xff]   ;;  %v8636_v22 = vld [vmem:[#allocation2 + $0x390] ss:$8 sps:$4 sm:$0xff]  }
 0x15f   : > { %1430 = vmatprep.subr.bf16.mxu1 %v8566_v21  ;;  %v8638_v21 = vld [vmem:[#allocation2 + $0x394] ss:$8 sps:$4 sm:$0xff]  }
 0x162   : > { %1431 = vmatpush1.bf16.msra.mxu1 %v8564_v24  ;;  %v8639_v24 = vld [vmem:[#allocation2 + $0x3a0] ss:$8 sps:$4 sm:$0xff]  }
 0x163   : > { %1432 = vmatprep.subr.bf16.mxu1 %v8569_v26  ;;  %v8642_v26 = vld [vmem:[#allocation2 + $0x3b0] ss:$8 sps:$4 sm:$0xff]  }
 0x166   : > { %1433 = vmatpush1.bf16.msra.mxu1 %v8567_v31  ;;  %v8650_v31 = vld [vmem:[#allocation2 + $0x3d4] ss:$8 sps:$4 sm:$0xff]  }
 0x167   : > { %1434 = vmatprep.subr.bf16.mxu1 %v8572_v32  ;;  %v8648_v32 = vld [vmem:[#allocation2 + $0x3d0] ss:$8 sps:$4 sm:$0xff]  }
 0x16a   : > { %1435 = vmatpush1.bf16.msra.mxu1 %v8570_v34  ;;  %v8653_v34 = vld [vmem:[#allocation2 + $0x3e4] ss:$8 sps:$4 sm:$0xff]  }
 0x16b   : > { %1436 = vmatprep.subr.bf16.mxu1 %v8575_v36  ;;  %v8651_v36 = vld [vmem:[#allocation2 + $0x3e0] ss:$8 sps:$4 sm:$0xff]  }
 0x16e   : > { %1437 = vmatpush1.bf16.msra.mxu1 %v8573_v39  ;;  %v8659_v39 = vld [vmem:[#allocation2 + $0x404] ss:$8 sps:$4 sm:$0xff]  }
 0x16f   : > { %1438 = vmatprep.subr.bf16.mxu1 %v8578_v40  ;;  %v8657_v40 = vld [vmem:[#allocation2 + $0x400] ss:$8 sps:$4 sm:$0xff]  }
 0x172   : > { %1439 = vmatpush1.bf16.msra.mxu1 %v8576_v41  ;;  %v1504_v41 = vrot.slane %v9498_v45, 6  ;;  %v8674_v45 = vld [vmem:[#allocation2 + $0x454] ss:$8 sps:$4 sm:$0xff]  }
 0x173   : > { %1440 = vmatprep.subr.bf16.mxu1 %v8581_v42  ;;  %v8662_v42 = vld [vmem:[#allocation2 + $0x414] ss:$8 sps:$4 sm:$0xff]  }
 0x176   : > { %1441 = vmatpush1.bf16.msra.mxu1 %v8579_v43  ;;  %v8660_v43 = vld [vmem:[#allocation2 + $0x410] ss:$8 sps:$4 sm:$0xff]  }
 0x177   : > { %1442 = vmatprep.subr.bf16.mxu1 %v8584_v44  ;;  %v8665_v44 = vld [vmem:[#allocation2 + $0x424] ss:$8 sps:$4 sm:$0xff]  }
 0x17a   : > { %1443 = vmatpush1.bf16.msra.mxu1 %v8582_v46  ;;  %v8663_v46 = vld [vmem:[#allocation2 + $0x420] ss:$8 sps:$4 sm:$0xff]  }
 0x17b   : > { %1444 = vmatprep.subr.bf16.mxu1 %v8587_v48  ;;  %v8668_v48 = vld [vmem:[#allocation2 + $0x434] ss:$8 sps:$4 sm:$0xff]  }
 0x17e   : > { %1445 = vmatpush1.bf16.msra.mxu1 %v8585_v49  ;;  %v8666_v49 = vld [vmem:[#allocation2 + $0x430] ss:$8 sps:$4 sm:$0xff]  }
 0x17f   : > { %1446 = vmatprep.subr.bf16.mxu1 %v8590_v50  ;;  %v8671_v50 = vld [vmem:[#allocation2 + $0x444] ss:$8 sps:$4 sm:$0xff]  }
 0x182   : > { %1447 = vmatpush1.bf16.msra.mxu1 %v8588_v51  ;;  %v8669_v51 = vld [vmem:[#allocation2 + $0x440] ss:$8 sps:$4 sm:$0xff]  }
 0x183   : > { %1448 = vmatprep.subr.bf16.mxu1 %v8593_v52  ;;  %v8672_v52 = vld [vmem:[#allocation2 + $0x450] ss:$8 sps:$4 sm:$0xff]  }
 0x186   : > { %1449 = vmatpush1.bf16.msra.mxu1 %v8591_v53  ;;  %v8677_v53 = vld [vmem:[#allocation2 + $0x464] ss:$8 sps:$4 sm:$0xff]  }
 0x187   : > { %1450 = vmatprep.subr.bf16.mxu1 %v8596_v54  ;;  %v8675_v54 = vld [vmem:[#allocation2 + $0x460] ss:$8 sps:$4 sm:$0xff]  }
 0x18a   : > { %1451 = vmatpush1.bf16.msra.mxu1 %v8594_v55  ;;  %v8680_v55 = vld [vmem:[#allocation2 + $0x474] ss:$8 sps:$4 sm:$0xff]  }
 0x18b   : > { %1452 = vmatprep.subr.bf16.mxu1 %v8599_v56  ;;  %v8678_v56 = vld [vmem:[#allocation2 + $0x470] ss:$8 sps:$4 sm:$0xff]  }
 0x18e   : > { %1453 = vmatpush1.bf16.msra.mxu1 %v8597_v57  ;;  %v8683_v57 = vld [vmem:[#allocation2 + $0x484] ss:$8 sps:$4 sm:$0xff]  }
 0x18f   : > { %1454 = vmatprep.subr.bf16.mxu1 %v8602_v58  ;;  %v8681_v58 = vld [vmem:[#allocation2 + $0x480] ss:$8 sps:$4 sm:$0xff]  }
 0x192   : > { %1455 = vmatpush1.bf16.msra.mxu1 %v8600_v59  ;;  %v8686_v59 = vld [vmem:[#allocation2 + $0x494] ss:$8 sps:$4 sm:$0xff]  }
 0x193   : > { %1456 = vmatprep.subr.bf16.mxu1 %v8605_v60  ;;  %v8684_v60 = vld [vmem:[#allocation2 + $0x490] ss:$8 sps:$4 sm:$0xff]  }
 0x196   : > { %1457 = vmatpush1.bf16.msra.mxu1 %v8603_v61  ;;  %v8689_v61 = vld [vmem:[#allocation2 + $0x4a4] ss:$8 sps:$4 sm:$0xff]  }
 0x197   : > { %1458 = vmatprep.subr.bf16.mxu1 %v8608_v62  ;;  %v8687_v62 = vld [vmem:[#allocation2 + $0x4a0] ss:$8 sps:$4 sm:$0xff]  }
 0x19a   : > { %1459 = vmatpush1.bf16.msra.mxu1 %v8606_v63  ;;  %v8692_v63 = vld [vmem:[#allocation2 + $0x4b4] ss:$8 sps:$4 sm:$0xff]  }
 0x19b   : > { %1668 = vmatprep.subr.bf16.mxu1 %v8611_v1  ;;  %v8690_v1 = vld [vmem:[#allocation2 + $0x4b0] ss:$8 sps:$4 sm:$0xff]  }
 0x19d   : > { %1461 = vmatmul.mubr.bf16.vlgmr.msra.gmra.mrb[12].mxu1 %v1264_v4  ;;  %v8693_v4 = vld [vmem:[#allocation2 + $0x4c0] ss:$8 sps:$4 sm:$0xff]  }
 0x19e   : > { %1669 = vmatpush1.bf16.msra.mxu1 %v8609_v3  ;;  %1700 = vmatprep.mubr.bf16.mxu1 %v1505_v6  ;;  %v8695_v3 = vld [vmem:[#allocation2 + $0x4c4] ss:$8 sps:$4 sm:$0xff]   ;;  %v8696_v6 = vld [vmem:[#allocation2 + $0x4d0] ss:$8 sps:$4 sm:$0xff]  }
 0x19f   : > { %1670 = vmatprep.subr.bf16.mxu1 %v8614_v5  ;;  %v8698_v5 = vld [vmem:[#allocation2 + $0x4d4] ss:$8 sps:$4 sm:$0xff]  }
 0x1a2   : > { %1671 = vmatpush1.bf16.msra.mxu1 %v8612_v7  ;;  %v8701_v7 = vld [vmem:[#allocation2 + $0x4e4] ss:$8 sps:$4 sm:$0xff]  }
 0x1a3   : > { %1672 = vmatprep.subr.bf16.mxu1 %v8617_v8  ;;  %v8699_v8 = vld [vmem:[#allocation2 + $0x4e0] ss:$8 sps:$4 sm:$0xff]  }
 0x1a6   : > { %1673 = vmatpush1.bf16.msra.mxu1 %v8615_v9  ;;  %v8704_v9 = vld [vmem:[#allocation2 + $0x4f4] ss:$8 sps:$4 sm:$0xff]  }
 0x1a7   : > { %1674 = vmatprep.subr.bf16.mxu1 %v8620_v10  ;;  %v8702_v10 = vld [vmem:[#allocation2 + $0x4f0] ss:$8 sps:$4 sm:$0xff]  }
 0x1aa   : > { %1675 = vmatpush1.bf16.msra.mxu1 %v8618_v11  ;;  %v8707_v11 = vld [vmem:[#allocation2 + $0x504] ss:$8 sps:$4 sm:$0xff]  }
 0x1ab   : > { %1676 = vmatprep.subr.bf16.mxu1 %v8623_v12  ;;  %v8705_v12 = vld [vmem:[#allocation2 + $0x500] ss:$8 sps:$4 sm:$0xff]  }
 0x1ae   : > { %1677 = vmatpush1.bf16.msra.mxu1 %v8621_v13  ;;  %v8710_v13 = vld [vmem:[#allocation2 + $0x514] ss:$8 sps:$4 sm:$0xff]  }
 0x1af   : > { %1678 = vmatprep.subr.bf16.mxu1 %v8626_v14  ;;  %v1983_v14 = vrot.slane %v9509_v30, 2 }
 0x1b2   : > { %1679 = vmatpush1.bf16.msra.mxu1 %v8624_v47  ;;  %v8708_v47 = vld [vmem:[#allocation2 + $0x510] ss:$8 sps:$4 sm:$0xff]  }
 0x1b3   : > { %1680 = vmatprep.subr.bf16.mxu1 %v8629_v15  ;;  %v8713_v15 = vld [vmem:[#allocation2 + $0x524] ss:$8 sps:$4 sm:$0xff]  }
 0x1b6   : > { %1681 = vmatpush1.bf16.msra.mxu1 %v8627_v16  ;;  %v8711_v16 = vld [vmem:[#allocation2 + $0x520] ss:$8 sps:$4 sm:$0xff]  }
 0x1b7   : > { %1682 = vmatprep.subr.bf16.mxu1 %v8632_v17  ;;  %v8716_v17 = vld [vmem:[#allocation2 + $0x534] ss:$8 sps:$4 sm:$0xff]  }
 0x1ba   : > { %1683 = vmatpush1.bf16.msra.mxu1 %v8630_v18  ;;  %v8714_v18 = vld [vmem:[#allocation2 + $0x530] ss:$8 sps:$4 sm:$0xff]  }
 0x1bb   : > { %1684 = vmatprep.subr.bf16.mxu1 %v8635_v19  ;;  %v8719_v19 = vld [vmem:[#allocation2 + $0x544] ss:$8 sps:$4 sm:$0xff]  }
 0x1be   : > { %1685 = vmatpush1.bf16.msra.mxu1 %v8633_v20  ;;  %v8717_v20 = vld [vmem:[#allocation2 + $0x540] ss:$8 sps:$4 sm:$0xff]  }
 0x1bf   : > { %1686 = vmatprep.subr.bf16.mxu1 %v8638_v21  ;;  %v8722_v21 = vld [vmem:[#allocation2 + $0x554] ss:$8 sps:$4 sm:$0xff]  }
 0x1c2   : > { %1687 = vmatpush1.bf16.msra.mxu1 %v8636_v22  ;;  %v8720_v22 = vld [vmem:[#allocation2 + $0x550] ss:$8 sps:$4 sm:$0xff]  }
 0x1c3   : > { %1688 = vmatprep.subr.bf16.mxu1 %v8641_v23  ;;  %v8725_v23 = vld [vmem:[#allocation2 + $0x564] ss:$8 sps:$4 sm:$0xff]  }
 0x1c6   : > { %1689 = vmatpush1.bf16.msra.mxu1 %v8639_v24  ;;  %v8723_v24 = vld [vmem:[#allocation2 + $0x560] ss:$8 sps:$4 sm:$0xff]  }
 0x1c7   : > { %1690 = vmatprep.subr.bf16.mxu1 %v8644_v25  ;;  %v8728_v25 = vld [vmem:[#allocation2 + $0x574] ss:$8 sps:$4 sm:$0xff]  }
 0x1ca   : > { %1691 = vmatpush1.bf16.msra.mxu1 %v8642_v26  ;;  %v9521_v26 = vld [vmem:[#allocation2 + $0x570] ss:$8 sps:$4 sm:$0xff]  }
 0x1cb   : > { %1692 = vmatprep.subr.bf16.mxu1 %v8647_v27  ;;  %v9523_v27 = vld [vmem:[#allocation2 + $0x584] ss:$8 sps:$4 sm:$0xff]  }
 0x1ce   : > { %1693 = vmatpush1.bf16.msra.mxu1 %v8645_v29  ;;  %v9526_v29 = vld [vmem:[#allocation2 + $0x580] ss:$8 sps:$4 sm:$0xff]  }
 0x1cf   : > { %1694 = vmatprep.subr.bf16.mxu1 %v8650_v31  ;;  %v9529_v31 = vld [vmem:[#allocation2 + $0x594] ss:$8 sps:$4 sm:$0xff]  }
 0x1d2   : > { %1695 = vmatpush1.bf16.msra.mxu1 %v8648_v32  ;;  %v9532_v32 = vld [vmem:[#allocation2 + $0x590] ss:$8 sps:$4 sm:$0xff]  }
 0x1d3   : > { %1696 = vmatprep.subr.bf16.mxu1 %v8653_v34  ;;  %v9535_v34 = vld [vmem:[#allocation2 + $0x5a4] ss:$8 sps:$4 sm:$0xff]  }
 0x1d6   : > { %1697 = vmatpush1.bf16.msra.mxu1 %v8651_v36  ;;  %v9538_v36 = vld [vmem:[#allocation2 + $0x5a0] ss:$8 sps:$4 sm:$0xff]  }
 0x1d7   : > { %1698 = vmatprep.subr.bf16.mxu1 %v8656_v37  ;;  %v9541_v37 = vld [vmem:[#allocation2 + $0x5b4] ss:$8 sps:$4 sm:$0xff]  }
 0x1da   : > { %1699 = vmatpush1.bf16.msra.mxu1 %v8654_v38  ;;  %v9544_v38 = vld [vmem:[#allocation2 + $0x5b0] ss:$8 sps:$4 sm:$0xff]  }
 0x1db   : > { %1904 = vmatprep.subr.bf16.mxu1 %v8659_v39  ;;  %v9547_v39 = vld [vmem:[#allocation2 + $0x5c4] ss:$8 sps:$4 sm:$0xff]  }
 0x1dd   : > { %1701 = vmatmul.mubr.bf16.vlgmr.msra.gmra.mrb[12].mxu1 %v1504_v41  ;;  %v9553_v41 = vld [vmem:[#allocation2 + $0x5d4] ss:$8 sps:$4 sm:$0xff]  }
 0x1de   : > { %1905 = vmatpush1.bf16.msra.mxu1 %v8657_v40  ;;  %1936 = vmatprep.mubr.bf16.mxu1 %v9509_v30  ;;  %v9550_v40 = vld [vmem:[#allocation2 + $0x5c0] ss:$8 sps:$4 sm:$0xff]  }
 0x1df   : > { %1906 = vmatprep.subr.bf16.mxu1 %v8662_v42  ;;  %v9556_v42 = vld [vmem:[#allocation2 + $0x5d0] ss:$8 sps:$4 sm:$0xff]  }
 0x1e2   : > { %1907 = vmatpush1.bf16.msra.mxu1 %v8660_v43  ;;  %v9559_v43 = vld [vmem:[#allocation2 + $0x5e4] ss:$8 sps:$4 sm:$0xff]  }
 0x1e3   : > { %1908 = vmatprep.subr.bf16.mxu1 %v8665_v44  ;;  %v9562_v44 = vld [vmem:[#allocation2 + $0x5e0] ss:$8 sps:$4 sm:$0xff]  }
 0x1e6   : > { %1909 = vmatpush1.bf16.msra.mxu1 %v8663_v46  ;;  %v9565_v46 = vld [vmem:[#allocation2 + $0x5f4] ss:$8 sps:$4 sm:$0xff]  }
 0x1e7   : > { %1910 = vmatprep.subr.bf16.mxu1 %v8668_v48  ;;  %v9568_v48 = vld [vmem:[#allocation2 + $0x5f0] ss:$8 sps:$4 sm:$0xff]  }
 0x1ea   : > { %1911 = vmatpush1.bf16.msra.mxu1 %v8666_v49  ;;  %v9571_v49 = vld [vmem:[#allocation2 + $0x604] ss:$8 sps:$4 sm:$0xff]  }
 0x1eb   : > { %1912 = vmatprep.subr.bf16.mxu1 %v8671_v50  ;;  %v9574_v50 = vld [vmem:[#allocation2 + $0x600] ss:$8 sps:$4 sm:$0xff]  }
 0x1ee   : > { %1913 = vmatpush1.bf16.msra.mxu1 %v8669_v51  ;;  %v1982_v51 = vrot.slane %v9507_v28, 2 }
 0x1ef   : > { %1914 = vmatprep.subr.bf16.mxu1 %v8674_v45  ;;  %v9578_v45 = vld [vmem:[#allocation2 + $0x614] ss:$8 sps:$4 sm:$0xff]  }
 0x1f2   : > { %1915 = vmatpush1.bf16.msra.mxu1 %v8672_v52  ;;  %v2223_v52 = vrot.slane %v9509_v30, 4 }
 0x1f3   : > { %1916 = vmatprep.subr.bf16.mxu1 %v8677_v53  ;;  %v9582_v53 = vld [vmem:[#allocation2 + $0x610] ss:$8 sps:$4 sm:$0xff]  }
 0x1f6   : > { %1917 = vmatpush1.bf16.msra.mxu1 %v8675_v54  ;;  %v9585_v54 = vld [vmem:[#allocation2 + $0x624] ss:$8 sps:$4 sm:$0xff]  }
 0x1f7   : > { %1918 = vmatprep.subr.bf16.mxu1 %v8680_v55  ;;  %v9588_v55 = vld [vmem:[#allocation2 + $0x620] ss:$8 sps:$4 sm:$0xff]  }
 0x1fa   : > { %1919 = vmatpush1.bf16.msra.mxu1 %v8678_v56  ;;  %v9591_v56 = vld [vmem:[#allocation2 + $0x634] ss:$8 sps:$4 sm:$0xff]  }
 0x1fb   : > { %1920 = vmatprep.subr.bf16.mxu1 %v8683_v57  ;;  %v9594_v57 = vld [vmem:[#allocation2 + $0x630] ss:$8 sps:$4 sm:$0xff]  }
 0x1fe   : > { %1921 = vmatpush1.bf16.msra.mxu1 %v8681_v58  ;;  %v9597_v58 = vld [vmem:[#allocation2 + $0x644] ss:$8 sps:$4 sm:$0xff]  }
 0x1ff   : > { %1922 = vmatprep.subr.bf16.mxu1 %v8686_v59  ;;  %v9600_v59 = vld [vmem:[#allocation2 + $0x640] ss:$8 sps:$4 sm:$0xff]  }
 0x202   : > { %1923 = vmatpush1.bf16.msra.mxu1 %v8684_v60  ;;  %v9603_v60 = vld [vmem:[#allocation2 + $0x654] ss:$8 sps:$4 sm:$0xff]  }
 0x203   : > { %1924 = vmatprep.subr.bf16.mxu1 %v8689_v61  ;;  %v9606_v61 = vld [vmem:[#allocation2 + $0x650] ss:$8 sps:$4 sm:$0xff]  }
 0x206   : > { %1925 = vmatpush1.bf16.msra.mxu1 %v8687_v62  ;;  %v9609_v62 = vld [vmem:[#allocation2 + $0x664] ss:$8 sps:$4 sm:$0xff]  }
 0x207   : > { %1926 = vmatprep.subr.bf16.mxu1 %v8692_v63  ;;  %v9612_v63 = vld [vmem:[#allocation2 + $0x660] ss:$8 sps:$4 sm:$0xff]  }
 0x20a   : > { %1927 = vmatpush1.bf16.msra.mxu1 %v8690_v1  ;;  %v9615_v1 = vld [vmem:[#allocation2 + $0x674] ss:$8 sps:$4 sm:$0xff]  }
 0x20b   : > { %1928 = vmatprep.subr.bf16.mxu1 %v8695_v3  ;;  %v9618_v3 = vld [vmem:[#allocation2 + $0x670] ss:$8 sps:$4 sm:$0xff]  }
 0x20e   : > { %1929 = vmatpush1.bf16.msra.mxu1 %v8693_v4  ;;  %v9621_v4 = vld [vmem:[#allocation2 + $0x684] ss:$8 sps:$4 sm:$0xff]  }
 0x20f   : > { %1930 = vmatprep.subr.bf16.mxu1 %v8698_v5  ;;  %v9624_v5 = vld [vmem:[#allocation2 + $0x680] ss:$8 sps:$4 sm:$0xff]  }
 0x212   : > { %1931 = vmatpush1.bf16.msra.mxu1 %v8696_v6  ;;  %v9627_v6 = vld [vmem:[#allocation2 + $0x694] ss:$8 sps:$4 sm:$0xff]  }
 0x213   : > { %1932 = vmatprep.subr.bf16.mxu1 %v8701_v7  ;;  %v9630_v7 = vld [vmem:[#allocation2 + $0x690] ss:$8 sps:$4 sm:$0xff]  }
 0x216   : > { %1933 = vmatpush1.bf16.msra.mxu1 %v8699_v8  ;;  %v9633_v8 = vld [vmem:[#allocation2 + $0x6a4] ss:$8 sps:$4 sm:$0xff]  }
 0x217   : > { %1934 = vmatprep.subr.bf16.mxu1 %v8704_v9  ;;  %v9636_v9 = vld [vmem:[#allocation2 + $0x6a0] ss:$8 sps:$4 sm:$0xff]  }
 0x21a   : > { %1935 = vmatpush1.bf16.msra.mxu1 %v8702_v10  ;;  %v9639_v10 = vld [vmem:[#allocation2 + $0x6b4] ss:$8 sps:$4 sm:$0xff]  }
 0x21b   : > { %2146 = vmatprep.subr.bf16.mxu1 %v8707_v11  ;;  %v9642_v11 = vld [vmem:[#allocation2 + $0x6b0] ss:$8 sps:$4 sm:$0xff]  }
 0x21d   : > { %1937 = vmatmul.mubr.bf16.vlgmr.msra.gmra.mrb[12].mxu1 %v9507_v28 }
 0x21e   : > { %2147 = vmatpush1.bf16.msra.mxu1 %v8705_v12  ;;  %2178 = vmatprep.mubr.bf16.mxu1 %v1983_v14  ;;  %v9645_v12 = vld [vmem:[#allocation2 + $0x6c4] ss:$8 sps:$4 sm:$0xff]   ;;  %v9651_v14 = vld [vmem:[#allocation2 + $0x6d4] ss:$8 sps:$4 sm:$0xff]  }
 0x21f   : > { %2148 = vmatprep.subr.bf16.mxu1 %v8710_v13  ;;  %v9648_v13 = vld [vmem:[#allocation2 + $0x6c0] ss:$8 sps:$4 sm:$0xff]  }
 0x222   : > { %2149 = vmatpush1.bf16.msra.mxu1 %v8708_v47  ;;  %v9654_v47 = vld [vmem:[#allocation2 + $0x6d0] ss:$8 sps:$4 sm:$0xff]  }
 0x223   : > { %2150 = vmatprep.subr.bf16.mxu1 %v8713_v15  ;;  %v9657_v15 = vld [vmem:[#allocation2 + $0x6e4] ss:$8 sps:$4 sm:$0xff]  }
 0x226   : > { %2151 = vmatpush1.bf16.msra.mxu1 %v8711_v16  ;;  %v9660_v16 = vld [vmem:[#allocation2 + $0x6e0] ss:$8 sps:$4 sm:$0xff]  }
 0x227   : > { %2152 = vmatprep.subr.bf16.mxu1 %v8716_v17  ;;  %v9663_v17 = vld [vmem:[#allocation2 + $0x6f4] ss:$8 sps:$4 sm:$0xff]  }
 0x228   : > { %11240 = vst [vmem:[#allocation6_spill] sm:$0xff] %v9663_v17 }
 0x22a   : > { %2153 = vmatpush1.bf16.msra.mxu1 %v8714_v18  ;;  %v9666_v18 = vld [vmem:[#allocation2 + $0x6f0] ss:$8 sps:$4 sm:$0xff]  }
 0x22b   : > { %2154 = vmatprep.subr.bf16.mxu1 %v8719_v19  ;;  %11241 = vst [vmem:[#allocation7_spill] sm:$0xff] %v9666_v18  ;;  %v9669_v19 = vld [vmem:[#allocation2 + $0x704] ss:$8 sps:$4 sm:$0xff]  }
 0x22c   : > { %11242 = vst [vmem:[#allocation8_spill] sm:$0xff] %v9669_v19 }
 0x22e   : > { %2155 = vmatpush1.bf16.msra.mxu1 %v8717_v20  ;;  %v9672_v20 = vld [vmem:[#allocation2 + $0x700] ss:$8 sps:$4 sm:$0xff]  }
 0x22f   : > { %2156 = vmatprep.subr.bf16.mxu1 %v8722_v21  ;;  %11243 = vst [vmem:[#allocation9_spill] sm:$0xff] %v9672_v20  ;;  %v2222_v21 = vrot.slane %v9507_v28, 4 }
 0x232   : > { %2157 = vmatpush1.bf16.msra.mxu1 %v8720_v22  ;;  %v9676_v22 = vld [vmem:[#allocation2 + $0x714] ss:$8 sps:$4 sm:$0xff]  }
 0x233   : > { %2158 = vmatprep.subr.bf16.mxu1 %v8725_v23  ;;  %11244 = vst [vmem:[#allocation10_spill] sm:$0xff] %v9676_v22  ;;  %v2463_v23 = vrot.slane %v9509_v30, 6  ;;  %v9692_v30 = vld [vmem:[#allocation2 + $0x720] ss:$8 sps:$4 sm:$0xff]  }
 0x234   : > { %11247 = vst [vmem:[#allocation13_spill] sm:$0xff] %v9692_v30 }
 0x236   : > { %2159 = vmatpush1.bf16.msra.mxu1 %v8723_v24  ;;  %v654_v24 = vld [vmem:[%s11141_s7] sm:$0xf] }
 0x237   : > { %2160 = vmatprep.subr.bf16.mxu1 %v8728_v25  ;;  %v9683_v25 = vld [vmem:[#allocation2 + $0x710] ss:$8 sps:$4 sm:$0xff]   ;;  %2907 = vperm.xlu0 %8459, %v654_v24  }
 0x238   : > { %11245 = vst [vmem:[#allocation11_spill] sm:$0xff] %v9683_v25  ;;  %v9701_v24 = vld [vmem:[#allocation2 + $0x730] ss:$8 sps:$4 sm:$0xff]  }
 0x239   : > { %11249 = vst [vmem:[#allocation15_spill] sm:$0xff] %v9701_v24 }
 0x23a   : > { %2161 = vmatpush1.bf16.msra.mxu1 %v9521_v26 }
 0x23b   : > { %2162 = vmatprep.subr.bf16.mxu1 %v9523_v27 }
 0x23e   : > { %2163 = vmatpush1.bf16.msra.mxu1 %v9526_v29 }
 0x23f   : > { %2164 = vmatprep.subr.bf16.mxu1 %v9529_v31 }
 0x242   : > { %2165 = vmatpush1.bf16.msra.mxu1 %v9532_v32 }
 0x243   : > { %2166 = vmatprep.subr.bf16.mxu1 %v9535_v34 }
 0x246   : > { %2167 = vmatpush1.bf16.msra.mxu1 %v9538_v36 }
 0x247   : > { %2168 = vmatprep.subr.bf16.mxu1 %v9541_v37 }
 0x24a   : > { %2169 = vmatpush1.bf16.msra.mxu1 %v9544_v38 }
 0x24b   : > { %2170 = vmatprep.subr.bf16.mxu1 %v9547_v39 }
 0x24e   : > { %2171 = vmatpush1.bf16.msra.mxu1 %v9550_v40 }
 0x24f   : > { %2172 = vmatprep.subr.bf16.mxu1 %v9553_v41 }
 0x252   : > { %2173 = vmatpush1.bf16.msra.mxu1 %v9556_v42 }
 0x253   : > { %2174 = vmatprep.subr.bf16.mxu1 %v9559_v43 }
 0x256   : > { %2175 = vmatpush1.bf16.msra.mxu1 %v9562_v44 }
 0x257   : > { %2176 = vmatprep.subr.bf16.mxu1 %v9565_v46 }
 0x25a   : > { %2177 = vmatpush1.bf16.msra.mxu1 %v9568_v48 }
 0x25b   : > { %2386 = vmatprep.subr.bf16.mxu1 %v9571_v49 }
 0x25d   : > { %2179 = vmatmul.mubr.bf16.vlgmr.msra.gmra.mrb[12].mxu1 %v1982_v51  ;;  %v9686_v51 = vld [vmem:[#allocation2 + $0x724] ss:$8 sps:$4 sm:$0xff]  }
 0x25e   : > { %2387 = vmatpush1.bf16.msra.mxu1 %v9574_v50  ;;  %2418 = vmatprep.mubr.bf16.mxu1 %v2223_v52  ;;  %11246 = vst [vmem:[#allocation12_spill] sm:$0xff] %v9686_v51  ;;  %v655_v52 = vld [vmem:[%s11142_s8] sm:$0xf] }
 0x25f   : > { %2388 = vmatprep.subr.bf16.mxu1 %v9578_v45  ;;  %2914 = vperm.xlu0 %8459, %v655_v52   ;;  %v9710_v52 = vld [vmem:[#allocation2 + $0x740] ss:$8 sps:$4 sm:$0xff]  }
 0x260   : > { %11251 = vst [vmem:[#allocation17_spill] sm:$0xff] %v9710_v52 }
 0x262   : > { %2389 = vmatpush1.bf16.msra.mxu1 %v9582_v53 }
 0x263   : > { %2390 = vmatprep.subr.bf16.mxu1 %v9585_v54 }
 0x266   : > { %2391 = vmatpush1.bf16.msra.mxu1 %v9588_v55 }
 0x267   : > { %2392 = vmatprep.subr.bf16.mxu1 %v9591_v56 }
 0x26a   : > { %2393 = vmatpush1.bf16.msra.mxu1 %v9594_v57 }
 0x26b   : > { %2394 = vmatprep.subr.bf16.mxu1 %v9597_v58 }
 0x26e   : > { %2395 = vmatpush1.bf16.msra.mxu1 %v9600_v59 }
 0x26f   : > { %2396 = vmatprep.subr.bf16.mxu1 %v9603_v60 }
 0x272   : > { %2397 = vmatpush1.bf16.msra.mxu1 %v9606_v61 }
 0x273   : > { %2398 = vmatprep.subr.bf16.mxu1 %v9609_v62 }
 0x276   : > { %2399 = vmatpush1.bf16.msra.mxu1 %v9612_v63 }
 0x277   : > { %2400 = vmatprep.subr.bf16.mxu1 %v9615_v1 }
 0x27a   : > { %2401 = vmatpush1.bf16.msra.mxu1 %v9618_v3 }
 0x27b   : > { %2402 = vmatprep.subr.bf16.mxu1 %v9621_v4 }
 0x27e   : > { %2403 = vmatpush1.bf16.msra.mxu1 %v9624_v5 }
 0x27f   : > { %2404 = vmatprep.subr.bf16.mxu1 %v9627_v6 }
 0x282   : > { %2405 = vmatpush1.bf16.msra.mxu1 %v9630_v7 }
 0x283   : > { %2406 = vmatprep.subr.bf16.mxu1 %v9633_v8 }
 0x286   : > { %2407 = vmatpush1.bf16.msra.mxu1 %v9636_v9 }
 0x287   : > { %2408 = vmatprep.subr.bf16.mxu1 %v9639_v10 }
 0x28a   : > { %2409 = vmatpush1.bf16.msra.mxu1 %v9642_v11 }
 0x28b   : > { %2410 = vmatprep.subr.bf16.mxu1 %v9645_v12 }
 0x28e   : > { %2411 = vmatpush1.bf16.msra.mxu1 %v9648_v13 }
 0x28f   : > { %2412 = vmatprep.subr.bf16.mxu1 %v9651_v14 }
 0x292   : > { %2413 = vmatpush1.bf16.msra.mxu1 %v9654_v47 }
 0x293   : > { %2414 = vmatprep.subr.bf16.mxu1 %v9657_v15 }
 0x296   : > { %2415 = vmatpush1.bf16.msra.mxu1 %v9660_v16 }
 0x297   : > { %2416 = vmatprep.subr.bf16.mxu1 %v9663_v17 }
 0x29a   : > { %2417 = vmatpush1.bf16.msra.mxu1 %v9666_v18 }
 0x29b   : > { %2626 = vmatprep.subr.bf16.mxu1 %v9669_v19 }
 0x29d   : > { %2419 = vmatmul.mubr.bf16.vlgmr.msra.gmra.mrb[12].mxu1 %v2222_v21  ;;  %v9695_v21 = vld [vmem:[#allocation2 + $0x734] ss:$8 sps:$4 sm:$0xff]  }
 0x29e   : > { %2627 = vmatpush1.bf16.msra.mxu1 %v9672_v20  ;;  %2658 = vmatprep.mubr.bf16.mxu1 %v2463_v23  ;;  %11248 = vst [vmem:[#allocation14_spill] sm:$0xff] %v9695_v21  ;;  %v7285_v23 = vld [vmem:[%s11144_s10 + $0x8] sm:$0xff] }
 0x29f   : > { %2628 = vmatprep.subr.bf16.mxu1 %v9676_v22  ;;  %4838 = vperm.xlu0 %8459, %v7285_v23   ;;  %v9719_v23 = vld [vmem:[#allocation2 + $0x750] ss:$8 sps:$4 sm:$0xff]  }
 0x2a0   : > { %11253 = vst [vmem:[#allocation19_spill] sm:$0xff] %v9719_v23 }
 0x2a2   : > { %2629 = vmatpush1.bf16.msra.mxu1 %v9683_v25 }
 0x2a3   : > { %2630 = vmatprep.subr.bf16.mxu1 %v9686_v51  ;;  %v9713_v51 = vld [vmem:[#allocation2 + $0x754] ss:$8 sps:$4 sm:$0xff]   ;;  %3441 = vperm.xlu0 %8459, %v7148_v2   ;;  %v9728_v2 = vld [vmem:[#allocation2 + $0x760] ss:$8 sps:$4 sm:$0xff]  }
 0x2a4   : > { %11252 = vst [vmem:[#allocation18_spill] sm:$0xff] %v9713_v51  ;;  %11255 = vst [vmem:[#allocation21_spill] sm:$0xff] %v9728_v2 }
 0x2a6   : > { %2631 = vmatpush1.bf16.msra.mxu1 %v9692_v30  ;;  %v9722_v30 = vld [vmem:[#allocation2 + $0x764] ss:$8 sps:$4 sm:$0xff]  }
 0x2a7   : > { %2632 = vmatprep.subr.bf16.mxu1 %v9695_v21  ;;  %v4898_v21 = vld [vmem:[%s11147_s13] sm:$0xf]  ;;  %11254 = vst [vmem:[#allocation20_spill] sm:$0xff] %v9722_v30 }
 0x2a8   : > { %4901 = vperm.xlu0 %8459, %v4898_v21   ;;  %v9737_v21 = vld [vmem:[#allocation2 + $0x784] ss:$8 sps:$4 sm:$0xff]  }
 0x2a9   : > { %11258 = vst [vmem:[#allocation24_spill] sm:$0xff] %v9737_v21 }
 0x2aa   : > { %2633 = vmatpush1.bf16.msra.mxu1 %v9701_v24  ;;  %v9731_v24 = vld [vmem:[#allocation2 + $0x774] ss:$8 sps:$4 sm:$0xff]  }
 0x2ab   : > { %2634 = vmatprep.subr.bf16.mxu1 %v9704_v0  ;;  %v5020_v0 = vld [vmem:[%s11150_s16] sm:$0xff]  ;;  %11256 = vst [vmem:[#allocation22_spill] sm:$0xff] %v9731_v24 }
 0x2ac   : > { %6712 = vperm.xlu0 %8459, %v5020_v0   ;;  %v9749_v0 = vld [vmem:[#allocation2 + $0x7a4] ss:$8 sps:$4 sm:$0xff]  }
 0x2ad   : > { %11262 = vst [vmem:[#allocation28_spill] sm:$0xff] %v9749_v0 }
 0x2ae   : > { %2635 = vmatpush1.bf16.msra.mxu1 %v9710_v52  ;;  %v9734_v52 = vld [vmem:[#allocation2 + $0x770] ss:$8 sps:$4 sm:$0xff]  }
 0x2af   : > { %2636 = vmatprep.subr.bf16.mxu1 %v9713_v51  ;;  %11257 = vst [vmem:[#allocation23_spill] sm:$0xff] %v9734_v52  ;;  %v9740_v51 = vld [vmem:[#allocation2 + $0x780] ss:$8 sps:$4 sm:$0xff]  }
 0x2b0   : > { %11259 = vst [vmem:[#allocation25_spill] sm:$0xff] %v9740_v51 }
 0x2b2   : > { %2637 = vmatpush1.bf16.msra.mxu1 %v9719_v23  ;;  %v9743_v23 = vld [vmem:[#allocation2 + $0x794] ss:$8 sps:$4 sm:$0xff]  }
 0x2b3   : > { %2638 = vmatprep.subr.bf16.mxu1 %v9722_v30  ;;  %11260 = vst [vmem:[#allocation26_spill] sm:$0xff] %v9743_v23  ;;  %v9746_v30 = vld [vmem:[#allocation2 + $0x790] ss:$8 sps:$4 sm:$0xff]  }
 0x2b4   : > { %11261 = vst [vmem:[#allocation27_spill] sm:$0xff] %v9746_v30 }
 0x2b6   : > { %2639 = vmatpush1.bf16.msra.mxu1 %v9728_v2  ;;  %v9792_v2 = vld [vmem:[#allocation2 + $0x814] ss:$8 sps:$4 sm:$0xff]  }
 0x2b7   : > { %2640 = vmatprep.subr.bf16.mxu1 %v9731_v24  ;;  %v9752_v24 = vld [vmem:[#allocation2 + $0x7a0] ss:$8 sps:$4 sm:$0xff]   ;;  %11276 = vst [vmem:[#allocation42_spill] sm:$0xff] %v9792_v2 }
 0x2b8   : > { %11263 = vst [vmem:[#allocation29_spill] sm:$0xff] %v9752_v24 }
 0x2ba   : > { %2641 = vmatpush1.bf16.msra.mxu1 %v9734_v52  ;;  %v9755_v52 = vld [vmem:[#allocation2 + $0x7b4] ss:$8 sps:$4 sm:$0xff]  }
 0x2bb   : > { %2642 = vmatprep.subr.bf16.mxu1 %v9737_v21  ;;  %11264 = vst [vmem:[#allocation30_spill] sm:$0xff] %v9755_v52  ;;  %v9758_v21 = vld [vmem:[#allocation2 + $0x7b0] ss:$8 sps:$4 sm:$0xff]  }
 0x2bc   : > { %11265 = vst [vmem:[#allocation31_spill] sm:$0xff] %v9758_v21 }
 0x2be   : > { %2643 = vmatpush1.bf16.msra.mxu1 %v9740_v51  ;;  %v9761_v51 = vld [vmem:[#allocation2 + $0x7c4] ss:$8 sps:$4 sm:$0xff]  }
 0x2bf   : > { %2644 = vmatprep.subr.bf16.mxu1 %v9743_v23  ;;  %11266 = vst [vmem:[#allocation32_spill] sm:$0xff] %v9761_v51  ;;  %v9764_v23 = vld [vmem:[#allocation2 + $0x7c0] ss:$8 sps:$4 sm:$0xff]  }
 0x2c0   : > { %11267 = vst [vmem:[#allocation33_spill] sm:$0xff] %v9764_v23 }
 0x2c2   : > { %2645 = vmatpush1.bf16.msra.mxu1 %v9746_v30  ;;  %v9767_v30 = vld [vmem:[#allocation2 + $0x7d4] ss:$8 sps:$4 sm:$0xff]  }
 0x2c3   : > { %2646 = vmatprep.subr.bf16.mxu1 %v9749_v0  ;;  %11268 = vst [vmem:[#allocation34_spill] sm:$0xff] %v9767_v30  ;;  %v9770_v0 = vld [vmem:[#allocation2 + $0x7d0] ss:$8 sps:$4 sm:$0xff]  }
 0x2c4   : > { %11269 = vst [vmem:[#allocation35_spill] sm:$0xff] %v9770_v0 }
 0x2c6   : > { %2647 = vmatpush1.bf16.msra.mxu1 %v9752_v24  ;;  %v9773_v24 = vld [vmem:[#allocation2 + $0x7e4] ss:$8 sps:$4 sm:$0xff]  }
 0x2c7   : > { %2648 = vmatprep.subr.bf16.mxu1 %v9755_v52  ;;  %11270 = vst [vmem:[#allocation36_spill] sm:$0xff] %v9773_v24  ;;  %v9776_v52 = vld [vmem:[#allocation2 + $0x7e0] ss:$8 sps:$4 sm:$0xff]  }
 0x2c8   : > { %11271 = vst [vmem:[#allocation37_spill] sm:$0xff] %v9776_v52 }
 0x2ca   : > { %2649 = vmatpush1.bf16.msra.mxu1 %v9758_v21  ;;  %v9779_v21 = vld [vmem:[#allocation2 + $0x7f4] ss:$8 sps:$4 sm:$0xff]  }
 0x2cb   : > { %2650 = vmatprep.subr.bf16.mxu1 %v9761_v51  ;;  %11272 = vst [vmem:[#allocation38_spill] sm:$0xff] %v9779_v21  ;;  %v9782_v51 = vld [vmem:[#allocation2 + $0x7f0] ss:$8 sps:$4 sm:$0xff]  }
 0x2cc   : > { %11273 = vst [vmem:[#allocation39_spill] sm:$0xff] %v9782_v51 }
 0x2ce   : > { %2651 = vmatpush1.bf16.msra.mxu1 %v9764_v23  ;;  %v9785_v23 = vld [vmem:[#allocation2 + $0x804] ss:$8 sps:$4 sm:$0xff]  }
 0x2cf   : > { %2652 = vmatprep.subr.bf16.mxu1 %v9767_v30  ;;  %11274 = vst [vmem:[#allocation40_spill] sm:$0xff] %v9785_v23  ;;  %v9788_v30 = vld [vmem:[#allocation2 + $0x800] ss:$8 sps:$4 sm:$0xff]  }
 0x2d0   : > { %11275 = vst [vmem:[#allocation41_spill] sm:$0xff] %v9788_v30 }
 0x2d2   : > { %2653 = vmatpush1.bf16.msra.mxu1 %v9770_v0  ;;  %v2462_v0 = vrot.slane %v9507_v28, 6  ;;  %v9803_v28 = vld [vmem:[#allocation2 + $0x820] ss:$8 sps:$4 sm:$0xff]  }
 0x2d3   : > { %2654 = vmatprep.subr.bf16.mxu1 %v9773_v24  ;;  %v757_v24 = vpack.c.bf16 %v9513_v35, %v9513_v35  ;;  %11279 = vst [vmem:[#allocation45_spill] sm:$0xff] %v9803_v28  ;;  %v9809_v35 = vld [vmem:[#allocation2 + $0x830] ss:$8 sps:$4 sm:$0xff]  }
 0x2d4   : > { %11281 = vst [vmem:[#allocation47_spill] sm:$0xff] %v9809_v35 }
 0x2d6   : > { %2655 = vmatpush1.bf16.msra.mxu1 %v9776_v52 }
 0x2d7   : > { %2656 = vmatprep.subr.bf16.mxu1 %v9779_v21  ;;  %v9797_v21 = vld [vmem:[#allocation2 + $0x810] ss:$8 sps:$4 sm:$0xff]  }
 0x2d8   : > { %11277 = vst [vmem:[#allocation43_spill] sm:$0xff] %v9797_v21 }
 0x2da   : > { %2657 = vmatpush1.bf16.msra.mxu1 %v9782_v51  ;;  %v9800_v51 = vld [vmem:[#allocation2 + $0x824] ss:$8 sps:$4 sm:$0xff]  }
 0x2db   : > { %2862 = vmatprep.subr.bf16.mxu1 %v9785_v23  ;;  %11278 = vst [vmem:[#allocation44_spill] sm:$0xff] %v9800_v51  ;;  %v9806_v23 = vld [vmem:[#allocation2 + $0x834] ss:$8 sps:$4 sm:$0xff]  }
 0x2dc   : > { %11280 = vst [vmem:[#allocation46_spill] sm:$0xff] %v9806_v23 }
 0x2dd   : > { %2659 = vmatmul.mubr.bf16.vlgmr.msra.gmra.mrb[12].mxu1 %v2462_v0  ;;  %v9815_v0 = vld [vmem:[#allocation2 + $0x840] ss:$8 sps:$4 sm:$0xff]  }
 0x2de   : > { %2863 = vmatpush1.bf16.msra.mxu1 %v9788_v30  ;;  %2894 = vmatprep.mubr.bf16.mxu1 %v757_v24  ;;  %v9812_v24 = vld [vmem:[#allocation2 + $0x844] ss:$8 sps:$4 sm:$0xff]   ;;  %11283 = vst [vmem:[#allocation49_spill] sm:$0xff] %v9815_v0 }
 0x2df   : > { %2864 = vmatprep.subr.bf16.mxu1 %v9792_v2  ;;  %11282 = vst [vmem:[#allocation48_spill] sm:$0xff] %v9812_v24 }
 0x2e2   : > { %2865 = vmatpush1.bf16.msra.mxu1 %v9797_v21  ;;  %v9818_v21 = vld [vmem:[#allocation2 + $0x854] ss:$8 sps:$4 sm:$0xff]  }
 0x2e3   : > { %2866 = vmatprep.subr.bf16.mxu1 %v9800_v51  ;;  %11284 = vst [vmem:[#allocation50_spill] sm:$0xff] %v9818_v21  ;;  %v9821_v51 = vld [vmem:[#allocation2 + $0x850] ss:$8 sps:$4 sm:$0xff]  }
 0x2e4   : > { %11285 = vst [vmem:[#allocation51_spill] sm:$0xff] %v9821_v51 }
 0x2e6   : > { %2867 = vmatpush1.bf16.msra.mxu1 %v9803_v28  ;;  %v9824_v28 = vld [vmem:[#allocation2 + $0x864] ss:$8 sps:$4 sm:$0xff]  }
 0x2e7   : > { %2868 = vmatprep.subr.bf16.mxu1 %v9806_v23  ;;  %11286 = vst [vmem:[#allocation52_spill] sm:$0xff] %v9824_v28  ;;  %v9827_v23 = vld [vmem:[#allocation2 + $0x860] ss:$8 sps:$4 sm:$0xff]  }
 0x2e8   : > { %11287 = vst [vmem:[#allocation53_spill] sm:$0xff] %v9827_v23 }
 0x2ea   : > { %2869 = vmatpush1.bf16.msra.mxu1 %v9809_v35  ;;  %v9830_v35 = vld [vmem:[#allocation2 + $0x874] ss:$8 sps:$4 sm:$0xff]  }
 0x2eb   : > { %2870 = vmatprep.subr.bf16.mxu1 %v9812_v24  ;;  %11288 = vst [vmem:[#allocation54_spill] sm:$0xff] %v9830_v35  ;;  %v9833_v24 = vld [vmem:[#allocation2 + $0x870] ss:$8 sps:$4 sm:$0xff]  }
 0x2ec   : > { %11289 = vst [vmem:[#allocation55_spill] sm:$0xff] %v9833_v24 }
 0x2ee   : > { %2871 = vmatpush1.bf16.msra.mxu1 %v9815_v0  ;;  %v9836_v0 = vld [vmem:[#allocation2 + $0x884] ss:$8 sps:$4 sm:$0xff]  }
 0x2ef   : > { %2872 = vmatprep.subr.bf16.mxu1 %v9818_v21  ;;  %11290 = vst [vmem:[#allocation56_spill] sm:$0xff] %v9836_v0  ;;  %v9839_v21 = vld [vmem:[#allocation2 + $0x880] ss:$8 sps:$4 sm:$0xff]  }
 0x2f0   : > { %11291 = vst [vmem:[#allocation57_spill] sm:$0xff] %v9839_v21 }
 0x2f2   : > { %2873 = vmatpush1.bf16.msra.mxu1 %v9821_v51  ;;  %v9842_v51 = vld [vmem:[#allocation2 + $0x894] ss:$8 sps:$4 sm:$0xff]  }
 0x2f3   : > { %2874 = vmatprep.subr.bf16.mxu1 %v9824_v28  ;;  %11292 = vst [vmem:[#allocation58_spill] sm:$0xff] %v9842_v51  ;;  %v9845_v28 = vld [vmem:[#allocation2 + $0x890] ss:$8 sps:$4 sm:$0xff]  }
 0x2f4   : > { %11293 = vst [vmem:[#allocation59_spill] sm:$0xff] %v9845_v28 }
 0x2f6   : > { %2875 = vmatpush1.bf16.msra.mxu1 %v9827_v23  ;;  %v9848_v23 = vld [vmem:[#allocation2 + $0x8a4] ss:$8 sps:$4 sm:$0xff]  }
 0x2f7   : > { %2876 = vmatprep.subr.bf16.mxu1 %v9830_v35  ;;  %11294 = vst [vmem:[#allocation60_spill] sm:$0xff] %v9848_v23  ;;  %v9851_v35 = vld [vmem:[#allocation2 + $0x8a0] ss:$8 sps:$4 sm:$0xff]  }
 0x2f8   : > { %11295 = vst [vmem:[#allocation61_spill] sm:$0xff] %v9851_v35 }
 0x2fa   : > { %2877 = vmatpush1.bf16.msra.mxu1 %v9833_v24  ;;  %v9854_v24 = vld [vmem:[#allocation2 + $0x8b4] ss:$8 sps:$4 sm:$0xff]  }
 0x2fb   : > { %2878 = vmatprep.subr.bf16.mxu1 %v9836_v0  ;;  %11296 = vst [vmem:[#allocation62_spill] sm:$0xff] %v9854_v24  ;;  %v9857_v0 = vld [vmem:[#allocation2 + $0x8b0] ss:$8 sps:$4 sm:$0xff]  }
 0x2fc   : > { %11297 = vst [vmem:[#allocation63_spill] sm:$0xff] %v9857_v0 }
 0x2fe   : > { %2879 = vmatpush1.bf16.msra.mxu1 %v9839_v21  ;;  %v9860_v21 = vld [vmem:[#allocation2 + $0x8c4] ss:$8 sps:$4 sm:$0xff]  }
 0x2ff   : > { %2880 = vmatprep.subr.bf16.mxu1 %v9842_v51  ;;  %11298 = vst [vmem:[#allocation64_spill] sm:$0xff] %v9860_v21  ;;  %v9863_v51 = vld [vmem:[#allocation2 + $0x8c0] ss:$8 sps:$4 sm:$0xff]  }
 0x300   : > { %11299 = vst [vmem:[#allocation65_spill] sm:$0xff] %v9863_v51 }
 0x302   : > { %2881 = vmatpush1.bf16.msra.mxu1 %v9845_v28  ;;  %v9866_v28 = vld [vmem:[#allocation2 + $0x8d4] ss:$8 sps:$4 sm:$0xff]  }
 0x303   : > { %2882 = vmatprep.subr.bf16.mxu1 %v9848_v23  ;;  %11300 = vst [vmem:[#allocation66_spill] sm:$0xff] %v9866_v28  ;;  %v9869_v23 = vld [vmem:[#allocation2 + $0x8d0] ss:$8 sps:$4 sm:$0xff]  }
 0x304   : > { %11301 = vst [vmem:[#allocation67_spill] sm:$0xff] %v9869_v23 }
 0x306   : > { %2883 = vmatpush1.bf16.msra.mxu1 %v9851_v35  ;;  %v9872_v35 = vld [vmem:[#allocation2 + $0x8e4] ss:$8 sps:$4 sm:$0xff]  }
 0x307   : > { %2884 = vmatprep.subr.bf16.mxu1 %v9854_v24  ;;  %11302 = vst [vmem:[#allocation68_spill] sm:$0xff] %v9872_v35  ;;  %v9875_v24 = vld [vmem:[#allocation2 + $0x8e0] ss:$8 sps:$4 sm:$0xff]  }
 0x308   : > { %11303 = vst [vmem:[#allocation69_spill] sm:$0xff] %v9875_v24 }
 0x30a   : > { %2885 = vmatpush1.bf16.msra.mxu1 %v9857_v0  ;;  %v9878_v0 = vld [vmem:[#allocation2 + $0x8f4] ss:$8 sps:$4 sm:$0xff]  }
 0x30b   : > { %2886 = vmatprep.subr.bf16.mxu1 %v9860_v21  ;;  %11304 = vst [vmem:[#allocation70_spill] sm:$0xff] %v9878_v0  ;;  %v9881_v21 = vld [vmem:[#allocation2 + $0x8f0] ss:$8 sps:$4 sm:$0xff]  }
 0x30c   : > { %11305 = vst [vmem:[#allocation71_spill] sm:$0xff] %v9881_v21 }
 0x30e   : > { %2887 = vmatpush1.bf16.msra.mxu1 %v9863_v51  ;;  %v2908_v51 = vpop.permute.xlu0 %2907 }
 0x30f   : > { %2888 = vmatprep.subr.bf16.mxu1 %v9866_v28  ;;  %v756_v28 = vpack.c.bf16 %v9511_v33, %v9511_v33  ;;  %v8897_v33 = vld [vmem:[%s11140_s6 + $0x14] sm:$0xff]  }
 0x312   : > { %2889 = vmatpush1.bf16.msra.mxu1 %v9869_v23  ;;  %v2915_v52 = vpop.permute.xlu0 %2914 }
 0x313   : > { %2890 = vmatprep.subr.bf16.mxu1 %v9872_v35 }
 0x316   : > { %2891 = vmatpush1.bf16.msra.mxu1 %v9875_v24 }
 0x317   : > { %2892 = vmatprep.subr.bf16.mxu1 %v9878_v0 }
 0x31a   : > { %2893 = vmatpush1.bf16.msra.mxu1 %v9881_v21 }
 0x31d   : > { %2895 = vmatmul.mubr.bf16.vlgmr.msra.gmra.mrb[12].mxu1 %v756_v28  ;;  %v9104_v28 = vld [vmem:[#allocation2 + $0x140] ss:$8 sps:$4 sm:$0xff]  }
 0x3f0   : > { %v2896_v23 = vpop.f32.mrb[12].mxu1 }
 0x3f1   : > { %v2910_v2 = vmul.f32 %v2908_v51, %v2896_v23  ;;  %v2898_v30 = vpop.f32.mrb[13].mxu1  ;;  %v9095_v23 = vld [vmem:[#allocation2 + $0x104] ss:$8 sps:$4 sm:$0xff]  }
 0x3f2   : > { %v2911_v35 = vmul.f32 %v2908_v51, %v2898_v30  ;;  %v2900_v25 = vpop.f32.mrb[14].mxu1  ;;  %v9100_v51 = vld [vmem:[#allocation2 + $0x120] ss:$8 sps:$4 sm:$0xff]   ;;  %v9101_v30 = vld [vmem:[#allocation2 + $0x134] ss:$8 sps:$4 sm:$0xff]  }
 0x3f3   : > { %v2917_v22 = vadd.f32 %v2915_v52, %v2910_v2  ;;  %v2901_v20 = vpop.f32.mrb[15].mxu1  ;;  %v9096_v25 = vld [vmem:[#allocation2 + $0x100] ss:$8 sps:$4 sm:$0xff]   ;;  %v9102_v2 = vld [vmem:[#allocation2 + $0x130] ss:$8 sps:$4 sm:$0xff]  }
 0x3f4   : > { %v2918_v24 = vadd.f32 %v2915_v52, %v2911_v35  ;;  %v11306_v20 = vmov 0   ;;  %v8899_v52 = vld [vmem:[%s11140_s6 + $0x24] ss:$0 sps:$4 sm:$0x33]   ;;  %v9105_v35 = vld [vmem:[#allocation2 + $0x154] ss:$8 sps:$4 sm:$0xff]  }
 0x3f5   : > { %v2919_v19 = vmax.f32 %v2917_v22, 0.0  ;;  %v9097_v22 = vld [vmem:[#allocation2 + $0x114] ss:$8 sps:$4 sm:$0xff]  }
 0x3f6   : > { %v2920_v18 = vmax.f32 %v2918_v24, 0.0  ;;  %v9106_v24 = vld [vmem:[#allocation2 + $0x150] ss:$8 sps:$4 sm:$0xff]  }
 0x3f7   : > { %v2931_v17 = vpack.c.bf16 %v2919_v19, %v2919_v19  ;;  %v9099_v19 = vld [vmem:[#allocation2 + $0x124] ss:$8 sps:$4 sm:$0xff]  }
 0x3f8   : > { %v2932_v0 = vpack.c.bf16 %v2920_v18, %v2920_v18  ;;  %v9098_v18 = vld [vmem:[#allocation2 + $0x110] ss:$8 sps:$4 sm:$0xff]  }
 0x3f9   : > { %v2956_v21 = vsel %vm684_vm0, %v2931_v17, 0  ;;  %v8898_v17 = vld [vmem:[%s11140_s6 + $0x1c] sm:$0xff]  }
 0x3fa   : > { %7153 = vmatprep.subr.msk.bf16.mxu0 %vm684_vm0, %v2932_v0  ;;  %v9107_v0 = vld [vmem:[#allocation2 + $0x164] ss:$8 sps:$4 sm:$0xff]  }
 0x3fb   : > { %2962 = vmatpush1.bf16.msra.mxu0 %v2956_v21  ;;  %v9103_v21 = vld [vmem:[#allocation2 + $0x144] ss:$8 sps:$4 sm:$0xff]  }
 0x3fc   : > { %3034 = vmatprep.subr.bf16.mxu0 %v9095_v23  ;;  %v9109_v23 = vld [vmem:[#allocation2 + $0x174] ss:$8 sps:$4 sm:$0xff]  }
 0x3fe   : > { %7154 = vmatmul.mubr.msk.bf16.vlgmr.msra.gmra.mrb[0].mxu0 %vm674_vm1, %v8897_v33  ;;  %v9108_v33 = vld [vmem:[#allocation2 + $0x160] ss:$8 sps:$4 sm:$0xff]  }
 0x3ff   : > { %3035 = vmatpush1.bf16.msra.mxu0 %v9096_v25  ;;  %3003 = vmatprep.mubr.bf16.mxu0 %v11306_v20  ;;  %v9110_v25 = vld [vmem:[#allocation2 + $0x170] ss:$8 sps:$4 sm:$0xff]  }
 0x400   : > { %3036 = vmatprep.subr.bf16.mxu0 %v9097_v22  ;;  %v9111_v22 = vld [vmem:[#allocation2 + $0x184] ss:$8 sps:$4 sm:$0xff]  }
 0x403   : > { %3037 = vmatpush1.bf16.msra.mxu0 %v9098_v18  ;;  %v9113_v18 = vld [vmem:[#allocation2 + $0x194] ss:$8 sps:$4 sm:$0xff]  }
 0x404   : > { %3038 = vmatprep.subr.bf16.mxu0 %v9099_v19  ;;  %v9114_v19 = vld [vmem:[#allocation2 + $0x190] ss:$8 sps:$4 sm:$0xff]  }
 0x406   : > { %7155 = vmatmul.mubr.msk.bf16.gmra.mrb[4].mxu0 %vm674_vm1, %v8898_v17  ;;  %v9112_v17 = vld [vmem:[#allocation2 + $0x180] ss:$8 sps:$4 sm:$0xff]  }
 0x407   : > { %3039 = vmatpush1.bf16.msra.mxu0 %v9100_v51  ;;  %3013 = vmatprep.mubr.bf16.mxu0 %v11306_v20  ;;  %v9115_v51 = vld [vmem:[#allocation2 + $0x1a4] ss:$8 sps:$4 sm:$0xff]   ;;  %v9166_v20 = vld [vmem:[#allocation2 + $0x230] ss:$8 sps:$4 sm:$0xff]  }
 0x408   : > { %3040 = vmatprep.subr.bf16.mxu0 %v9101_v30  ;;  %v9116_v30 = vld [vmem:[#allocation2 + $0x1a0] ss:$8 sps:$4 sm:$0xff]  }
 0x40b   : > { %3041 = vmatpush1.bf16.msra.mxu0 %v9102_v2  ;;  %v9118_v2 = vld [vmem:[#allocation2 + $0x1b0] ss:$8 sps:$4 sm:$0xff]  }
 0x40c   : > { %3042 = vmatprep.subr.bf16.mxu0 %v9103_v21  ;;  %v9119_v21 = vld [vmem:[#allocation2 + $0x1c4] ss:$8 sps:$4 sm:$0xff]  }
 0x40e   : > { %7156 = vmatmul.mubr.msk.bf16.gmra.mrb[8].mxu0 %vm674_vm1, %v8899_v52  ;;  %v9117_v52 = vld [vmem:[#allocation2 + $0x1b4] ss:$8 sps:$4 sm:$0xff]  }
 0x40f   : > { %3043 = vmatpush1.bf16.msra.mxu0 %v9104_v28  ;;  %v9120_v28 = vld [vmem:[#allocation2 + $0x1c0] ss:$8 sps:$4 sm:$0xff]  }
 0x410   : > { %3044 = vmatprep.subr.bf16.mxu0 %v9105_v35  ;;  %v9121_v35 = vld [vmem:[#allocation2 + $0x1d4] ss:$8 sps:$4 sm:$0xff]  }
 0x413   : > { %3045 = vmatpush1.bf16.msra.mxu0 %v9106_v24  ;;  %v9122_v24 = vld [vmem:[#allocation2 + $0x1d0] ss:$8 sps:$4 sm:$0xff]  }
 0x414   : > { %3046 = vmatprep.subr.bf16.mxu0 %v9107_v0  ;;  %v9123_v0 = vld [vmem:[#allocation2 + $0x1e4] ss:$8 sps:$4 sm:$0xff]  }
 0x417   : > { %3047 = vmatpush1.bf16.msra.mxu0 %v9108_v33  ;;  %v9124_v33 = vld [vmem:[#allocation2 + $0x1e0] ss:$8 sps:$4 sm:$0xff]  }
 0x418   : > { %3048 = vmatprep.subr.bf16.mxu0 %v9109_v23  ;;  %v9125_v23 = vld [vmem:[#allocation2 + $0x1f4] ss:$8 sps:$4 sm:$0xff]  }
 0x41b   : > { %3049 = vmatpush1.bf16.msra.mxu0 %v9110_v25  ;;  %v9126_v25 = vld [vmem:[#allocation2 + $0x1f0] ss:$8 sps:$4 sm:$0xff]  }
 0x41c   : > { %3050 = vmatprep.subr.bf16.mxu0 %v9111_v22  ;;  %v9127_v22 = vld [vmem:[#allocation2 + $0x4] ss:$8 sps:$4 sm:$0xff]  }
 0x41f   : > { %3051 = vmatpush1.bf16.msra.mxu0 %v9112_v17 }
 0x420   : > { %3052 = vmatprep.subr.bf16.mxu0 %v9113_v18 }
 0x423   : > { %3053 = vmatpush1.bf16.msra.mxu0 %v9114_v19 }
 0x424   : > { %3054 = vmatprep.subr.bf16.mxu0 %v9115_v51 }
 0x427   : > { %3055 = vmatpush1.bf16.msra.mxu0 %v9116_v30 }
 0x428   : > { %3056 = vmatprep.subr.bf16.mxu0 %v9117_v52 }
 0x42b   : > { %3057 = vmatpush1.bf16.msra.mxu0 %v9118_v2 }
 0x42c   : > { %3058 = vmatprep.subr.bf16.mxu0 %v9119_v21 }
 0x42f   : > { %3059 = vmatpush1.bf16.msra.mxu0 %v9120_v28  ;;  %v9128_v28 = vld [vmem:[#allocation2] ss:$8 sps:$4 sm:$0xff]  }
 0x430   : > { %3060 = vmatprep.subr.bf16.mxu0 %v9121_v35  ;;  %v9129_v35 = vld [vmem:[#allocation2 + $0x14] ss:$8 sps:$4 sm:$0xff]  }
 0x433   : > { %3061 = vmatpush1.bf16.msra.mxu0 %v9122_v24  ;;  %v9130_v24 = vld [vmem:[#allocation2 + $0x10] ss:$8 sps:$4 sm:$0xff]  }
 0x434   : > { %3062 = vmatprep.subr.bf16.mxu0 %v9123_v0  ;;  %v9131_v0 = vld [vmem:[#allocation2 + $0x24] ss:$8 sps:$4 sm:$0xff]  }
 0x437   : > { %3063 = vmatpush1.bf16.msra.mxu0 %v9124_v33  ;;  %v9132_v33 = vld [vmem:[#allocation2 + $0x20] ss:$8 sps:$4 sm:$0xff]  }
 0x438   : > { %3064 = vmatprep.subr.bf16.mxu0 %v9125_v23  ;;  %v9133_v23 = vld [vmem:[#allocation2 + $0x34] ss:$8 sps:$4 sm:$0xff]  }
 0x43b   : > { %3065 = vmatpush1.bf16.msra.mxu0 %v9126_v25  ;;  %v9134_v25 = vld [vmem:[#allocation2 + $0x30] ss:$8 sps:$4 sm:$0xff]  }
 0x43c   : > { %3075 = vmatprep.subr.bf16.mxu0 %v9127_v22  ;;  %v9135_v22 = vld [vmem:[#allocation2 + $0x44] ss:$8 sps:$4 sm:$0xff]  }
 0x4d1   : > { %v2995_v17 = vpop.f32.mrb[0].mxu0 }
 0x4d2   : > { %v2997_v18 = vpop.f32.mrb[1].mxu0 }
 0x4d3   : > { %v2999_v19 = vpop.f32.mrb[2].mxu0 }
 0x4d4   : > { %v9903_v51 = vpack.c.bf16 %v2999_v19, %v2995_v17  ;;  %v3001_v30 = vpop.f32.mrb[3].mxu0  ;;  %v9136_v17 = vld [vmem:[#allocation2 + $0x40] ss:$8 sps:$4 sm:$0xff]   ;;  %v9138_v19 = vld [vmem:[#allocation2 + $0x50] ss:$8 sps:$4 sm:$0xff]  }
 0x4d5   : > { %v9905_v52 = vpack.c.bf16 %v3001_v30, %v2997_v18  ;;  %v9137_v18 = vld [vmem:[#allocation2 + $0x54] ss:$8 sps:$4 sm:$0xff]   ;;  %v9139_v30 = vld [vmem:[#allocation2 + $0x64] ss:$8 sps:$4 sm:$0xff]  }
 0x4d6   : > { %v3030_v21 = vrot.slane %v9903_v51, 2 }
 0x4d7   : > { %v3031_v2 = vrot.slane %v9905_v52, 2 }
 0x4d9   : > { %3066 = vmatprep.mubr.bf16.mxu0 %v3031_v2  ;;  %v9140_v2 = vld [vmem:[#allocation2 + $0x60] ss:$8 sps:$4 sm:$0xff]  }
 0x4da   : > { %3067 = vmatmul.mubr.bf16.vlgmr.msra.gmra.mrb[12].mxu0 %v3030_v21  ;;  %v9141_v21 = vld [vmem:[#allocation2 + $0x74] ss:$8 sps:$4 sm:$0xff]  }
 0x4db   : > { %3076 = vmatpush1.bf16.msra.mxu0 %v9128_v28  ;;  %3107 = vmatprep.mubr.bf16.mxu0 %v9905_v52  ;;  %v9142_v28 = vld [vmem:[#allocation2 + $0x70] ss:$8 sps:$4 sm:$0xff]  }
 0x4dc   : > { %3077 = vmatprep.subr.bf16.mxu0 %v9129_v35  ;;  %v9143_v35 = vld [vmem:[#allocation2 + $0x84] ss:$8 sps:$4 sm:$0xff]  }
 0x4df   : > { %3078 = vmatpush1.bf16.msra.mxu0 %v9130_v24  ;;  %v9144_v24 = vld [vmem:[#allocation2 + $0x80] ss:$8 sps:$4 sm:$0xff]  }
 0x4e0   : > { %3079 = vmatprep.subr.bf16.mxu0 %v9131_v0  ;;  %v9145_v0 = vld [vmem:[#allocation2 + $0x94] ss:$8 sps:$4 sm:$0xff]  }
 0x4e3   : > { %3080 = vmatpush1.bf16.msra.mxu0 %v9132_v33  ;;  %v9146_v33 = vld [vmem:[#allocation2 + $0x90] ss:$8 sps:$4 sm:$0xff]  }
 0x4e4   : > { %3081 = vmatprep.subr.bf16.mxu0 %v9133_v23  ;;  %v9147_v23 = vld [vmem:[#allocation2 + $0xa4] ss:$8 sps:$4 sm:$0xff]  }
 0x4e7   : > { %3082 = vmatpush1.bf16.msra.mxu0 %v9134_v25  ;;  %v9148_v25 = vld [vmem:[#allocation2 + $0xa0] ss:$8 sps:$4 sm:$0xff]  }
 0x4e8   : > { %3083 = vmatprep.subr.bf16.mxu0 %v9135_v22  ;;  %v9149_v22 = vld [vmem:[#allocation2 + $0xb4] ss:$8 sps:$4 sm:$0xff]  }
 0x4eb   : > { %3084 = vmatpush1.bf16.msra.mxu0 %v9136_v17  ;;  %v9150_v17 = vld [vmem:[#allocation2 + $0xb0] ss:$8 sps:$4 sm:$0xff]  }
 0x4ec   : > { %3085 = vmatprep.subr.bf16.mxu0 %v9137_v18  ;;  %v9151_v18 = vld [vmem:[#allocation2 + $0xc4] ss:$8 sps:$4 sm:$0xff]  }
 0x4ef   : > { %3086 = vmatpush1.bf16.msra.mxu0 %v9138_v19  ;;  %v9152_v19 = vld [vmem:[#allocation2 + $0xc0] ss:$8 sps:$4 sm:$0xff]  }
 0x4f0   : > { %3087 = vmatprep.subr.bf16.mxu0 %v9139_v30  ;;  %v9153_v30 = vld [vmem:[#allocation2 + $0xd4] ss:$8 sps:$4 sm:$0xff]  }
 0x4f3   : > { %3088 = vmatpush1.bf16.msra.mxu0 %v9140_v2  ;;  %v9154_v2 = vld [vmem:[#allocation2 + $0xd0] ss:$8 sps:$4 sm:$0xff]  }
 0x4f4   : > { %3089 = vmatprep.subr.bf16.mxu0 %v9141_v21  ;;  %v9155_v21 = vld [vmem:[#allocation2 + $0xe4] ss:$8 sps:$4 sm:$0xff]  }
 0x4f7   : > { %3090 = vmatpush1.bf16.msra.mxu0 %v9142_v28  ;;  %v9156_v28 = vld [vmem:[#allocation2 + $0xe0] ss:$8 sps:$4 sm:$0xff]  }
 0x4f8   : > { %3091 = vmatprep.subr.bf16.mxu0 %v9143_v35  ;;  %v9157_v35 = vld [vmem:[#allocation2 + $0xf4] ss:$8 sps:$4 sm:$0xff]  }
 0x4fb   : > { %3092 = vmatpush1.bf16.msra.mxu0 %v9144_v24  ;;  %v9158_v24 = vld [vmem:[#allocation2 + $0xf0] ss:$8 sps:$4 sm:$0xff]  }
 0x4fc   : > { %3093 = vmatprep.subr.bf16.mxu0 %v9145_v0  ;;  %v9159_v0 = vld [vmem:[#allocation2 + $0x204] ss:$8 sps:$4 sm:$0xff]  }
 0x4ff   : > { %3094 = vmatpush1.bf16.msra.mxu0 %v9146_v33  ;;  %v3117_v33 = vrot.slane %v9905_v52, 4 }
 0x500   : > { %3095 = vmatprep.subr.bf16.mxu0 %v9147_v23  ;;  %v3005_v23 = vpop.f32.mrb[4].mxu0 }
 0x503   : > { %3096 = vmatpush1.bf16.msra.mxu0 %v9148_v25  ;;  %v9160_v25 = vld [vmem:[#allocation2 + $0x200] ss:$8 sps:$4 sm:$0xff]  }
 0x504   : > { %3097 = vmatprep.subr.bf16.mxu0 %v9149_v22  ;;  %v3007_v22 = vpop.f32.mrb[5].mxu0 }
 0x507   : > { %3098 = vmatpush1.bf16.msra.mxu0 %v9150_v17  ;;  %v9161_v17 = vld [vmem:[#allocation2 + $0x214] ss:$8 sps:$4 sm:$0xff]  }
 0x508   : > { %3099 = vmatprep.subr.bf16.mxu0 %v9151_v18  ;;  %v3009_v18 = vpop.f32.mrb[6].mxu0 }
 0x50b   : > { %3100 = vmatpush1.bf16.msra.mxu0 %v9152_v19  ;;  %v9912_v19 = vpack.c.bf16 %v3009_v18, %v3005_v23  ;;  %v9167_v23 = vld [vmem:[#allocation2 + $0x244] ss:$8 sps:$4 sm:$0xff]   ;;  %v9169_v18 = vld [vmem:[#allocation2 + $0x254] ss:$8 sps:$4 sm:$0xff]  }
 0x50c   : > { %3101 = vmatprep.subr.bf16.mxu0 %v9153_v30  ;;  %v3011_v30 = vpop.f32.mrb[7].mxu0 }
 0x50f   : > { %3102 = vmatpush1.bf16.msra.mxu0 %v9154_v2  ;;  %v9914_v2 = vpack.c.bf16 %v3011_v30, %v3007_v22  ;;  %v9168_v22 = vld [vmem:[#allocation2 + $0x240] ss:$8 sps:$4 sm:$0xff]   ;;  %v9170_v30 = vld [vmem:[#allocation2 + $0x250] ss:$8 sps:$4 sm:$0xff]  }
 0x510   : > { %3103 = vmatprep.subr.bf16.mxu0 %v9155_v21  ;;  %v9162_v21 = vld [vmem:[#allocation2 + $0x210] ss:$8 sps:$4 sm:$0xff]  }
 0x513   : > { %3104 = vmatpush1.bf16.msra.mxu0 %v9156_v28  ;;  %v9163_v28 = vld [vmem:[#allocation2 + $0x224] ss:$8 sps:$4 sm:$0xff]  }
 0x514   : > { %3105 = vmatprep.subr.bf16.mxu0 %v9157_v35  ;;  %v9916_v35 = vpop.f32.mrb[8].mxu0 }
 0x515   : > { %11307 = vst [vmem:[#allocation72_spill] sm:$0xff] %v9916_v35  ;;  %v9174_v35 = vld [vmem:[#allocation2 + $0x270] ss:$8 sps:$4 sm:$0xff]  }
 0x517   : > { %3106 = vmatpush1.bf16.msra.mxu0 %v9158_v24  ;;  %v9164_v24 = vld [vmem:[#allocation2 + $0x220] ss:$8 sps:$4 sm:$0xff]  }
 0x518   : > { %3120 = vmatprep.subr.bf16.mxu0 %v9159_v0  ;;  %v9918_v0 = vpop.f32.mrb[9].mxu0 }
 0x51a   : > { %3108 = vmatmul.mubr.bf16.vlgmr.msra.gmra.mrb[12].mxu0 %v9903_v51 }
 0x51b   : > { %3121 = vmatpush1.bf16.msra.mxu0 %v9160_v25  ;;  %3152 = vmatprep.mubr.bf16.mxu0 %v3117_v33  ;;  %v9165_v33 = vld [vmem:[#allocation2 + $0x234] ss:$8 sps:$4 sm:$0xff]   ;;  %v3019_v25 = vpop.f32.mrb[10].mxu0 }
 0x51c   : > { %3122 = vmatprep.subr.bf16.mxu0 %v9161_v17  ;;  %v3020_v17 = vpop.f32.mrb[11].mxu0  ;;  %v9176_v25 = vld [vmem:[#allocation2 + $0x280] ss:$8 sps:$4 sm:$0xff]  }
 0x51d   : > { %v9178_v17 = vld [vmem:[#allocation2 + $0x290] ss:$8 sps:$4 sm:$0xff]  }
 0x51f   : > { %3123 = vmatpush1.bf16.msra.mxu0 %v9162_v21  ;;  %v9171_v21 = vld [vmem:[#allocation2 + $0x264] ss:$8 sps:$4 sm:$0xff]  }
 0x520   : > { %3124 = vmatprep.subr.bf16.mxu0 %v9163_v28  ;;  %v9172_v28 = vld [vmem:[#allocation2 + $0x260] ss:$8 sps:$4 sm:$0xff]  }
 0x523   : > { %3125 = vmatpush1.bf16.msra.mxu0 %v9164_v24  ;;  %v9173_v24 = vld [vmem:[#allocation2 + $0x274] ss:$8 sps:$4 sm:$0xff]  }
 0x524   : > { %3126 = vmatprep.subr.bf16.mxu0 %v9165_v33  ;;  %v9175_v33 = vld [vmem:[#allocation2 + $0x284] ss:$8 sps:$4 sm:$0xff]  }
 0x527   : > { %3127 = vmatpush1.bf16.msra.mxu0 %v9166_v20  ;;  %v9177_v20 = vld [vmem:[#allocation2 + $0x294] ss:$8 sps:$4 sm:$0xff]  }
 0x528   : > { %3128 = vmatprep.subr.bf16.mxu0 %v9167_v23  ;;  %v9179_v23 = vld [vmem:[#allocation2 + $0x2a4] ss:$8 sps:$4 sm:$0xff]  }
 0x52b   : > { %3129 = vmatpush1.bf16.msra.mxu0 %v9168_v22  ;;  %v9180_v22 = vld [vmem:[#allocation2 + $0x2a0] ss:$8 sps:$4 sm:$0xff]  }
 0x52c   : > { %3130 = vmatprep.subr.bf16.mxu0 %v9169_v18  ;;  %v9181_v18 = vld [vmem:[#allocation2 + $0x2b4] ss:$8 sps:$4 sm:$0xff]  }
 0x52f   : > { %3131 = vmatpush1.bf16.msra.mxu0 %v9170_v30  ;;  %v9182_v30 = vld [vmem:[#allocation2 + $0x2b0] ss:$8 sps:$4 sm:$0xff]  }
 0x530   : > { %3132 = vmatprep.subr.bf16.mxu0 %v9171_v21  ;;  %v9183_v21 = vld [vmem:[#allocation2 + $0x2c4] ss:$8 sps:$4 sm:$0xff]  }
 0x533   : > { %3133 = vmatpush1.bf16.msra.mxu0 %v9172_v28  ;;  %v9184_v28 = vld [vmem:[#allocation2 + $0x2c0] ss:$8 sps:$4 sm:$0xff]  }
 0x534   : > { %3134 = vmatprep.subr.bf16.mxu0 %v9173_v24  ;;  %v9186_v24 = vld [vmem:[#allocation2 + $0x2d0] ss:$8 sps:$4 sm:$0xff]  }
 0x537   : > { %3135 = vmatpush1.bf16.msra.mxu0 %v9174_v35  ;;  %v9185_v35 = vld [vmem:[#allocation2 + $0x2d4] ss:$8 sps:$4 sm:$0xff]  }
 0x538   : > { %3136 = vmatprep.subr.bf16.mxu0 %v9175_v33  ;;  %v9187_v33 = vld [vmem:[#allocation2 + $0x2e4] ss:$8 sps:$4 sm:$0xff]  }
 0x53b   : > { %3137 = vmatpush1.bf16.msra.mxu0 %v9176_v25  ;;  %v9188_v25 = vld [vmem:[#allocation2 + $0x2e0] ss:$8 sps:$4 sm:$0xff]  }
 0x53c   : > { %3138 = vmatprep.subr.bf16.mxu0 %v9177_v20  ;;  %v9189_v20 = vld [vmem:[#allocation2 + $0x2f4] ss:$8 sps:$4 sm:$0xff]  }
 0x53f   : > { %3139 = vmatpush1.bf16.msra.mxu0 %v9178_v17  ;;  %v9190_v17 = vld [vmem:[#allocation2 + $0x2f0] ss:$8 sps:$4 sm:$0xff]  }
 0x540   : > { %3140 = vmatprep.subr.bf16.mxu0 %v9179_v23  ;;  %v3116_v23 = vrot.slane %v9903_v51, 4 }
 0x543   : > { %3141 = vmatpush1.bf16.msra.mxu0 %v9180_v22  ;;  %v9191_v22 = vld [vmem:[#allocation2 + $0x304] ss:$8 sps:$4 sm:$0xff]  }
 0x544   : > { %3142 = vmatprep.subr.bf16.mxu0 %v9181_v18  ;;  %v3164_v18 = vrot.slane %v9905_v52, 6  ;;  %v9201_v52 = vld [vmem:[#allocation2 + $0x354] ss:$8 sps:$4 sm:$0xff]  }
 0x547   : > { %3143 = vmatpush1.bf16.msra.mxu0 %v9182_v30  ;;  %v9192_v30 = vld [vmem:[#allocation2 + $0x300] ss:$8 sps:$4 sm:$0xff]  }
 0x548   : > { %3144 = vmatprep.subr.bf16.mxu0 %v9183_v21  ;;  %v9193_v21 = vld [vmem:[#allocation2 + $0x314] ss:$8 sps:$4 sm:$0xff]  }
 0x54b   : > { %3145 = vmatpush1.bf16.msra.mxu0 %v9184_v28  ;;  %v9194_v28 = vld [vmem:[#allocation2 + $0x310] ss:$8 sps:$4 sm:$0xff]  }
 0x54c   : > { %3146 = vmatprep.subr.bf16.mxu0 %v9185_v35  ;;  %v9195_v35 = vld [vmem:[#allocation2 + $0x324] ss:$8 sps:$4 sm:$0xff]  }
 0x54f   : > { %3147 = vmatpush1.bf16.msra.mxu0 %v9186_v24  ;;  %v9196_v24 = vld [vmem:[#allocation2 + $0x320] ss:$8 sps:$4 sm:$0xff]  }
 0x550   : > { %3148 = vmatprep.subr.bf16.mxu0 %v9187_v33  ;;  %v9197_v33 = vld [vmem:[#allocation2 + $0x334] ss:$8 sps:$4 sm:$0xff]  }
 0x553   : > { %3149 = vmatpush1.bf16.msra.mxu0 %v9188_v25  ;;  %v9198_v25 = vld [vmem:[#allocation2 + $0x330] ss:$8 sps:$4 sm:$0xff]  }
 0x554   : > { %3150 = vmatprep.subr.bf16.mxu0 %v9189_v20  ;;  %v9199_v20 = vld [vmem:[#allocation2 + $0x344] ss:$8 sps:$4 sm:$0xff]  }
 0x557   : > { %3151 = vmatpush1.bf16.msra.mxu0 %v9190_v17  ;;  %v9200_v17 = vld [vmem:[#allocation2 + $0x340] ss:$8 sps:$4 sm:$0xff]  }
 0x558   : > { %3167 = vmatprep.subr.bf16.mxu0 %v9191_v22  ;;  %v9203_v22 = vld [vmem:[#allocation2 + $0x364] ss:$8 sps:$4 sm:$0xff]  }
 0x55a   : > { %3153 = vmatmul.mubr.bf16.vlgmr.msra.gmra.mrb[12].mxu0 %v3116_v23  ;;  %v9202_v23 = vld [vmem:[#allocation2 + $0x350] ss:$8 sps:$4 sm:$0xff]  }
 0x55b   : > { %3168 = vmatpush1.bf16.msra.mxu0 %v9192_v30  ;;  %3199 = vmatprep.mubr.bf16.mxu0 %v3164_v18  ;;  %v9204_v18 = vld [vmem:[#allocation2 + $0x360] ss:$8 sps:$4 sm:$0xff]   ;;  %v9205_v30 = vld [vmem:[#allocation2 + $0x374] ss:$8 sps:$4 sm:$0xff]  }
 0x55c   : > { %3169 = vmatprep.subr.bf16.mxu0 %v9193_v21  ;;  %v9206_v21 = vld [vmem:[#allocation2 + $0x370] ss:$8 sps:$4 sm:$0xff]  }
 0x55f   : > { %3170 = vmatpush1.bf16.msra.mxu0 %v9194_v28  ;;  %v9207_v28 = vld [vmem:[#allocation2 + $0x384] ss:$8 sps:$4 sm:$0xff]  }
 0x560   : > { %3171 = vmatprep.subr.bf16.mxu0 %v9195_v35  ;;  %v9208_v35 = vld [vmem:[#allocation2 + $0x380] ss:$8 sps:$4 sm:$0xff]  }
 0x563   : > { %3172 = vmatpush1.bf16.msra.mxu0 %v9196_v24  ;;  %v9209_v24 = vld [vmem:[#allocation2 + $0x394] ss:$8 sps:$4 sm:$0xff]  }
 0x564   : > { %3173 = vmatprep.subr.bf16.mxu0 %v9197_v33  ;;  %v9210_v33 = vld [vmem:[#allocation2 + $0x390] ss:$8 sps:$4 sm:$0xff]  }
 0x567   : > { %3174 = vmatpush1.bf16.msra.mxu0 %v9198_v25  ;;  %v9211_v25 = vld [vmem:[#allocation2 + $0x3a4] ss:$8 sps:$4 sm:$0xff]  }
 0x568   : > { %3175 = vmatprep.subr.bf16.mxu0 %v9199_v20  ;;  %v9212_v20 = vld [vmem:[#allocation2 + $0x3a0] ss:$8 sps:$4 sm:$0xff]  }
 0x56b   : > { %3176 = vmatpush1.bf16.msra.mxu0 %v9200_v17  ;;  %v9213_v17 = vld [vmem:[#allocation2 + $0x3b4] ss:$8 sps:$4 sm:$0xff]  }
 0x56c   : > { %3177 = vmatprep.subr.bf16.mxu0 %v9201_v52  ;;  %v9214_v52 = vld [vmem:[#allocation2 + $0x3b0] ss:$8 sps:$4 sm:$0xff]  }
 0x56f   : > { %3178 = vmatpush1.bf16.msra.mxu0 %v9202_v23  ;;  %v648_v23 = vld [vmem:[%s9926_s2] sm:$0xff] }
 0x570   : > { %3179 = vmatprep.subr.bf16.mxu0 %v9203_v22  ;;  %v9215_v22 = vld [vmem:[#allocation2 + $0x3c4] ss:$8 sps:$4 sm:$0xff]  }
 0x573   : > { %3180 = vmatpush1.bf16.msra.mxu0 %v9204_v18  ;;  %v3468_v18 = vpack.c.bf16 %v648_v23, %v648_v23  ;;  %v3163_v23 = vrot.slane %v9903_v51, 6  ;;  %v9231_v51 = vld [vmem:[#allocation2 + $0x444] ss:$8 sps:$4 sm:$0xff]  }
 0x574   : > { %3181 = vmatprep.subr.bf16.mxu0 %v9205_v30  ;;  %v9316_v30 = vmov 0.0  }
 0x575   : > { %8025 = vmatprep.subr.bf16.mxu1 %v9316_v30  ;;  %8027 = vmatprep.mubr.msk.bf16.mxu1 %vm9317_vm3, %v9316_v30 }
 0x577   : > { %3182 = vmatpush1.bf16.msra.mxu0 %v9206_v21  ;;  %v3510_v21 = vsel %vm3508_vm2, %v3468_v18, 0  ;;  %v9224_v18 = vld [vmem:[#allocation2 + $0x400] ss:$8 sps:$4 sm:$0xff]  }
 0x578   : > { %3183 = vmatprep.subr.bf16.mxu0 %v9207_v28  ;;  %v9216_v28 = vld [vmem:[#allocation2 + $0x3c0] ss:$8 sps:$4 sm:$0xff]   ;;  %8026 = vmatpush3.bf16.msra.mxu1 %v3510_v21  ;;  %v9225_v21 = vld [vmem:[#allocation2 + $0x414] ss:$8 sps:$4 sm:$0xff]  }
 0x579   : > { %8155 = vmatprep.subr.bf16.mxu1 %v9316_v30 }
 0x57b   : > { %3184 = vmatpush1.bf16.msra.mxu0 %v9208_v35  ;;  %v9217_v35 = vld [vmem:[#allocation2 + $0x3d4] ss:$8 sps:$4 sm:$0xff]  }
 0x57c   : > { %3185 = vmatprep.subr.bf16.mxu0 %v9209_v24  ;;  %v8900_v24 = vld [vmem:[%s11143_s9] sm:$0xff]  }
 0x57d   : > { %8028 = vmatmul.mubr.msk.bf16.vlgmr.msra.gmra.mrb[16].mxu1 %vm3492_vm4, %v8900_v24  ;;  %v9228_v24 = vld [vmem:[#allocation2 + $0x420] ss:$8 sps:$4 sm:$0xff]  }
 0x57e   : > { %8031 = vmatprep.mubr.msk.bf16.mxu1 %vm9317_vm3, %v9316_v30 }
 0x57f   : > { %3186 = vmatpush1.bf16.msra.mxu0 %v9210_v33  ;;  %v9218_v33 = vld [vmem:[#allocation2 + $0x3d0] ss:$8 sps:$4 sm:$0xff]  }
 0x580   : > { %3187 = vmatprep.subr.bf16.mxu0 %v9211_v25  ;;  %v9219_v25 = vld [vmem:[#allocation2 + $0x3e4] ss:$8 sps:$4 sm:$0xff]  }
 0x583   : > { %3188 = vmatpush1.bf16.msra.mxu0 %v9212_v20  ;;  %v9220_v20 = vld [vmem:[#allocation2 + $0x3e0] ss:$8 sps:$4 sm:$0xff]  }
 0x584   : > { %3189 = vmatprep.subr.bf16.mxu0 %v9213_v17  ;;  %v9221_v17 = vld [vmem:[#allocation2 + $0x3f4] ss:$8 sps:$4 sm:$0xff]  }
 0x587   : > { %3190 = vmatpush1.bf16.msra.mxu0 %v9214_v52  ;;  %v9222_v52 = vld [vmem:[#allocation2 + $0x3f0] ss:$8 sps:$4 sm:$0xff]  }
 0x588   : > { %3191 = vmatprep.subr.bf16.mxu0 %v9215_v22  ;;  %v9223_v22 = vld [vmem:[#allocation2 + $0x404] ss:$8 sps:$4 sm:$0xff]  }
 0x58b   : > { %3192 = vmatpush1.bf16.msra.mxu0 %v9216_v28  ;;  %v9226_v28 = vld [vmem:[#allocation2 + $0x410] ss:$8 sps:$4 sm:$0xff]  }
 0x58c   : > { %3193 = vmatprep.subr.bf16.mxu0 %v9217_v35  ;;  %v9227_v35 = vld [vmem:[#allocation2 + $0x424] ss:$8 sps:$4 sm:$0xff]  }
 0x58f   : > { %3194 = vmatpush1.bf16.msra.mxu0 %v9218_v33  ;;  %v9229_v33 = vld [vmem:[#allocation2 + $0x434] ss:$8 sps:$4 sm:$0xff]  }
 0x590   : > { %3195 = vmatprep.subr.bf16.mxu0 %v9219_v25  ;;  %v9230_v25 = vld [vmem:[#allocation2 + $0x430] ss:$8 sps:$4 sm:$0xff]  }
 0x593   : > { %3196 = vmatpush1.bf16.msra.mxu0 %v9220_v20  ;;  %v9232_v20 = vld [vmem:[#allocation2 + $0x440] ss:$8 sps:$4 sm:$0xff]  }
 0x594   : > { %3197 = vmatprep.subr.bf16.mxu0 %v9221_v17  ;;  %v9233_v17 = vld [vmem:[#allocation2 + $0x454] ss:$8 sps:$4 sm:$0xff]  }
 0x597   : > { %3198 = vmatpush1.bf16.msra.mxu0 %v9222_v52  ;;  %v8901_v52 = vld [vmem:[%s11143_s9 + $0x8] sm:$0xff]  }
 0x598   : > { %3210 = vmatprep.subr.bf16.mxu0 %v9223_v22  ;;  %v9235_v22 = vld [vmem:[#allocation2 + $0x464] ss:$8 sps:$4 sm:$0xff]   ;;  %8032 = vmatmul.mubr.msk.bf16.gmra.mrb[20].mxu1 %vm3492_vm4, %v8901_v52  ;;  %v9246_v52 = vld [vmem:[#allocation2 + $0x4b0] ss:$8 sps:$4 sm:$0xff]  }
 0x599   : > { %8035 = vmatprep.mubr.msk.bf16.mxu1 %vm9317_vm3, %v9316_v30 }
 0x59a   : > { %3200 = vmatmul.mubr.bf16.vlgmr.msra.gmra.mrb[12].mxu0 %v3163_v23  ;;  %v9234_v23 = vld [vmem:[#allocation2 + $0x450] ss:$8 sps:$4 sm:$0xff]  }
 0x59b   : > { %3211 = vmatpush1.bf16.msra.mxu0 %v9224_v18  ;;  %3242 = vmatprep.mubr.bf16.mxu0 %v9914_v2  ;;  %v9236_v18 = vld [vmem:[#allocation2 + $0x460] ss:$8 sps:$4 sm:$0xff]  }
 0x59c   : > { %3212 = vmatprep.subr.bf16.mxu0 %v9225_v21  ;;  %v9237_v21 = vld [vmem:[#allocation2 + $0x474] ss:$8 sps:$4 sm:$0xff]  }
 0x59f   : > { %3213 = vmatpush1.bf16.msra.mxu0 %v9226_v28  ;;  %v9238_v28 = vld [vmem:[#allocation2 + $0x470] ss:$8 sps:$4 sm:$0xff]  }
 0x5a0   : > { %3214 = vmatprep.subr.bf16.mxu0 %v9227_v35  ;;  %v9239_v35 = vld [vmem:[#allocation2 + $0x484] ss:$8 sps:$4 sm:$0xff]  }
 0x5a3   : > { %3215 = vmatpush1.bf16.msra.mxu0 %v9228_v24  ;;  %v9240_v24 = vld [vmem:[#allocation2 + $0x480] ss:$8 sps:$4 sm:$0xff]  }
 0x5a4   : > { %3216 = vmatprep.subr.bf16.mxu0 %v9229_v33  ;;  %v9241_v33 = vld [vmem:[#allocation2 + $0x494] ss:$8 sps:$4 sm:$0xff]  }
 0x5a7   : > { %3217 = vmatpush1.bf16.msra.mxu0 %v9230_v25  ;;  %v9242_v25 = vld [vmem:[#allocation2 + $0x490] ss:$8 sps:$4 sm:$0xff]  }
 0x5a8   : > { %3218 = vmatprep.subr.bf16.mxu0 %v9231_v51  ;;  %v9243_v51 = vld [vmem:[#allocation2 + $0x4a4] ss:$8 sps:$4 sm:$0xff]  }
 0x5ab   : > { %3219 = vmatpush1.bf16.msra.mxu0 %v9232_v20  ;;  %v9244_v20 = vld [vmem:[#allocation2 + $0x4a0] ss:$8 sps:$4 sm:$0xff]  }
 0x5ac   : > { %3220 = vmatprep.subr.bf16.mxu0 %v9233_v17  ;;  %v9245_v17 = vld [vmem:[#allocation2 + $0x4b4] ss:$8 sps:$4 sm:$0xff]  }
 0x5af   : > { %3221 = vmatpush1.bf16.msra.mxu0 %v9234_v23  ;;  %v9247_v23 = vld [vmem:[#allocation2 + $0x4c4] ss:$8 sps:$4 sm:$0xff]  }
 0x5b0   : > { %3222 = vmatprep.subr.bf16.mxu0 %v9235_v22  ;;  %v9248_v22 = vld [vmem:[#allocation2 + $0x4c0] ss:$8 sps:$4 sm:$0xff]  }
 0x5b3   : > { %3223 = vmatpush1.bf16.msra.mxu0 %v9236_v18  ;;  %v9249_v18 = vld [vmem:[#allocation2 + $0x4d4] ss:$8 sps:$4 sm:$0xff]  }
 0x5b4   : > { %3224 = vmatprep.subr.bf16.mxu0 %v9237_v21  ;;  %v8902_v21 = vld [vmem:[%s11143_s9 + $0x10] sm:$0xff]  }
 0x5b5   : > { %8036 = vmatmul.mubr.msk.bf16.gmra.mrb[24].mxu1 %vm3492_vm4, %v8902_v21  ;;  %v9261_v21 = vld [vmem:[#allocation2 + $0x534] ss:$8 sps:$4 sm:$0xff]  }
 0x5b6   : > { %8039 = vmatprep.mubr.msk.bf16.mxu1 %vm9317_vm3, %v9316_v30 }
 0x5b7   : > { %3225 = vmatpush1.bf16.msra.mxu0 %v9238_v28  ;;  %v9250_v28 = vld [vmem:[#allocation2 + $0x4d0] ss:$8 sps:$4 sm:$0xff]  }
 0x5b8   : > { %3226 = vmatprep.subr.bf16.mxu0 %v9239_v35  ;;  %v9251_v35 = vld [vmem:[#allocation2 + $0x4e4] ss:$8 sps:$4 sm:$0xff]  }
 0x5bb   : > { %3227 = vmatpush1.bf16.msra.mxu0 %v9240_v24  ;;  %v9252_v24 = vld [vmem:[#allocation2 + $0x4e0] ss:$8 sps:$4 sm:$0xff]  }
 0x5bc   : > { %3228 = vmatprep.subr.bf16.mxu0 %v9241_v33  ;;  %v9253_v33 = vld [vmem:[#allocation2 + $0x4f4] ss:$8 sps:$4 sm:$0xff]  }
 0x5bf   : > { %3229 = vmatpush1.bf16.msra.mxu0 %v9242_v25  ;;  %v9254_v25 = vld [vmem:[#allocation2 + $0x4f0] ss:$8 sps:$4 sm:$0xff]  }
 0x5c0   : > { %3230 = vmatprep.subr.bf16.mxu0 %v9243_v51  ;;  %v9255_v51 = vld [vmem:[#allocation2 + $0x504] ss:$8 sps:$4 sm:$0xff]  }
 0x5c3   : > { %3231 = vmatpush1.bf16.msra.mxu0 %v9244_v20  ;;  %v3256_v20 = vrot.slane %v9914_v2, 2 }
 0x5c4   : > { %3232 = vmatprep.subr.bf16.mxu0 %v9245_v17  ;;  %v9256_v17 = vld [vmem:[#allocation2 + $0x500] ss:$8 sps:$4 sm:$0xff]  }
 0x5c7   : > { %3233 = vmatpush1.bf16.msra.mxu0 %v9246_v52  ;;  %v9257_v52 = vld [vmem:[#allocation2 + $0x514] ss:$8 sps:$4 sm:$0xff]  }
 0x5c8   : > { %3234 = vmatprep.subr.bf16.mxu0 %v9247_v23  ;;  %v9258_v23 = vld [vmem:[#allocation2 + $0x510] ss:$8 sps:$4 sm:$0xff]  }
 0x5cb   : > { %3235 = vmatpush1.bf16.msra.mxu0 %v9248_v22  ;;  %v9259_v22 = vld [vmem:[#allocation2 + $0x524] ss:$8 sps:$4 sm:$0xff]  }
 0x5cc   : > { %3236 = vmatprep.subr.bf16.mxu0 %v9249_v18  ;;  %v9260_v18 = vld [vmem:[#allocation2 + $0x520] ss:$8 sps:$4 sm:$0xff]  }
 0x5cf   : > { %3237 = vmatpush1.bf16.msra.mxu0 %v9250_v28  ;;  %v9262_v28 = vld [vmem:[#allocation2 + $0x530] ss:$8 sps:$4 sm:$0xff]  }
 0x5d0   : > { %3238 = vmatprep.subr.bf16.mxu0 %v9251_v35  ;;  %v9263_v35 = vld [vmem:[#allocation2 + $0x544] ss:$8 sps:$4 sm:$0xff]  }
 0x5d3   : > { %3239 = vmatpush1.bf16.msra.mxu0 %v9252_v24  ;;  %v9264_v24 = vld [vmem:[#allocation2 + $0x540] ss:$8 sps:$4 sm:$0xff]  }
 0x5d4   : > { %3240 = vmatprep.subr.bf16.mxu0 %v9253_v33  ;;  %v9265_v33 = vld [vmem:[#allocation2 + $0x554] ss:$8 sps:$4 sm:$0xff]  }
 0x5d7   : > { %3241 = vmatpush1.bf16.msra.mxu0 %v9254_v25  ;;  %v8903_v25 = vld [vmem:[%s11143_s9 + $0x18] sm:$0xff]  }
 0x5d8   : > { %3259 = vmatprep.subr.bf16.mxu0 %v9255_v51  ;;  %v9266_v51 = vld [vmem:[#allocation2 + $0x550] ss:$8 sps:$4 sm:$0xff]   ;;  %8040 = vmatmul.mubr.msk.bf16.gmra.mrb[28].mxu1 %vm3492_vm4, %v8903_v25  ;;  %v11348_v25 = vld [vmem:[#allocation45_spill] sm:$0xff] }
 0x5d9   : > { %8043 = vmatprep.mubr.msk.bf16.mxu1 %vm9317_vm3, %v9316_v30 }
 0x5da   : > { %3243 = vmatmul.mubr.bf16.vlgmr.msra.gmra.mrb[12].mxu0 %v9912_v19 }
 0x5db   : > { %3260 = vmatpush1.bf16.msra.mxu0 %v9256_v17  ;;  %3291 = vmatprep.mubr.bf16.mxu0 %v3256_v20  ;;  %v9267_v20 = vld [vmem:[#allocation2 + $0x564] ss:$8 sps:$4 sm:$0xff]   ;;  %v9268_v17 = vld [vmem:[#allocation2 + $0x560] ss:$8 sps:$4 sm:$0xff]  }
 0x5dc   : > { %3261 = vmatprep.subr.bf16.mxu0 %v9257_v52  ;;  %v9269_v52 = vld [vmem:[#allocation2 + $0x574] ss:$8 sps:$4 sm:$0xff]  }
 0x5df   : > { %3262 = vmatpush1.bf16.msra.mxu0 %v9258_v23  ;;  %v11342_v23 = vld [vmem:[#allocation39_spill] sm:$0xff] }
 0x5e0   : > { %3263 = vmatprep.subr.bf16.mxu0 %v9259_v22  ;;  %v3349_v22 = vrot.slane %v9912_v19, 6 }
 0x5e3   : > { %3264 = vmatpush1.bf16.msra.mxu0 %v9260_v18  ;;  %v11343_v18 = vld [vmem:[#allocation40_spill] sm:$0xff] }
 0x5e4   : > { %3265 = vmatprep.subr.bf16.mxu0 %v9261_v21  ;;  %v3027_v21 = vpack.c.bf16 %v9918_v0, %v9918_v0 }
 0x5e7   : > { %3266 = vmatpush1.bf16.msra.mxu0 %v9262_v28  ;;  %v11344_v28 = vld [vmem:[#allocation41_spill] sm:$0xff] }
 0x5e8   : > { %3267 = vmatprep.subr.bf16.mxu0 %v9263_v35  ;;  %v11345_v35 = vld [vmem:[#allocation42_spill] sm:$0xff] }
 0x5eb   : > { %3268 = vmatpush1.bf16.msra.mxu0 %v9264_v24  ;;  %v11346_v24 = vld [vmem:[#allocation43_spill] sm:$0xff] }
 0x5ec   : > { %3269 = vmatprep.subr.bf16.mxu0 %v9265_v33  ;;  %v11347_v33 = vld [vmem:[#allocation44_spill] sm:$0xff] }
 0x5ef   : > { %3270 = vmatpush1.bf16.msra.mxu0 %v9266_v51 }
 0x5f0   : > { %3271 = vmatprep.subr.bf16.mxu0 %v9267_v20  ;;  %v11349_v20 = vld [vmem:[#allocation46_spill] sm:$0xff] }
 0x5f3   : > { %3272 = vmatpush1.bf16.msra.mxu0 %v9268_v17 }
 0x5f4   : > { %3273 = vmatprep.subr.bf16.mxu0 %v9269_v52 }
 0x5f7   : > { %3274 = vmatpush1.bf16.msra.mxu0 %v9521_v26  ;;  %v8904_v26 = vld [vmem:[%s11143_s9 + $0x20] ss:$0 sps:$4 sm:$0xff]  }
 0x5f8   : > { %3275 = vmatprep.subr.bf16.mxu0 %v9523_v27  ;;  %8044 = vmatmul.mubr.msk.bf16.gmra.mrb[32].mxu1 %vm3492_vm4, %v8904_v26  ;;  %v3255_v27 = vrot.slane %v9912_v19, 2 }
 0x5f9   : > { %8157 = vmatprep.mubr.msk.bf16.mxu1 %vm9317_vm3, %v9316_v30 }
 0x5fb   : > { %3276 = vmatpush1.bf16.msra.mxu0 %v9526_v29  ;;  %v3303_v29 = vrot.slane %v9914_v2, 4 }
 0x5fc   : > { %3277 = vmatprep.subr.bf16.mxu0 %v9529_v31  ;;  %v11309_v31 = vld [vmem:[#allocation6_spill] sm:$0xff] }
 0x5ff   : > { %3278 = vmatpush1.bf16.msra.mxu0 %v9532_v32  ;;  %v11310_v32 = vld [vmem:[#allocation7_spill] sm:$0xff] }
 0x600   : > { %3279 = vmatprep.subr.bf16.mxu0 %v9535_v34  ;;  %v3302_v34 = vrot.slane %v9912_v19, 4  ;;  %v3466_v19 = vld [vmem:[%s11144_s10] sm:$0xff] }
 0x601   : > { %4290 = vperm.xlu1 %8460, %v3466_v19   ;;  %v10241_v19 = vld [vmem:[%s11375_s23 + $0x80] sm:$0xff]  }
 0x603   : > { %3280 = vmatpush1.bf16.msra.mxu0 %v9538_v36  ;;  %v11311_v36 = vld [vmem:[#allocation8_spill] sm:$0xff] }
 0x604   : > { %3281 = vmatprep.subr.bf16.mxu0 %v9541_v37  ;;  %v3350_v37 = vrot.slane %v9914_v2, 6  ;;  %v11341_v2 = vld [vmem:[#allocation38_spill] sm:$0xff] }
 0x607   : > { %3282 = vmatpush1.bf16.msra.mxu0 %v9544_v38  ;;  %v11312_v38 = vld [vmem:[#allocation9_spill] sm:$0xff] }
 0x608   : > { %3283 = vmatprep.subr.bf16.mxu0 %v9547_v39  ;;  %v11313_v39 = vld [vmem:[#allocation10_spill] sm:$0xff] }
 0x60b   : > { %3284 = vmatpush1.bf16.msra.mxu0 %v9550_v40  ;;  %v11314_v40 = vld [vmem:[#allocation11_spill] sm:$0xff] }
 0x60c   : > { %3285 = vmatprep.subr.bf16.mxu0 %v9553_v41  ;;  %v11315_v41 = vld [vmem:[#allocation12_spill] sm:$0xff] }
 0x60f   : > { %3286 = vmatpush1.bf16.msra.mxu0 %v9556_v42 }
 0x610   : > { %3287 = vmatprep.subr.bf16.mxu0 %v9559_v43 }
 0x613   : > { %3288 = vmatpush1.bf16.msra.mxu0 %v9562_v44  ;;  %v11316_v44 = vld [vmem:[#allocation13_spill] sm:$0xff] }
 0x614   : > { %3289 = vmatprep.subr.bf16.mxu0 %v9565_v46 }
 0x617   : > { %3290 = vmatpush1.bf16.msra.mxu0 %v9568_v48  ;;  %v11317_v48 = vld [vmem:[#allocation14_spill] sm:$0xff] }
 0x618   : > { %3306 = vmatprep.subr.bf16.mxu0 %v9571_v49 }
 0x61a   : > { %3292 = vmatmul.mubr.bf16.vlgmr.msra.gmra.mrb[12].mxu0 %v3255_v27  ;;  %v11350_v27 = vld [vmem:[#allocation47_spill] sm:$0xff] }
 0x61b   : > { %3307 = vmatpush1.bf16.msra.mxu0 %v9574_v50  ;;  %3338 = vmatprep.mubr.bf16.mxu0 %v3303_v29  ;;  %v3467_v29 = vld [vmem:[%s11145_s11] sm:$0xff] }
 0x61c   : > { %3308 = vmatprep.subr.bf16.mxu0 %v9578_v45  ;;  %v11318_v45 = vld [vmem:[#allocation15_spill] sm:$0xff]  ;;  %4296 = vperm.xlu1 %8460, %v3467_v29  }
 0x61d   : > { %v10291_v29 = vld [vmem:[%s11375_s23 + $0xb0] sm:$0xff]  }
 0x61f   : > { %3309 = vmatpush1.bf16.msra.mxu0 %v9582_v53  ;;  %v11319_v53 = vld [vmem:[#allocation16_spill] sm:$0xff] }
 0x620   : > { %3310 = vmatprep.subr.bf16.mxu0 %v9585_v54  ;;  %v11320_v54 = vld [vmem:[#allocation17_spill] sm:$0xff] }
 0x623   : > { %3311 = vmatpush1.bf16.msra.mxu0 %v9588_v55  ;;  %v11321_v55 = vld [vmem:[#allocation18_spill] sm:$0xff] }
 0x624   : > { %3312 = vmatprep.subr.bf16.mxu0 %v9591_v56  ;;  %v11322_v56 = vld [vmem:[#allocation19_spill] sm:$0xff] }
 0x627   : > { %3313 = vmatpush1.bf16.msra.mxu0 %v9594_v57  ;;  %v11323_v57 = vld [vmem:[#allocation20_spill] sm:$0xff] }
 0x628   : > { %3314 = vmatprep.subr.bf16.mxu0 %v9597_v58  ;;  %v11324_v58 = vld [vmem:[#allocation21_spill] sm:$0xff] }
 0x62b   : > { %3315 = vmatpush1.bf16.msra.mxu0 %v9600_v59  ;;  %v11325_v59 = vld [vmem:[#allocation22_spill] sm:$0xff] }
 0x62c   : > { %3316 = vmatprep.subr.bf16.mxu0 %v9603_v60  ;;  %v11326_v60 = vld [vmem:[#allocation23_spill] sm:$0xff] }
 0x62f   : > { %3317 = vmatpush1.bf16.msra.mxu0 %v9606_v61  ;;  %v11327_v61 = vld [vmem:[#allocation24_spill] sm:$0xff] }
 0x630   : > { %3318 = vmatprep.subr.bf16.mxu0 %v9609_v62  ;;  %v11328_v62 = vld [vmem:[#allocation25_spill] sm:$0xff] }
 0x633   : > { %3319 = vmatpush1.bf16.msra.mxu0 %v9612_v63  ;;  %v11329_v63 = vld [vmem:[#allocation26_spill] sm:$0xff] }
 0x634   : > { %3320 = vmatprep.subr.bf16.mxu0 %v9615_v1  ;;  %v11330_v1 = vld [vmem:[#allocation27_spill] sm:$0xff] }
 0x637   : > { %3321 = vmatpush1.bf16.msra.mxu0 %v9618_v3  ;;  %v11331_v3 = vld [vmem:[#allocation28_spill] sm:$0xff] }
 0x638   : > { %3322 = vmatprep.subr.bf16.mxu0 %v9621_v4  ;;  %v11332_v4 = vld [vmem:[#allocation29_spill] sm:$0xff] }
 0x63b   : > { %3323 = vmatpush1.bf16.msra.mxu0 %v9624_v5 }
 0x63c   : > { %3324 = vmatprep.subr.bf16.mxu0 %v9627_v6  ;;  %v11333_v6 = vld [vmem:[#allocation30_spill] sm:$0xff] }
 0x63f   : > { %3325 = vmatpush1.bf16.msra.mxu0 %v9630_v7 }
 0x640   : > { %3326 = vmatprep.subr.bf16.mxu0 %v9633_v8 }
 0x643   : > { %3327 = vmatpush1.bf16.msra.mxu0 %v9636_v9 }
 0x644   : > { %3328 = vmatprep.subr.bf16.mxu0 %v9639_v10 }
 0x647   : > { %3329 = vmatpush1.bf16.msra.mxu0 %v9642_v11  ;;  %v11334_v11 = vld [vmem:[#allocation31_spill] sm:$0xff] }
 0x648   : > { %3330 = vmatprep.subr.bf16.mxu0 %v9645_v12  ;;  %v11335_v12 = vld [vmem:[#allocation32_spill] sm:$0xff] }
 0x64b   : > { %3331 = vmatpush1.bf16.msra.mxu0 %v9648_v13  ;;  %v11336_v13 = vld [vmem:[#allocation33_spill] sm:$0xff] }
 0x64c   : > { %3332 = vmatprep.subr.bf16.mxu0 %v9651_v14  ;;  %v11337_v14 = vld [vmem:[#allocation34_spill] sm:$0xff] }
 0x64f   : > { %3333 = vmatpush1.bf16.msra.mxu0 %v9654_v47  ;;  %v11338_v47 = vld [vmem:[#allocation35_spill] sm:$0xff] }
 0x650   : > { %3334 = vmatprep.subr.bf16.mxu0 %v9657_v15  ;;  %v3546_v42 = vpop.f32.mrb[16].mxu1  ;;  %v11339_v15 = vld [vmem:[#allocation36_spill] sm:$0xff] }
 0x651   : > { %v8029_v43 = vpop.f32.mrb[17].mxu1 }
 0x652   : > { %v3549_v46 = vpop.f32.mrb[18].mxu1  ;;  %v11359_v43 = vld [vmem:[#allocation56_spill] sm:$0xff] }
 0x653   : > { %3335 = vmatpush1.bf16.msra.mxu0 %v9660_v16  ;;  %v10028_v49 = vpack.c.bf16 %v3549_v46, %v3546_v42  ;;  %v8030_v50 = vpop.f32.mrb[19].mxu1  ;;  %v11340_v16 = vld [vmem:[#allocation37_spill] sm:$0xff]  ;;  %v11358_v42 = vld [vmem:[#allocation55_spill] sm:$0xff]  ;;  %v11361_v46 = vld [vmem:[#allocation58_spill] sm:$0xff] }
 0x654   : > { %3336 = vmatprep.subr.bf16.mxu0 %v11309_v31  ;;  %v11351_v31 = vld [vmem:[#allocation48_spill] sm:$0xff] }
 0x655   : > { %v11363_v50 = vld [vmem:[#allocation60_spill] sm:$0xff] }
 0x657   : > { %3337 = vmatpush1.bf16.msra.mxu0 %v11310_v32  ;;  %v11352_v32 = vld [vmem:[#allocation49_spill] sm:$0xff] }
 0x658   : > { %3353 = vmatprep.subr.bf16.mxu0 %v11311_v36  ;;  %v11353_v36 = vld [vmem:[#allocation50_spill] sm:$0xff] }
 0x65a   : > { %3339 = vmatmul.mubr.bf16.vlgmr.msra.gmra.mrb[12].mxu0 %v3302_v34  ;;  %v7286_v34 = vld [vmem:[%s11145_s11 + $0x8] sm:$0xff] }
 0x65b   : > { %3354 = vmatpush1.bf16.msra.mxu0 %v11312_v38  ;;  %3385 = vmatprep.mubr.bf16.mxu0 %v3350_v37  ;;  %v11354_v37 = vld [vmem:[#allocation51_spill] sm:$0xff]  ;;  %v7149_v38 = vld [vmem:[%s11142_s8 + $0x4] sm:$0xf] }
 0x65c   : > { %3355 = vmatprep.subr.bf16.mxu0 %v11313_v39  ;;  %4844 = vperm.xlu1 %8460, %v7286_v34   ;;  %v11355_v39 = vld [vmem:[#allocation52_spill] sm:$0xff]  ;;  %v4905_v34 = vld [vmem:[%s11148_s14] sm:$0xf] }
 0x65f   : > { %3356 = vmatpush1.bf16.msra.mxu0 %v11314_v40  ;;  %v11356_v40 = vld [vmem:[#allocation53_spill] sm:$0xff] }
 0x660   : > { %3357 = vmatprep.subr.bf16.mxu0 %v11315_v41  ;;  %3448 = vperm.xlu1 %8460, %v7149_v38   ;;  %v11357_v41 = vld [vmem:[#allocation54_spill] sm:$0xff] }
 0x661   : > { %v10320_v38 = vld [vmem:[%s11375_s23 + $0xc8] sm:$0xff]  }
 0x663   : > { %3358 = vmatpush1.bf16.msra.mxu0 %v11316_v44  ;;  %v11360_v44 = vld [vmem:[#allocation57_spill] sm:$0xff] }
 0x664   : > { %3359 = vmatprep.subr.bf16.mxu0 %v11317_v48  ;;  %v11362_v48 = vld [vmem:[#allocation59_spill] sm:$0xff]  ;;  %4908 = vperm.xlu1 %8460, %v4905_v34  }
 0x665   : > { %v8942_v34 = vld [vmem:[%s11143_s9 + $0x2c] sm:$0xff]  }
 0x667   : > { %3360 = vmatpush1.bf16.msra.mxu0 %v11318_v45  ;;  %v11364_v45 = vld [vmem:[#allocation61_spill] sm:$0xff] }
 0x668   : > { %3361 = vmatprep.subr.bf16.mxu0 %v11319_v53 }
 0x66b   : > { %3362 = vmatpush1.bf16.msra.mxu0 %v11320_v54  ;;  %v3554_v5 = vpop.f32.mrb[20].mxu1  ;;  %v11365_v54 = vld [vmem:[#allocation62_spill] sm:$0xff] }
 0x66c   : > { %3363 = vmatprep.subr.bf16.mxu0 %v11321_v55  ;;  %v8033_v7 = vpop.f32.mrb[21].mxu1 }
 0x66d   : > { %v3557_v8 = vpop.f32.mrb[22].mxu1  ;;  %v11376_v7 = vld [vmem:[#allocation72_spill] sm:$0xff] }
 0x66e   : > { %v10046_v9 = vpack.c.bf16 %v3557_v8, %v3554_v5  ;;  %v8034_v10 = vpop.f32.mrb[23].mxu1  ;;  %v11374_v5 = vld [vmem:[#allocation71_spill] sm:$0xff]  ;;  %v3026_v8 = vpack.c.bf16 %v11376_v7, %v11376_v7 }
 0x66f   : > { %3364 = vmatpush1.bf16.msra.mxu0 %v11322_v56  ;;  %v10120_v10 = vld [vmem:[%s11375_s23 + $0x28] sm:$0xff]  }
 0x670   : > { %3365 = vmatprep.subr.bf16.mxu0 %v11323_v57 }
 0x673   : > { %3366 = vmatpush1.bf16.msra.mxu0 %v11324_v58 }
 0x674   : > { %3367 = vmatprep.subr.bf16.mxu0 %v11325_v59  ;;  %v11366_v59 = vld [vmem:[#allocation63_spill] sm:$0xff] }
 0x677   : > { %3368 = vmatpush1.bf16.msra.mxu0 %v11326_v60  ;;  %v11367_v60 = vld [vmem:[#allocation64_spill] sm:$0xff] }
 0x678   : > { %3369 = vmatprep.subr.bf16.mxu0 %v11327_v61  ;;  %v11368_v61 = vld [vmem:[#allocation65_spill] sm:$0xff] }
 0x67b   : > { %3370 = vmatpush1.bf16.msra.mxu0 %v11328_v62  ;;  %v11369_v62 = vld [vmem:[#allocation66_spill] sm:$0xff] }
 0x67c   : > { %3371 = vmatprep.subr.bf16.mxu0 %v11329_v63  ;;  %v11370_v63 = vld [vmem:[#allocation67_spill] sm:$0xff] }
 0x67f   : > { %3372 = vmatpush1.bf16.msra.mxu0 %v11330_v1  ;;  %v11371_v1 = vld [vmem:[#allocation68_spill] sm:$0xff] }
 0x680   : > { %3373 = vmatprep.subr.bf16.mxu0 %v11331_v3  ;;  %v11372_v3 = vld [vmem:[#allocation69_spill] sm:$0xff] }
 0x683   : > { %3374 = vmatpush1.bf16.msra.mxu0 %v11332_v4  ;;  %v11373_v4 = vld [vmem:[#allocation70_spill] sm:$0xff] }
 0x684   : > { %3375 = vmatprep.subr.bf16.mxu0 %v11333_v6  ;;  %v10111_v6 = vld [vmem:[%s11375_s23 + $0x20] sm:$0xff]  }
 0x687   : > { %3376 = vmatpush1.bf16.msra.mxu0 %v11334_v11  ;;  %v10129_v11 = vld [vmem:[%s11375_s23 + $0x30] sm:$0xff]  }
 0x688   : > { %3377 = vmatprep.subr.bf16.mxu0 %v11335_v12  ;;  %v3562_v51 = vpop.f32.mrb[24].mxu1  ;;  %v10136_v12 = vld [vmem:[%s11375_s23 + $0x38] sm:$0xff]  }
 0x689   : > { %v8037_v0 = vpop.f32.mrb[25].mxu1 }
 0x68a   : > { %v3565_v17 = vpop.f32.mrb[26].mxu1  ;;  %v10250_v0 = vld [vmem:[%s11375_s23 + $0x88] sm:$0xff]  }
 0x68b   : > { %3378 = vmatpush1.bf16.msra.mxu0 %v11336_v13  ;;  %v10070_v52 = vpack.c.bf16 %v3565_v17, %v3562_v51  ;;  %v8038_v26 = vpop.f32.mrb[27].mxu1  ;;  %v10234_v51 = vld [vmem:[%s11375_s23 + $0x78] sm:$0xff]  }
 0x68c   : > { %3379 = vmatprep.subr.bf16.mxu0 %v11337_v14  ;;  %v10266_v17 = vld [vmem:[%s11375_s23 + $0x98] sm:$0xff]   ;;  %v10273_v26 = vld [vmem:[%s11375_s23 + $0xa0] sm:$0xff]  }
 0x68f   : > { %3380 = vmatpush1.bf16.msra.mxu0 %v11338_v47  ;;  %v3607_v47 = vrot.slane %v10028_v49, 4 }
 0x690   : > { %3381 = vmatprep.subr.bf16.mxu0 %v11339_v15 }
 0x693   : > { %3382 = vmatpush1.bf16.msra.mxu0 %v11340_v16  ;;  %v10146_v16 = vld [vmem:[%s11375_s23] sm:$0xff]  }
 0x694   : > { %3383 = vmatprep.subr.bf16.mxu0 %v11341_v2 }
 0x697   : > { %3384 = vmatpush1.bf16.msra.mxu0 %v11342_v23  ;;  %v10154_v23 = vld [vmem:[%s11375_s23 + $0x8] sm:$0xff]  }
 0x698   : > { %3396 = vmatprep.subr.bf16.mxu0 %v11343_v18  ;;  %v10170_v18 = vld [vmem:[%s11375_s23 + $0x18] sm:$0xff]  }
 0x69a   : > { %3386 = vmatmul.mubr.bf16.vlgmr.msra.gmra.mrb[12].mxu0 %v3349_v22  ;;  %v10163_v22 = vld [vmem:[%s11375_s23 + $0x10] sm:$0xff]  }
 0x69b   : > { %3397 = vmatpush1.bf16.msra.mxu0 %v11344_v28  ;;  %3428 = vmatprep.mubr.bf16.mxu0 %v3027_v21  ;;  %v10177_v21 = vld [vmem:[%s11375_s23 + $0x40] sm:$0xff]   ;;  %v10186_v28 = vld [vmem:[%s11375_s23 + $0x48] sm:$0xff]  }
 0x69c   : > { %3398 = vmatprep.subr.bf16.mxu0 %v11345_v35  ;;  %v10195_v35 = vld [vmem:[%s11375_s23 + $0x50] sm:$0xff]  }
 0x69f   : > { %3399 = vmatpush1.bf16.msra.mxu0 %v11346_v24  ;;  %v10209_v24 = vld [vmem:[%s11375_s23 + $0x60] sm:$0xff]  }
 0x6a0   : > { %3400 = vmatprep.subr.bf16.mxu0 %v11347_v33  ;;  %v10218_v33 = vld [vmem:[%s11375_s23 + $0x68] sm:$0xff]  }
 0x6a3   : > { %3401 = vmatpush1.bf16.msra.mxu0 %v11348_v25  ;;  %v10227_v25 = vld [vmem:[%s11375_s23 + $0x70] sm:$0xff]  }
 0x6a4   : > { %3402 = vmatprep.subr.bf16.mxu0 %v11349_v20  ;;  %v3830_v20 = vrot.slane %v10046_v9, 4 }
 0x6a7   : > { %3403 = vmatpush1.bf16.msra.mxu0 %v11350_v27  ;;  %v10282_v27 = vld [vmem:[%s11375_s23 + $0xa8] sm:$0xff]  }
 0x6a8   : > { %3404 = vmatprep.subr.bf16.mxu0 %v11351_v31  ;;  %v10298_v31 = vld [vmem:[%s11375_s23 + $0xb8] sm:$0xff]  }
 0x6ab   : > { %3405 = vmatpush1.bf16.msra.mxu0 %v11352_v32  ;;  %v3570_v53 = vpop.f32.mrb[28].mxu1  ;;  %v10305_v32 = vld [vmem:[%s11375_s23 + $0xc0] sm:$0xff]  }
 0x6ac   : > { %3406 = vmatprep.subr.bf16.mxu0 %v11353_v36  ;;  %v8041_v55 = vpop.f32.mrb[29].mxu1  ;;  %v3986_v36 = vrot.slane %v10070_v52, 4 }
 0x6ad   : > { %v3573_v56 = vpop.f32.mrb[30].mxu1 }
 0x6ae   : > { %v10097_v57 = vpack.c.bf16 %v3573_v56, %v3570_v53  ;;  %v8042_v58 = vpop.f32.mrb[31].mxu1  ;;  %v10410_v56 = vpop.permute.xlu0 %4838 }
 0x6af   : > { %3407 = vmatpush1.bf16.msra.mxu0 %v11354_v37  ;;  %v5021_v37 = vld [vmem:[%s11151_s17] sm:$0xff] }
 0x6b0   : > { %3408 = vmatprep.subr.bf16.mxu0 %v11355_v39  ;;  %6718 = vperm.xlu1 %8460, %v5021_v37   ;;  %v10336_v39 = vld [vmem:[%s11375_s23 + $0xd8] sm:$0xff]  }
 0x6b2   : > { %v10414_v58 = vpop.permute.xlu0 %3441 }
 0x6b3   : > { %3409 = vmatpush1.bf16.msra.mxu0 %v11356_v40  ;;  %v10343_v40 = vld [vmem:[%s11375_s23 + $0xe0] sm:$0xff]  }
 0x6b4   : > { %3410 = vmatprep.subr.bf16.mxu0 %v11357_v41  ;;  %v10352_v41 = vld [vmem:[%s11375_s23 + $0xe8] sm:$0xff]  }
 0x6b7   : > { %3411 = vmatpush1.bf16.msra.mxu0 %v11358_v42  ;;  %v10361_v42 = vld [vmem:[%s11375_s23 + $0xf0] sm:$0xff]  }
 0x6b8   : > { %3412 = vmatprep.subr.bf16.mxu0 %v11359_v43  ;;  %v10368_v43 = vld [vmem:[%s11375_s23 + $0xf8] sm:$0xff]  }
 0x6bb   : > { %3413 = vmatpush1.bf16.msra.mxu0 %v11360_v44  ;;  %v10375_v44 = vld [vmem:[%s11375_s23 + $0x100] sm:$0xff]  }
 0x6bc   : > { %3414 = vmatprep.subr.bf16.mxu0 %v11361_v46  ;;  %v4142_v46 = vrot.slane %v10097_v57, 4 }
 0x6bf   : > { %3415 = vmatpush1.bf16.msra.mxu0 %v11362_v48  ;;  %v10384_v48 = vld [vmem:[%s11375_s23 + $0x108] sm:$0xff]  }
 0x6c0   : > { %3416 = vmatprep.subr.bf16.mxu0 %v11363_v50  ;;  %v10393_v50 = vld [vmem:[%s11375_s23 + $0x110] sm:$0xff]  }
 0x6c3   : > { %3417 = vmatpush1.bf16.msra.mxu0 %v11364_v45  ;;  %v10400_v45 = vld [vmem:[%s11375_s23 + $0x118] sm:$0xff]  }
 0x6c4   : > { %3418 = vmatprep.subr.bf16.mxu0 %v11365_v54  ;;  %v4291_v54 = vpop.permute.xlu1 %4290 }
 0x6c7   : > { %3419 = vmatpush1.bf16.msra.mxu0 %v11366_v59 }
 0x6c8   : > { %3420 = vmatprep.subr.bf16.mxu0 %v11367_v60  ;;  %v4297_v55 = vpop.permute.xlu1 %4296 }
 0x6cb   : > { %3421 = vmatpush1.bf16.msra.mxu0 %v11368_v61  ;;  %v10139_v13 = vpop.f32.mrb[32].mxu1 }
 0x6cc   : > { %3422 = vmatprep.subr.bf16.mxu0 %v11369_v62  ;;  %v8045_v14 = vpop.f32.mrb[33].mxu1  ;;  %v3588_v53 = vpack.c.bf16 %v10139_v13, %v10139_v13 }
 0x6cd   : > { %v3581_v15 = vpop.f32.mrb[34].mxu1 }
 0x6ce   : > { %v8046_v2 = vpop.f32.mrb[35].mxu1 }
 0x6cf   : > { %3423 = vmatpush1.bf16.msra.mxu0 %v11370_v63 }
 0x6d0   : > { %3424 = vmatprep.subr.bf16.mxu0 %v11371_v1 }
 0x6d3   : > { %3425 = vmatpush1.bf16.msra.mxu0 %v11372_v3 }
 0x6d4   : > { %3426 = vmatprep.subr.bf16.mxu0 %v11373_v4 }
 0x6d7   : > { %3427 = vmatpush1.bf16.msra.mxu0 %v11374_v5 }
 0x6d8   : > { %8047 = vmatprep.subr.bf16.mxu0 %v9316_v30 }
 0x6da   : > { %3429 = vmatmul.mubr.bf16.vlgmr.msra.gmra.mrb[12].mxu0 %v3026_v8 }
 0x6db   : > { %8048 = vmatpush3.bf16.msra.mxu0 %v10111_v6  ;;  %8055 = vmatprep.mubr.msk.bf16.mxu0 %vm9317_vm3, %v9316_v30 }
 0x6dc   : > { %8049 = vmatprep.subr.bf16.mxu0 %v9316_v30 }
 0x6df   : > { %8050 = vmatpush3.bf16.msra.mxu0 %v10120_v10 }
 0x6e0   : > { %8051 = vmatprep.subr.bf16.mxu0 %v9316_v30 }
 0x6e3   : > { %8052 = vmatpush3.bf16.msra.mxu0 %v10129_v11 }
 0x6e4   : > { %8053 = vmatprep.subr.bf16.mxu0 %v9316_v30 }
 0x6e7   : > { %8054 = vmatpush3.bf16.msra.mxu0 %v10136_v12 }
 0x6e8   : > { %8059 = vmatprep.subr.bf16.mxu0 %v9316_v30 }
 0x6ea   : > { %8056 = vmatmul.mubr.msk.bf16.vlgmr.msra.gmra.mrb[16].mxu0 %vm3632_vm5, %v3607_v47 }
 0x6eb   : > { %8060 = vmatpush3.bf16.msra.mxu0 %v10146_v16  ;;  %8067 = vmatprep.mubr.msk.bf16.mxu0 %vm9317_vm3, %v9316_v30 }
 0x6ec   : > { %8061 = vmatprep.subr.bf16.mxu0 %v9316_v30 }
 0x6ef   : > { %8062 = vmatpush3.bf16.msra.mxu0 %v10154_v23 }
 0x6f0   : > { %8063 = vmatprep.subr.bf16.mxu0 %v9316_v30 }
 0x6f3   : > { %8064 = vmatpush3.bf16.msra.mxu0 %v10163_v22 }
 0x6f4   : > { %8065 = vmatprep.subr.bf16.mxu0 %v9316_v30 }
 0x6f7   : > { %8066 = vmatpush3.bf16.msra.mxu0 %v10170_v18 }
 0x6f8   : > { %8071 = vmatprep.subr.bf16.mxu0 %v9316_v30 }
 0x6fa   : > { %8068 = vmatmul.mubr.msk.bf16.vlgmr.msra.gmra.mrb[16].mxu0 %vm3632_vm5, %v10028_v49  ;;  %v10202_v49 = vld [vmem:[%s11375_s23 + $0x58] sm:$0xff]  }
 0x6fb   : > { %8072 = vmatpush3.bf16.msra.mxu0 %v10177_v21  ;;  %8079 = vmatprep.mubr.msk.bf16.mxu0 %vm9317_vm3, %v9316_v30 }
 0x6fc   : > { %8073 = vmatprep.subr.bf16.mxu0 %v9316_v30 }
 0x6ff   : > { %8074 = vmatpush3.bf16.msra.mxu0 %v10186_v28 }
 0x700   : > { %8075 = vmatprep.subr.bf16.mxu0 %v9316_v30 }
 0x703   : > { %8076 = vmatpush3.bf16.msra.mxu0 %v10195_v35 }
 0x704   : > { %8077 = vmatprep.subr.bf16.mxu0 %v9316_v30 }
 0x707   : > { %8078 = vmatpush3.bf16.msra.mxu0 %v10202_v49 }
 0x708   : > { %8083 = vmatprep.subr.bf16.mxu0 %v9316_v30 }
 0x70a   : > { %8080 = vmatmul.mubr.msk.bf16.vlgmr.msra.gmra.mrb[16].mxu0 %vm3632_vm5, %v10046_v9  ;;  %v10259_v9 = vld [vmem:[%s11375_s23 + $0x90] sm:$0xff]  }
 0x70b   : > { %8084 = vmatpush3.bf16.msra.mxu0 %v10209_v24  ;;  %8091 = vmatprep.mubr.msk.bf16.mxu0 %vm9317_vm3, %v9316_v30 }
 0x70c   : > { %8085 = vmatprep.subr.bf16.mxu0 %v9316_v30 }
 0x70f   : > { %8086 = vmatpush3.bf16.msra.mxu0 %v10218_v33 }
 0x710   : > { %8087 = vmatprep.subr.bf16.mxu0 %v9316_v30 }
 0x713   : > { %8088 = vmatpush3.bf16.msra.mxu0 %v10227_v25 }
 0x714   : > { %8089 = vmatprep.subr.bf16.mxu0 %v9316_v30 }
 0x717   : > { %8090 = vmatpush3.bf16.msra.mxu0 %v10234_v51 }
 0x718   : > { %8095 = vmatprep.subr.bf16.mxu0 %v9316_v30 }
 0x71a   : > { %8092 = vmatmul.mubr.msk.bf16.vlgmr.msra.gmra.mrb[16].mxu0 %vm3632_vm5, %v3830_v20  ;;  %v8941_v20 = vld [vmem:[%s11143_s9 + $0x24] sm:$0xff]  }
 0x71b   : > { %8096 = vmatpush3.bf16.msra.mxu0 %v10241_v19  ;;  %8103 = vmatprep.mubr.msk.bf16.mxu0 %vm9317_vm3, %v9316_v30 }
 0x71c   : > { %8097 = vmatprep.subr.bf16.mxu0 %v9316_v30 }
 0x71f   : > { %8098 = vmatpush3.bf16.msra.mxu0 %v10250_v0 }
 0x720   : > { %8099 = vmatprep.subr.bf16.mxu0 %v9316_v30 }
 0x723   : > { %8100 = vmatpush3.bf16.msra.mxu0 %v10259_v9 }
 0x724   : > { %8101 = vmatprep.subr.bf16.mxu0 %v9316_v30 }
 0x727   : > { %8102 = vmatpush3.bf16.msra.mxu0 %v10266_v17 }
 0x728   : > { %8107 = vmatprep.subr.bf16.mxu0 %v9316_v30 }
 0x72a   : > { %8104 = vmatmul.mubr.msk.bf16.vlgmr.msra.gmra.mrb[16].mxu0 %vm3632_vm5, %v10070_v52  ;;  %v10329_v52 = vld [vmem:[%s11375_s23 + $0xd0] sm:$0xff]  }
 0x72b   : > { %8108 = vmatpush3.bf16.msra.mxu0 %v10273_v26  ;;  %8115 = vmatprep.mubr.msk.bf16.mxu0 %vm9317_vm3, %v9316_v30 }
 0x72c   : > { %8109 = vmatprep.subr.bf16.mxu0 %v9316_v30 }
 0x72f   : > { %8110 = vmatpush3.bf16.msra.mxu0 %v10282_v27 }
 0x730   : > { %8111 = vmatprep.subr.bf16.mxu0 %v9316_v30 }
 0x733   : > { %8112 = vmatpush3.bf16.msra.mxu0 %v10291_v29 }
 0x734   : > { %8113 = vmatprep.subr.bf16.mxu0 %v9316_v30 }
 0x737   : > { %8114 = vmatpush3.bf16.msra.mxu0 %v10298_v31 }
 0x738   : > { %8119 = vmatprep.subr.bf16.mxu0 %v9316_v30 }
 0x73a   : > { %8116 = vmatmul.mubr.msk.bf16.vlgmr.msra.gmra.mrb[16].mxu0 %vm3632_vm5, %v3986_v36 }
 0x73b   : > { %8120 = vmatpush3.bf16.msra.mxu0 %v10305_v32  ;;  %8127 = vmatprep.mubr.msk.bf16.mxu0 %vm9317_vm3, %v9316_v30 }
 0x73c   : > { %8121 = vmatprep.subr.bf16.mxu0 %v9316_v30 }
 0x73f   : > { %8122 = vmatpush3.bf16.msra.mxu0 %v10320_v38 }
 0x740   : > { %8123 = vmatprep.subr.bf16.mxu0 %v9316_v30 }
 0x743   : > { %8124 = vmatpush3.bf16.msra.mxu0 %v10329_v52 }
 0x744   : > { %8125 = vmatprep.subr.bf16.mxu0 %v9316_v30 }
 0x747   : > { %8126 = vmatpush3.bf16.msra.mxu0 %v10336_v39 }
 0x748   : > { %8131 = vmatprep.subr.bf16.mxu0 %v9316_v30 }
 0x74a   : > { %8128 = vmatmul.mubr.msk.bf16.vlgmr.msra.gmra.mrb[16].mxu0 %vm3632_vm5, %v10097_v57  ;;  %v10412_v57 = vpop.permute.xlu1 %4844 }
 0x74b   : > { %8132 = vmatpush3.bf16.msra.mxu0 %v10343_v40  ;;  %8139 = vmatprep.mubr.msk.bf16.mxu0 %vm9317_vm3, %v9316_v30 }
 0x74c   : > { %8133 = vmatprep.subr.bf16.mxu0 %v9316_v30 }
 0x74e   : > { %v10416_v60 = vpop.permute.xlu1 %3448 }
 0x74f   : > { %8134 = vmatpush3.bf16.msra.mxu0 %v10352_v41 }
 0x750   : > { %8135 = vmatprep.subr.bf16.mxu0 %v9316_v30 }
 0x753   : > { %8136 = vmatpush3.bf16.msra.mxu0 %v10361_v42 }
 0x754   : > { %8137 = vmatprep.subr.bf16.mxu0 %v9316_v30 }
 0x757   : > { %8138 = vmatpush3.bf16.msra.mxu0 %v10368_v43 }
 0x758   : > { %8143 = vmatprep.subr.bf16.mxu0 %v9316_v30 }
 0x75a   : > { %8140 = vmatmul.mubr.msk.bf16.vlgmr.msra.gmra.mrb[16].mxu0 %vm3632_vm5, %v4142_v46 }
 0x75b   : > { %8144 = vmatpush3.bf16.msra.mxu0 %v10375_v44  ;;  %8151 = vmatprep.mubr.msk.bf16.mxu0 %vm9317_vm3, %v9316_v30 }
 0x75c   : > { %8145 = vmatprep.subr.bf16.mxu0 %v9316_v30 }
 0x75f   : > { %8146 = vmatpush3.bf16.msra.mxu0 %v10384_v48 }
 0x760   : > { %8147 = vmatprep.subr.bf16.mxu0 %v9316_v30 }
 0x763   : > { %8148 = vmatpush3.bf16.msra.mxu0 %v10393_v50 }
 0x764   : > { %8149 = vmatprep.subr.bf16.mxu0 %v9316_v30 }
 0x767   : > { %8150 = vmatpush3.bf16.msra.mxu0 %v10400_v45 }
 0x768   : > { %8285 = vmatprep.subr.bf16.mxu0 %v9316_v30 }
 0x76a   : > { %8152 = vmatmul.mubr.msk.bf16.vlgmr.msra.gmra.mrb[16].mxu0 %vm3632_vm5, %v3588_v53 }
 0x76b   : > { %8287 = vmatprep.mubr.msk.bf16.mxu0 %vm9317_vm3, %v9316_v30 }
 0x7ad   : > { %v3430_v59 = vpop.f32.mrb[12].mxu0 }
 0x7ae   : > { %v3444_v61 = vmul.f32 %v10414_v58, %v3430_v59  ;;  %v10419_v62 = vpop.f32.mrb[13].mxu0 }
 0x7af   : > { %v3434_v63 = vpop.f32.mrb[14].mxu0 }
 0x7b0   : > { %v10422_v1 = vadd.f32 %v10416_v60, %v3444_v61  ;;  %v3435_v3 = vpop.f32.mrb[15].mxu0 }
 0x83d   : > { %v4281_v4 = vpop.f32.mrb[16].mxu0 }
 0x83e   : > { %v4293_v5 = vmul.f32 %v4291_v54, %v4281_v4  ;;  %v8153_v7 = vpop.f32.mrb[17].mxu0 }
 0x83f   : > { %v4284_v8 = vpop.f32.mrb[18].mxu0 }
 0x840   : > { %v4299_v13 = vadd.f32 %v4297_v55, %v4293_v5  ;;  %v8154_v14 = vpop.f32.mrb[19].mxu0 }
 0x842   : > { %v4300_v47 = vmax.f32 %v4299_v13, 0.0 }
 0x844   : > { %v4315_v15 = vpack.c.bf16 %v4300_v47, %v4300_v47 }
 0x846   : > { %v4355_v2 = vsel %vm3508_vm2, %v4315_v15, 0 }
 0x847   : > { %8156 = vmatpush3.bf16.msra.mxu1 %v4355_v2 }
 0x848   : > { %8177 = vmatprep.subr.bf16.mxu1 %v9316_v30 }
 0x84a   : > { %8158 = vmatmul.mubr.msk.bf16.vlgmr.msra.gmra.mrb[36].mxu1 %vm3492_vm4, %v8941_v20 }
 0x84b   : > { %8161 = vmatprep.mubr.msk.bf16.mxu1 %vm9317_vm3, %v9316_v30  ;;  %8178 = vmatpush3.bf16.msra.mxu1 %v10111_v6  ;;  %v8943_v6 = vld [vmem:[%s11143_s9 + $0x34] sm:$0xff]  }
 0x84c   : > { %8179 = vmatprep.subr.bf16.mxu1 %v9316_v30 }
 0x84f   : > { %8180 = vmatpush3.bf16.msra.mxu1 %v10120_v10  ;;  %v8944_v10 = vld [vmem:[%s11143_s9 + $0x3c] sm:$0xff]  }
 0x850   : > { %8181 = vmatprep.subr.bf16.mxu1 %v9316_v30 }
 0x852   : > { %8162 = vmatmul.mubr.msk.bf16.gmra.mrb[40].mxu1 %vm3492_vm4, %v8942_v34 }
 0x853   : > { %8165 = vmatprep.mubr.msk.bf16.mxu1 %vm9317_vm3, %v9316_v30  ;;  %8182 = vmatpush3.bf16.msra.mxu1 %v10129_v11  ;;  %v8945_v11 = vld [vmem:[%s11143_s9 + $0x44] ss:$0 sps:$4 sm:$0xff]  }
 0x854   : > { %8183 = vmatprep.subr.bf16.mxu1 %v9316_v30 }
 0x857   : > { %8184 = vmatpush3.bf16.msra.mxu1 %v10136_v12 }
 0x858   : > { %8189 = vmatprep.subr.bf16.mxu1 %v9316_v30 }
 0x85a   : > { %8166 = vmatmul.mubr.msk.bf16.gmra.mrb[44].mxu1 %vm3492_vm4, %v8943_v6  ;;  %v4920_v6 = vld [vmem:[%s11139_s5 + $0x40] sm:$0xff] }
 0x85b   : > { %8169 = vmatprep.mubr.msk.bf16.mxu1 %vm9317_vm3, %v9316_v30 }
 0x862   : > { %8170 = vmatmul.mubr.msk.bf16.gmra.mrb[48].mxu1 %vm3492_vm4, %v8944_v10  ;;  %v4922_v10 = vld [vmem:[%s11139_s5 + $0x50] sm:$0xff] }
 0x863   : > { %8173 = vmatprep.mubr.msk.bf16.mxu1 %vm9317_vm3, %v9316_v30 }
 0x86a   : > { %8174 = vmatmul.mubr.msk.bf16.gmra.mrb[52].mxu1 %vm3492_vm4, %v8945_v11  ;;  %v4927_v11 = vld [vmem:[%s11139_s5 + $0x78] sm:$0xff] }
 0x86b   : > { %8185 = vmatprep.mubr.msk.bf16.mxu1 %vm9317_vm3, %v9316_v30 }
 0x91d   : > { %v4391_v12 = vpop.f32.mrb[36].mxu1 }
 0x91e   : > { %v8159_v36 = vpop.f32.mrb[37].mxu1 }
 0x91f   : > { %v4394_v37 = vpop.f32.mrb[38].mxu1  ;;  %v8301_v36 = vpack.c.bf16 %v4922_v10, %v4920_v6  ;;  %v8980_v6 = vld [vmem:[%s11138_s4 + $0xb8] sm:$0xff]   ;;  %v8985_v10 = vld [vmem:[%s11138_s4 + $0x1c0] sm:$0xff]  }
 0x920   : > { %v4429_v46 = vpack.c.bf16 %v4394_v37, %v4391_v12  ;;  %v8160_v53 = vpop.f32.mrb[39].mxu1  ;;  %v11377_v12 = vld [vmem:[#allocation5_spill] sm:$0xff] }
 0x921   : > { %v4926_v53 = vld [vmem:[%s11139_s5 + $0x70] sm:$0xff] }
 0x922   : > { %v4435_v54 = vrot.slane %v4429_v46, 4 }
 0x924   : > { %8186 = vmatmul.mubr.msk.bf16.vlgmr.msra.gmra.mrb[56].mxu1 %vm3632_vm5, %v4435_v54 }
 0x925   : > { %8190 = vmatpush3.bf16.msra.mxu1 %v10146_v16  ;;  %8197 = vmatprep.mubr.msk.bf16.mxu1 %vm9317_vm3, %v9316_v30  ;;  %v4399_v55 = vpop.f32.mrb[40].mxu1 }
 0x926   : > { %8191 = vmatprep.subr.bf16.mxu1 %v9316_v30  ;;  %v8163_v59 = vpop.f32.mrb[41].mxu1 }
 0x927   : > { %v4402_v61 = vpop.f32.mrb[42].mxu1 }
 0x928   : > { %v4430_v63 = vpack.c.bf16 %v4402_v61, %v4399_v55  ;;  %v8164_v3 = vpop.f32.mrb[43].mxu1  ;;  %v8953_v61 = vld [vmem:[%s11138_s4 + $0x40] sm:$0xff]  }
 0x929   : > { %8192 = vmatpush3.bf16.msra.mxu1 %v10154_v23  ;;  %v8957_v3 = vld [vmem:[%s11138_s4 + $0x48] sm:$0xff]  }
 0x92a   : > { %8193 = vmatprep.subr.bf16.mxu1 %v9316_v30 }
 0x92d   : > { %8194 = vmatpush3.bf16.msra.mxu1 %v10163_v22  ;;  %v4407_v4 = vpop.f32.mrb[44].mxu1 }
 0x92e   : > { %8195 = vmatprep.subr.bf16.mxu1 %v9316_v30  ;;  %v8167_v16 = vpop.f32.mrb[45].mxu1 }
 0x92f   : > { %v4410_v5 = vpop.f32.mrb[46].mxu1  ;;  %v8961_v16 = vld [vmem:[%s11138_s4 + $0x50] sm:$0xff]  }
 0x930   : > { %v4431_v7 = vpack.c.bf16 %v4410_v5, %v4407_v4  ;;  %v8168_v8 = vpop.f32.mrb[47].mxu1  ;;  %v8958_v4 = vld [vmem:[%s11138_s4 + $0x8] sm:$0xff]   ;;  %v8962_v5 = vld [vmem:[%s11138_s4 + $0x10] sm:$0xff]  }
 0x931   : > { %8196 = vmatpush3.bf16.msra.mxu1 %v10170_v18  ;;  %v8966_v8 = vld [vmem:[%s11138_s4 + $0x18] sm:$0xff]  }
 0x932   : > { %8201 = vmatprep.subr.bf16.mxu1 %v9316_v30 }
 0x934   : > { %8198 = vmatmul.mubr.msk.bf16.vlgmr.msra.gmra.mrb[56].mxu1 %vm3632_vm5, %v4429_v46  ;;  %v4924_v46 = vld [vmem:[%s11139_s5 + $0x60] sm:$0xff] }
 0x935   : > { %8202 = vmatpush3.bf16.msra.mxu1 %v10177_v21  ;;  %8209 = vmatprep.mubr.msk.bf16.mxu1 %vm9317_vm3, %v9316_v30  ;;  %v4415_v23 = vpop.f32.mrb[48].mxu1  ;;  %v8305_v55 = vpack.c.bf16 %v4926_v53, %v4924_v46 }
 0x936   : > { %8203 = vmatprep.subr.bf16.mxu1 %v9316_v30  ;;  %v8171_v22 = vpop.f32.mrb[49].mxu1 }
 0x937   : > { %v4418_v13 = vpop.f32.mrb[50].mxu1  ;;  %v8970_v22 = vld [vmem:[%s11138_s4 + $0x20] sm:$0xff]  }
 0x938   : > { %v10480_v14 = vpack.c.bf16 %v4418_v13, %v4415_v23  ;;  %v8172_v47 = vpop.f32.mrb[51].mxu1  ;;  %v8969_v23 = vld [vmem:[%s11138_s4 + $0x60] sm:$0xff]  }
 0x939   : > { %8204 = vmatpush3.bf16.msra.mxu1 %v10186_v28  ;;  %v4567_v28 = vrot.slane %v4430_v63, 4  ;;  %v9271_v13 = vld [vmem:[%s9475_s26] sm:$0xff] }
 0x93a   : > { %8205 = vmatprep.subr.bf16.mxu1 %v9316_v30 }
 0x93d   : > { %8206 = vmatpush3.bf16.msra.mxu1 %v10195_v35  ;;  %v10485_v18 = vpop.f32.mrb[52].mxu1  ;;  %v4657_v35 = vrot.slane %v4431_v7, 4 }
 0x93e   : > { %8207 = vmatprep.subr.bf16.mxu1 %v9316_v30  ;;  %v8175_v21 = vpop.f32.mrb[53].mxu1 }
 0x93f   : > { %v4426_v15 = vpop.f32.mrb[54].mxu1 }
 0x940   : > { %v8176_v2 = vpop.f32.mrb[55].mxu1 }
 0x941   : > { %8208 = vmatpush3.bf16.msra.mxu1 %v10202_v49  ;;  %v4747_v49 = vrot.slane %v10480_v14, 4 }
 0x942   : > { %8213 = vmatprep.subr.bf16.mxu1 %v9316_v30 }
 0x944   : > { %8210 = vmatmul.mubr.msk.bf16.vlgmr.msra.gmra.mrb[56].mxu1 %vm3632_vm5, %v4430_v63  ;;  %v8954_v63 = vld [vmem:[%s11138_s4] sm:$0xff]  }
 0x945   : > { %8214 = vmatpush3.bf16.msra.mxu1 %v10209_v24  ;;  %8221 = vmatprep.mubr.msk.bf16.mxu1 %vm9317_vm3, %v9316_v30  ;;  %v4433_v24 = vpack.c.bf16 %v10485_v18, %v10485_v18  ;;  %v4902_v18 = vpop.permute.xlu0 %4901 }
 0x946   : > { %8215 = vmatprep.subr.bf16.mxu1 %v9316_v30 }
 0x949   : > { %8216 = vmatpush3.bf16.msra.mxu1 %v10218_v33 }
 0x94a   : > { %8217 = vmatprep.subr.bf16.mxu1 %v9316_v30 }
 0x94d   : > { %8218 = vmatpush3.bf16.msra.mxu1 %v10227_v25 }
 0x94e   : > { %8219 = vmatprep.subr.bf16.mxu1 %v9316_v30 }
 0x951   : > { %8220 = vmatpush3.bf16.msra.mxu1 %v10234_v51 }
 0x952   : > { %8225 = vmatprep.subr.bf16.mxu1 %v9316_v30 }
 0x954   : > { %8222 = vmatmul.mubr.msk.bf16.vlgmr.msra.gmra.mrb[56].mxu1 %vm3632_vm5, %v4567_v28 }
 0x955   : > { %8226 = vmatpush3.bf16.msra.mxu1 %v10241_v19  ;;  %8233 = vmatprep.mubr.msk.bf16.mxu1 %vm9317_vm3, %v9316_v30 }
 0x956   : > { %8227 = vmatprep.subr.bf16.mxu1 %v9316_v30 }
 0x959   : > { %8228 = vmatpush3.bf16.msra.mxu1 %v10250_v0 }
 0x95a   : > { %8229 = vmatprep.subr.bf16.mxu1 %v9316_v30 }
 0x95d   : > { %8230 = vmatpush3.bf16.msra.mxu1 %v10259_v9 }
 0x95e   : > { %8231 = vmatprep.subr.bf16.mxu1 %v9316_v30 }
 0x961   : > { %8232 = vmatpush3.bf16.msra.mxu1 %v10266_v17  ;;  %v9270_v17 = vld [vmem:[%s9926_s2] sm:$0xff] }
 0x962   : > { %8237 = vmatprep.subr.bf16.mxu1 %v9316_v30 }
 0x964   : > { %8234 = vmatmul.mubr.msk.bf16.vlgmr.msra.gmra.mrb[56].mxu1 %vm3632_vm5, %v4431_v7  ;;  %v8965_v7 = vld [vmem:[%s11138_s4 + $0x58] sm:$0xff]  }
 0x965   : > { %8238 = vmatpush3.bf16.msra.mxu1 %v10273_v26  ;;  %8245 = vmatprep.mubr.msk.bf16.mxu1 %vm9317_vm3, %v9316_v30 }
 0x966   : > { %8239 = vmatprep.subr.bf16.mxu1 %v9316_v30 }
 0x969   : > { %8240 = vmatpush3.bf16.msra.mxu1 %v10282_v27  ;;  %v4913_v27 = vld [vmem:[%s11139_s5 + $0x8] sm:$0xff] }
 0x96a   : > { %8241 = vmatprep.subr.bf16.mxu1 %v9316_v30 }
 0x96d   : > { %8242 = vmatpush3.bf16.msra.mxu1 %v10291_v29  ;;  %v4915_v29 = vld [vmem:[%s11139_s5 + $0x18] sm:$0xff] }
 0x96e   : > { %8243 = vmatprep.subr.bf16.mxu1 %v9316_v30 }
 0x971   : > { %8244 = vmatpush3.bf16.msra.mxu1 %v10298_v31 }
 0x972   : > { %8249 = vmatprep.subr.bf16.mxu1 %v9316_v30 }
 0x974   : > { %8246 = vmatmul.mubr.msk.bf16.vlgmr.msra.gmra.mrb[56].mxu1 %vm3632_vm5, %v4657_v35  ;;  %v4909_v35 = vpop.permute.xlu1 %4908 }
 0x975   : > { %8250 = vmatpush3.bf16.msra.mxu1 %v10305_v32  ;;  %8257 = vmatprep.mubr.msk.bf16.mxu1 %vm9317_vm3, %v9316_v30 }
 0x976   : > { %8251 = vmatprep.subr.bf16.mxu1 %v9316_v30 }
 0x979   : > { %8252 = vmatpush3.bf16.msra.mxu1 %v10320_v38  ;;  %v8291_v38 = vpack.c.bf16 %v4915_v29, %v4913_v27  ;;  %v8947_v27 = vld [vmem:[%s11149_s15 + $0x8] sm:$0xff]   ;;  %v8960_v29 = vld [vmem:[%s11138_s4 + $0x90] sm:$0xff]  }
 0x97a   : > { %8253 = vmatprep.subr.bf16.mxu1 %v9316_v30 }
 0x97d   : > { %8254 = vmatpush3.bf16.msra.mxu1 %v10329_v52  ;;  %v4912_v52 = vld [vmem:[%s11139_s5] sm:$0xff] }
 0x97e   : > { %8255 = vmatprep.subr.bf16.mxu1 %v9316_v30 }
 0x981   : > { %8256 = vmatpush3.bf16.msra.mxu1 %v10336_v39  ;;  %v4914_v39 = vld [vmem:[%s11139_s5 + $0x10] sm:$0xff] }
 0x982   : > { %8261 = vmatprep.subr.bf16.mxu1 %v9316_v30 }
 0x984   : > { %8258 = vmatmul.mubr.msk.bf16.vlgmr.msra.gmra.mrb[56].mxu1 %vm3632_vm5, %v10480_v14  ;;  %v3453_v14 = vadd.f32 %v9271_v13, %v10422_v1 }
 0x985   : > { %8262 = vmatpush3.bf16.msra.mxu1 %v10343_v40  ;;  %8269 = vmatprep.mubr.msk.bf16.mxu1 %vm9317_vm3, %v9316_v30  ;;  %v4917_v40 = vld [vmem:[%s11139_s5 + $0x28] sm:$0xff] }
 0x986   : > { %8263 = vmatprep.subr.bf16.mxu1 %v9316_v30  ;;  %v10662_v47 = vmax.f32 %v3453_v14, 0.0  ;;  %v8993_v14 = vld [vmem:[%s11138_s4 + $0x1d0] sm:$0xff]  }
 0x988   : > { %v5022_v2 = vpack.c.bf16 %v10662_v47, %v10662_v47 }
 0x989   : > { %8264 = vmatpush3.bf16.msra.mxu1 %v10352_v41  ;;  %v4919_v41 = vld [vmem:[%s11139_s5 + $0x38] sm:$0xff] }
 0x98a   : > { %8265 = vmatprep.subr.bf16.mxu1 %v9316_v30  ;;  %v5063_v1 = vsel %vm684_vm0, %v5022_v2, 0 }
 0x98d   : > { %8266 = vmatpush3.bf16.msra.mxu1 %v10361_v42  ;;  %v3445_v42 = vmul.f32 %v10414_v58, %v10419_v62  ;;  %v4923_v58 = vld [vmem:[%s11139_s5 + $0x58] sm:$0xff] }
 0x98e   : > { %8267 = vmatprep.subr.bf16.mxu1 %v9316_v30 }
 0x98f   : > { %v3452_v62 = vadd.f32 %v10416_v60, %v3445_v42  ;;  %v4925_v60 = vld [vmem:[%s11139_s5 + $0x68] sm:$0xff]  ;;  %v8950_v42 = vld [vmem:[%s11149_s15 + $0x20] ss:$0 sps:$4 sm:$0xff]  }
 0x990   : > { %v8303_v37 = vpack.c.bf16 %v4927_v11, %v4925_v60  ;;  %v8983_v60 = vld [vmem:[%s11138_s4 + $0x140] sm:$0xff]  }
 0x991   : > { %8268 = vmatpush3.bf16.msra.mxu1 %v10368_v43 }
 0x992   : > { %8273 = vmatprep.subr.bf16.mxu1 %v9316_v30 }
 0x994   : > { %8270 = vmatmul.mubr.msk.bf16.vlgmr.msra.gmra.mrb[56].mxu1 %vm3632_vm5, %v4747_v49 }
 0x995   : > { %8274 = vmatpush3.bf16.msra.mxu1 %v10375_v44  ;;  %8281 = vmatprep.mubr.msk.bf16.mxu1 %vm9317_vm3, %v9316_v30  ;;  %v4850_v44 = vld [vmem:[%s11146_s12] sm:$0x3] }
 0x996   : > { %8275 = vmatprep.subr.bf16.mxu1 %v9316_v30 }
 0x999   : > { %8276 = vmatpush3.bf16.msra.mxu1 %v10384_v48  ;;  %v8293_v48 = vpack.c.bf16 %v4914_v39, %v4912_v52  ;;  %v8967_v52 = vld [vmem:[%s11138_s4 + $0xe0] sm:$0xff]   ;;  %v8948_v39 = vld [vmem:[%s11149_s15 + $0x10] sm:$0xff]  }
 0x99a   : > { %8277 = vmatprep.subr.bf16.mxu1 %v9316_v30 }
 0x99d   : > { %8278 = vmatpush3.bf16.msra.mxu1 %v10393_v50  ;;  %v8295_v50 = vpack.c.bf16 %v4919_v41, %v4917_v40  ;;  %v8968_v40 = vld [vmem:[%s11138_s4 + $0xa0] sm:$0xff]   ;;  %v8949_v41 = vld [vmem:[%s11149_s15 + $0x18] sm:$0xff]  }
 0x99e   : > { %8279 = vmatprep.subr.bf16.mxu1 %v9316_v30 }
 0x9a1   : > { %8280 = vmatpush3.bf16.msra.mxu1 %v10400_v45  ;;  %v4916_v45 = vld [vmem:[%s11139_s5 + $0x20] sm:$0xff] }
 0x9a2   : > { %7849 = vmatprep.subr.bf16.mxu1 %v8953_v61 }
 0x9a4   : > { %8282 = vmatmul.mubr.msk.bf16.vlgmr.msra.gmra.mrb[56].mxu1 %vm3632_vm5, %v4433_v24 }
 0x9a5   : > { %7850 = vmatpush3.bf16.msra.mxu1 %v8954_v63 }
 0x9a6   : > { %7851 = vmatprep.subr.bf16.mxu1 %v8957_v3 }
 0x9a9   : > { %7852 = vmatpush3.bf16.msra.mxu1 %v8958_v4 }
 0x9aa   : > { %7853 = vmatprep.subr.bf16.mxu1 %v8961_v16  ;;  %v8986_v16 = vld [vmem:[%s11138_s4 + $0x180] sm:$0xff]  }
 0x9ad   : > { %7854 = vmatpush3.bf16.msra.mxu1 %v8962_v5 }
 0x9ae   : > { %7855 = vmatprep.subr.bf16.mxu1 %v8965_v7  ;;  %v8984_v7 = vld [vmem:[%s11138_s4 + $0x100] sm:$0xff]  }
 0x9b1   : > { %7856 = vmatpush3.bf16.msra.mxu1 %v8966_v8 }
 0x9b2   : > { %7857 = vmatprep.subr.bf16.mxu1 %v8969_v23  ;;  %v8987_v23 = vld [vmem:[%s11138_s4 + $0x148] sm:$0xff]  }
 0x9b5   : > { %7858 = vmatpush3.bf16.msra.mxu1 %v8970_v22  ;;  %v8990_v22 = vld [vmem:[%s11138_s4 + $0x188] sm:$0xff]  }
 0xa77   : > { %v4829_v33 = vpop.f32.mrb[56].mxu1 }
 0xa78   : > { %v4841_v25 = vmul.f32 %v10410_v56, %v4829_v33  ;;  %v8283_v51 = vpop.f32.mrb[57].mxu1  ;;  %v4918_v56 = vld [vmem:[%s11139_s5 + $0x30] sm:$0xff] }
 0xa79   : > { %v4832_v19 = vpop.f32.mrb[58].mxu1  ;;  %v8297_v20 = vpack.c.bf16 %v4918_v56, %v4916_v45  ;;  %v8946_v51 = vld [vmem:[%s11149_s15] sm:$0xff]   ;;  %v8977_v45 = vld [vmem:[%s11138_s4 + $0x70] sm:$0xff]  }
 0xa7a   : > { %v4847_v0 = vadd.f32 %v10412_v57, %v4841_v25  ;;  %v8284_v9 = vpop.f32.mrb[59].mxu1  ;;  %v4921_v57 = vld [vmem:[%s11139_s5 + $0x48] sm:$0xff]  ;;  %v8951_v25 = vld [vmem:[%s11138_s4 + $0xc0] sm:$0xff]   ;;  %v11378_v19 = vmov 0   ;;  %v8978_v56 = vld [vmem:[%s11138_s4 + $0x30] sm:$0xff]  }
 0xa7b   : > { %v8299_v34 = vpack.c.bf16 %v4923_v58, %v4921_v57  ;;  %v8955_v9 = vld [vmem:[%s11138_s4 + $0xc8] sm:$0xff]   ;;  %v8975_v57 = vld [vmem:[%s11138_s4 + $0xf0] sm:$0xff]  }
 0xa7c   : > { %v4848_v26 = vadd.f32 %v9270_v17, %v4847_v0  ;;  %v8952_v0 = vld [vmem:[%s11138_s4 + $0x80] sm:$0xff]   ;;  %v8956_v17 = vld [vmem:[%s11138_s4 + $0x88] sm:$0xff]   ;;  %v8976_v58 = vld [vmem:[%s11138_s4 + $0xb0] sm:$0xff]  }
 0xa7e   : > { %v10569_v31 = vmax.f32 %v4848_v26, 0.0  ;;  %v8959_v26 = vld [vmem:[%s11138_s4 + $0xd0] sm:$0xff]  }
 0xa80   : > { %v4851_v32 = vpack.c.bf16 %v10569_v31, %v10569_v31 }
 0xa82   : > { %v4856_v43 = vsel %vm3508_vm2, %v4851_v32, 0  ;;  %v8963_v32 = vld [vmem:[%s11138_s4 + $0xd8] sm:$0xff]  }
 0xa83   : > { %8286 = vmatpush3.bf16.msra.mxu0 %v4856_v43  ;;  %v8973_v43 = vld [vmem:[%s11138_s4 + $0x68] sm:$0xff]  }
 0xa84   : > { %8292 = vmatprep.subr.bf16.mxu0 %v8291_v38  ;;  %v8964_v38 = vld [vmem:[%s11138_s4 + $0x98] sm:$0xff]   ;;  %7859 = vmatprep.subr.bf16.mxu1 %v8973_v43 }
 0xa86   : > { %8288 = vmatmul.mubr.msk.bf16.vlgmr.msra.gmra.mrb[20].mxu0 %vm3492_vm4, %v4850_v44  ;;  %v8974_v44 = vld [vmem:[%s11138_s4 + $0x28] sm:$0xff]  }
 0xa87   : > { %8294 = vmatpush1.bf16.msra.mxu0 %v8293_v48  ;;  %4995 = vmatprep.mubr.f32.mxu0 %v9316_v30  ;;  %v3454_v30 = vadd.f32 %v3452_v62, %v11377_v12  ;;  %v8971_v48 = vld [vmem:[%s11138_s4 + $0xe8] sm:$0xff]   ;;  %v8981_v62 = vld [vmem:[%s11138_s4 + $0x78] sm:$0xff]  }
 0xa88   : > { %8296 = vmatprep.subr.bf16.mxu0 %v8295_v50  ;;  %v8972_v50 = vld [vmem:[%s11138_s4 + $0xa8] sm:$0xff]   ;;  %7860 = vmatpush3.bf16.msra.mxu1 %v8974_v44  ;;  %v9009_v44 = vld [vmem:[%s11138_s4 + $0x1f0] sm:$0xff]  }
 0xa89   : > { %v10625_v54 = vmax.f32 %v3454_v30, 0.0  ;;  %7861 = vmatprep.subr.bf16.mxu1 %v8977_v45 }
 0xa8b   : > { %8298 = vmatpush1.bf16.msra.mxu0 %v8297_v20  ;;  %v5023_v59 = vpack.c.bf16 %v10625_v54, %v10625_v54  ;;  %v8982_v20 = vld [vmem:[%s11138_s4 + $0x38] sm:$0xff]  }
 0xa8c   : > { %8300 = vmatprep.subr.bf16.mxu0 %v8299_v34  ;;  %7862 = vmatpush3.bf16.msra.mxu1 %v8978_v56  ;;  %v8979_v34 = vld [vmem:[%s11138_s4 + $0xf8] sm:$0xff]   ;;  %v9007_v56 = vld [vmem:[%s11138_s4 + $0x170] sm:$0xff]  }
 0xa8d   : > { %7863 = vmatprep.subr.bf16.mxu1 %v8981_v62  ;;  %v9010_v62 = vld [vmem:[%s11138_s4 + $0x1b0] sm:$0xff]  }
 0xa8f   : > { %8302 = vmatpush1.bf16.msra.mxu0 %v8301_v36 }
 0xa90   : > { %8304 = vmatprep.subr.bf16.mxu0 %v8303_v37  ;;  %7864 = vmatpush3.bf16.msra.mxu1 %v8982_v20 }
 0xa91   : > { %7893 = vmatprep.subr.bf16.mxu1 %v8985_v10  ;;  %v9011_v10 = vld [vmem:[%s11138_s4 + $0x178] sm:$0xff]  }
 0xa93   : > { %8306 = vmatpush1.bf16.msra.mxu0 %v8305_v55 }
 0xa94   : > { %7313 = vmatprep.subr.msk.bf16.mxu0 %vm684_vm0, %v5023_v59 }
 0xb59   : > { %v4892_v21 = vpop.f32.mrb[20].mxu0 }
 0xb5a   : > { %v4904_v15 = vmul.f32 %v4902_v18, %v4892_v21  ;;  %v8289_v28 = vpop.f32.mrb[21].mxu0  ;;  %v8988_v18 = vld [vmem:[%s11138_s4 + $0x108] sm:$0xff]  }
 0xb5b   : > { %v4895_v49 = vpop.f32.mrb[22].mxu0 }
 0xb5c   : > { %v4911_v24 = vadd.f32 %v4909_v35, %v4904_v15  ;;  %v8290_v33 = vpop.f32.mrb[23].mxu0  ;;  %v8991_v15 = vld [vmem:[%s11138_s4 + $0x150] sm:$0xff]  }
 0xb5d   : > { %v8994_v35 = vld [vmem:[%s11138_s4 + $0x190] sm:$0xff]  }
 0xb5e   : > { %7307 = vmatmul.mubr.msk.f32.vlgmr.msra.gmra.mrb[24].mxu0 %vm3632_vm5, %v4911_v24  ;;  %v8997_v24 = vld [vmem:[%s11138_s4 + $0x1d8] sm:$0xff]   ;;  %v8992_v33 = vld [vmem:[%s11138_s4 + $0x110] sm:$0xff]  }
 0xb5f   : > { %5069 = vmatpush1.bf16.msra.mxu0 %v5063_v1  ;;  %5100 = vmatprep.mubr.bf16.mxu0 %v11378_v19  ;;  %v8995_v1 = vld [vmem:[%s11138_s4 + $0x158] sm:$0xff]  }
 0xb60   : > { %7827 = vmatprep.subr.bf16.mxu0 %v8951_v25 }
 0xb62   : > { %7314 = vmatmul.mubr.msk.bf16.vlgmr.msra.gmra.mrb[28].mxu0 %vm674_vm1, %v8946_v51  ;;  %v8998_v51 = vld [vmem:[%s11138_s4 + $0x198] sm:$0xff]  }
 0xb63   : > { %5110 = vmatprep.mubr.bf16.mxu0 %v11378_v19  ;;  %7828 = vmatpush3.bf16.msra.mxu0 %v8952_v0  ;;  %v9001_v0 = vld [vmem:[%s11138_s4 + $0x1e0] sm:$0xff]  }
 0xb64   : > { %7829 = vmatprep.subr.bf16.mxu0 %v8955_v9 }
 0xb67   : > { %7830 = vmatpush3.bf16.msra.mxu0 %v8956_v17  ;;  %v8996_v17 = vld [vmem:[%s11138_s4 + $0x118] sm:$0xff]  }
 0xb68   : > { %7831 = vmatprep.subr.bf16.mxu0 %v8959_v26 }
 0xb6a   : > { %7315 = vmatmul.mubr.msk.bf16.gmra.mrb[32].mxu0 %vm674_vm1, %v8947_v27  ;;  %v8999_v27 = vld [vmem:[%s11138_s4 + $0x160] sm:$0xff]  }
 0xb6b   : > { %5120 = vmatprep.mubr.bf16.mxu0 %v11378_v19  ;;  %7832 = vmatpush3.bf16.msra.mxu0 %v8960_v29 }
 0xb6c   : > { %7833 = vmatprep.subr.bf16.mxu0 %v8963_v32 }
 0xb6f   : > { %7834 = vmatpush3.bf16.msra.mxu0 %v8964_v38  ;;  %v9002_v38 = vld [vmem:[%s11138_s4 + $0x1a0] sm:$0xff]  }
 0xb70   : > { %7835 = vmatprep.subr.bf16.mxu0 %v8967_v52 }
 0xb72   : > { %7316 = vmatmul.mubr.msk.bf16.gmra.mrb[36].mxu0 %vm674_vm1, %v8948_v39  ;;  %v9005_v39 = vld [vmem:[%s11138_s4 + $0x1e8] sm:$0xff]  }
 0xb73   : > { %5130 = vmatprep.mubr.bf16.mxu0 %v11378_v19  ;;  %7836 = vmatpush3.bf16.msra.mxu0 %v8968_v40  ;;  %v9000_v40 = vld [vmem:[%s11138_s4 + $0x120] sm:$0xff]  }
 0xb74   : > { %7837 = vmatprep.subr.bf16.mxu0 %v8971_v48 }
 0xb77   : > { %7838 = vmatpush3.bf16.msra.mxu0 %v8972_v50  ;;  %v9004_v50 = vld [vmem:[%s11138_s4 + $0x128] sm:$0xff]  }
 0xb78   : > { %7839 = vmatprep.subr.bf16.mxu0 %v8975_v57 }
 0xb7a   : > { %7317 = vmatmul.mubr.msk.bf16.gmra.mrb[40].mxu0 %vm674_vm1, %v8949_v41  ;;  %v9003_v41 = vld [vmem:[%s11138_s4 + $0x168] sm:$0xff]  }
 0xb7b   : > { %5140 = vmatprep.mubr.bf16.mxu0 %v11378_v19  ;;  %7840 = vmatpush3.bf16.msra.mxu0 %v8976_v58 }
 0xb7c   : > { %7841 = vmatprep.subr.bf16.mxu0 %v8979_v34  ;;  %v9013_v34 = vld [vmem:[%s11138_s4 + $0x1f8] sm:$0xff]  }
 0xb7f   : > { %7842 = vmatpush3.bf16.msra.mxu0 %v8980_v6  ;;  %v9008_v6 = vld [vmem:[%s11138_s4 + $0x130] sm:$0xff]  }
 0xb80   : > { %7871 = vmatprep.subr.bf16.mxu0 %v8983_v60  ;;  %v9014_v60 = vld [vmem:[%s11138_s4 + $0x1b8] sm:$0xff]  }
 0xb82   : > { %7318 = vmatmul.mubr.msk.bf16.gmra.mrb[44].mxu0 %vm674_vm1, %v8950_v42  ;;  %v9006_v42 = vld [vmem:[%s11138_s4 + $0x1a8] sm:$0xff]  }
 0xc31   : > { %v4997_v11 = vpop.f32.mrb[24].mxu0 }
 0xc32   : > { %v5002_v12 = vadd.f32 %v4997_v11, %v10662_v47  ;;  %v4999_v30 = vpop.f32.mrb[25].mxu0 }
 0xc33   : > { %v5003_v36 = vadd.f32 %v4999_v30, %v10625_v54  ;;  %v8989_v54 = vld [vmem:[%s11138_s4 + $0x1c8] sm:$0xff]  }
 0xc34   : > { %v5004_v37 = vmax.f32 %v5002_v12, 0.0  ;;  %v9017_v12 = vld [vmem:[%s11138_s4 + $0x2c0] sm:$0xff]  }
 0xc35   : > { %v5005_v46 = vmax.f32 %v5003_v36, 0.0  ;;  %v5102_v53 = vpop.f32.mrb[28].mxu0  ;;  %v9012_v36 = vld [vmem:[%s11138_s4 + $0x138] sm:$0xff]  }
 0xc36   : > { %v5104_v55 = vpop.f32.mrb[29].mxu0 }
 0xc37   : > { %v5008_v59 = vcombine.low %v5004_v37, %v5005_v46  ;;  %v5106_v61 = vpop.f32.mrb[30].mxu0 }
 0xc38   : > { %v5149_v63 = vpack.c.bf16 %v5106_v61, %v5102_v53  ;;  %v5108_v3 = vpop.f32.mrb[31].mxu0  ;;  %v9015_v53 = vld [vmem:[%s11138_s4 + $0x240] sm:$0xff]  }
 0xc39   : > { %5010 = vst [vmem:[%s641_s1] sm:$0xff] %v5008_v59  ;;  %v5150_v4 = vpack.c.bf16 %v5108_v3, %v5104_v55  ;;  %v9018_v59 = vld [vmem:[%s11138_s4 + $0x280] sm:$0xff]  }
 0xc3a   : > { %v5226_v8 = vrot.slane %v5149_v63, 4  ;;  %v9016_v3 = vld [vmem:[%s11138_s4 + $0x200] sm:$0xff]  }
 0xc3b   : > { %v5227_v5 = vrot.slane %v5150_v4, 4  ;;  %5494 = vmatprep.mubr.bf16.mxu1 %v5150_v4  ;;  %v9019_v4 = vld [vmem:[%s11138_s4 + $0x248] sm:$0xff]  }
 0xc3c   : > { %5495 = vmatmul.mubr.bf16.vlgmr.msra.gmra.mrb[60].mxu1 %v5149_v63  ;;  %v9021_v63 = vld [vmem:[%s11138_s4 + $0x2c8] sm:$0xff]  }
 0xc3d   : > { %5358 = vmatprep.mubr.bf16.mxu0 %v5227_v5  ;;  %7894 = vmatpush3.bf16.msra.mxu1 %v8986_v16  ;;  %v5112_v13 = vpop.f32.mrb[32].mxu0  ;;  %v9022_v16 = vld [vmem:[%s11138_s4 + $0x288] sm:$0xff]  }
 0xc3e   : > { %5359 = vmatmul.mubr.bf16.vlgmr.msra.gmra.mrb[48].mxu0 %v5226_v8  ;;  %7895 = vmatprep.subr.bf16.mxu1 %v8989_v54  ;;  %v5114_v47 = vpop.f32.mrb[33].mxu0  ;;  %v9025_v54 = vld [vmem:[%s11138_s4 + $0x2d0] sm:$0xff]   ;;  %v9020_v5 = vld [vmem:[%s11138_s4 + $0x208] sm:$0xff]  }
 0xc3f   : > { %7872 = vmatpush3.bf16.msra.mxu0 %v8984_v7  ;;  %v5116_v21 = vpop.f32.mrb[34].mxu0  ;;  %v9023_v7 = vld [vmem:[%s11138_s4 + $0x250] sm:$0xff]  }
 0xc40   : > { %7873 = vmatprep.subr.bf16.mxu0 %v8987_v23  ;;  %v10795_v2 = vpack.c.bf16 %v5116_v21, %v5112_v13  ;;  %v5118_v28 = vpop.f32.mrb[35].mxu0  ;;  %v9026_v8 = vld [vmem:[%s11138_s4 + $0x290] sm:$0xff]   ;;  %v9029_v23 = vld [vmem:[%s11138_s4 + $0x2d8] sm:$0xff]   ;;  %v9031_v21 = vld [vmem:[%s11138_s4 + $0x260] sm:$0xff]  }
 0xc41   : > { %7896 = vmatpush3.bf16.msra.mxu1 %v8990_v22  ;;  %v5152_v49 = vpack.c.bf16 %v5118_v28, %v5114_v47  ;;  %v9024_v22 = vld [vmem:[%s11138_s4 + $0x210] sm:$0xff]   ;;  %v9027_v13 = vld [vmem:[%s11138_s4 + $0x258] sm:$0xff]   ;;  %v9033_v47 = vld [vmem:[%s11138_s4 + $0x2e0] sm:$0xff]  }
 0xc42   : > { %7897 = vmatprep.subr.bf16.mxu1 %v8993_v14  ;;  %v5707_v46 = vrot.slane %v10795_v2, 4  ;;  %v9030_v14 = vld [vmem:[%s11138_s4 + $0x298] sm:$0xff]   ;;  %v9032_v28 = vld [vmem:[%s11138_s4 + $0x220] sm:$0xff]  }
 0xc43   : > { %7874 = vmatpush3.bf16.msra.mxu0 %v8988_v18  ;;  %v5708_v25 = vrot.slane %v5152_v49, 4  ;;  %5663 = vmatprep.mubr.bf16.mxu0 %v5152_v49  ;;  %v9028_v18 = vld [vmem:[%s11138_s4 + $0x218] sm:$0xff]   ;;  %v9038_v49 = vld [vmem:[%s11138_s4 + $0x2a8] sm:$0xff]  }
 0xc44   : > { %7875 = vmatprep.subr.bf16.mxu0 %v8991_v15  ;;  %v9034_v15 = vld [vmem:[%s11138_s4 + $0x2a0] sm:$0xff]  }
 0xc45   : > { %7898 = vmatpush3.bf16.msra.mxu1 %v8994_v35  ;;  %5839 = vmatprep.mubr.bf16.mxu1 %v5708_v25  ;;  %v5122_v19 = vpop.f32.mrb[36].mxu0  ;;  %v9035_v35 = vld [vmem:[%s11138_s4 + $0x268] sm:$0xff]   ;;  %v9039_v25 = vld [vmem:[%s11138_s4 + $0x270] sm:$0xff]  }
 0xc46   : > { %7899 = vmatprep.subr.bf16.mxu1 %v8997_v24  ;;  %v5124_v9 = vpop.f32.mrb[37].mxu0  ;;  %v9041_v24 = vld [vmem:[%s11138_s4 + $0x2f0] sm:$0xff]  }
 0xc47   : > { %7876 = vmatpush3.bf16.msra.mxu0 %v8992_v33  ;;  %v5126_v26 = vpop.f32.mrb[38].mxu0  ;;  %v9036_v33 = vld [vmem:[%s11138_s4 + $0x228] sm:$0xff]  }
 0xc48   : > { %7877 = vmatprep.subr.bf16.mxu0 %v8995_v1  ;;  %v10821_v29 = vpack.c.bf16 %v5126_v26, %v5122_v19  ;;  %v5128_v32 = vpop.f32.mrb[39].mxu0  ;;  %v9042_v1 = vld [vmem:[%s11138_s4 + $0x2b0] sm:$0xff]   ;;  %v9044_v26 = vld [vmem:[%s11138_s4 + $0x238] sm:$0xff]  }
 0xc49   : > { %7900 = vmatpush3.bf16.msra.mxu1 %v8998_v51  ;;  %v5154_v52 = vpack.c.bf16 %v5128_v32, %v5124_v9  ;;  %v9045_v51 = vld [vmem:[%s11138_s4 + $0x2f8] sm:$0xff]   ;;  %v9040_v19 = vld [vmem:[%s11138_s4 + $0x230] sm:$0xff]   ;;  %v9047_v32 = vld [vmem:[%s11138_s4 + $0x340] sm:$0xff]  }
 0xc4a   : > { %7901 = vmatprep.subr.bf16.mxu1 %v9001_v0  ;;  %v9043_v0 = vld [vmem:[%s11138_s4 + $0x278] sm:$0xff]  }
 0xc4b   : > { %7878 = vmatpush3.bf16.msra.mxu0 %v8996_v17  ;;  %v6054_v61 = vrot.slane %v5154_v52, 4  ;;  %v9046_v9 = vld [vmem:[%s11138_s4 + $0x2b8] sm:$0xff]   ;;  %v9049_v17 = vld [vmem:[%s11138_s4 + $0x3c0] sm:$0xff]  }
 0xc4c   : > { %7879 = vmatprep.subr.bf16.mxu0 %v8999_v27  ;;  %v6053_v27 = vrot.slane %v10821_v29, 4 }
 0xc4d   : > { %7902 = vmatpush3.bf16.msra.mxu1 %v9002_v38  ;;  %v5132_v43 = vpop.f32.mrb[40].mxu0  ;;  %v9050_v38 = vld [vmem:[%s11138_s4 + $0x380] sm:$0xff]  }
 0xc4e   : > { %7903 = vmatprep.subr.bf16.mxu1 %v9005_v39  ;;  %v5134_v48 = vpop.f32.mrb[41].mxu0  ;;  %v9053_v39 = vld [vmem:[%s11138_s4 + $0x3c8] sm:$0xff]  }
 0xc4f   : > { %7880 = vmatpush3.bf16.msra.mxu0 %v9000_v40  ;;  %v5136_v45 = vpop.f32.mrb[42].mxu0  ;;  %v9048_v40 = vld [vmem:[%s11138_s4 + $0x300] sm:$0xff]  }
 0xc50   : > { %7881 = vmatprep.subr.bf16.mxu0 %v9003_v41  ;;  %v10847_v57 = vpack.c.bf16 %v5136_v45, %v5132_v43  ;;  %v5138_v58 = vpop.f32.mrb[43].mxu0  ;;  %v9051_v41 = vld [vmem:[%s11138_s4 + $0x348] sm:$0xff]   ;;  %v9057_v43 = vld [vmem:[%s11138_s4 + $0x3d0] sm:$0xff]  }
 0xc51   : > { %7904 = vmatpush3.bf16.msra.mxu1 %v9006_v42  ;;  %v10852_v20 = vpack.c.bf16 %v5138_v58, %v5134_v48  ;;  %v9054_v42 = vld [vmem:[%s11138_s4 + $0x388] sm:$0xff]   ;;  %v9055_v48 = vld [vmem:[%s11138_s4 + $0x350] sm:$0xff]   ;;  %v9062_v58 = vld [vmem:[%s11138_s4 + $0x398] sm:$0xff]  }
 0xc52   : > { %7905 = vmatprep.subr.bf16.mxu1 %v9009_v44  ;;  %v9052_v44 = vld [vmem:[%s11138_s4 + $0x308] sm:$0xff]   ;;  %v9056_v45 = vld [vmem:[%s11138_s4 + $0x310] sm:$0xff]  }
 0xc53   : > { %7882 = vmatpush3.bf16.msra.mxu0 %v9004_v50  ;;  %v9061_v50 = vld [vmem:[%s11138_s4 + $0x3d8] sm:$0xff]  }
 0xc54   : > { %7883 = vmatprep.subr.bf16.mxu0 %v9007_v56  ;;  %v9059_v56 = vld [vmem:[%s11138_s4 + $0x358] sm:$0xff]  }
 0xc55   : > { %7906 = vmatpush3.bf16.msra.mxu1 %v9010_v62  ;;  %v10866_v11 = vpop.f32.mrb[44].mxu0  ;;  %v9065_v62 = vld [vmem:[%s11138_s4 + $0x3e0] sm:$0xff]  }
 0xc56   : > { %7907 = vmatprep.subr.bf16.mxu1 %v9013_v34  ;;  %v10871_v30 = vpop.f32.mrb[45].mxu0  ;;  %v9063_v34 = vld [vmem:[%s11138_s4 + $0x360] sm:$0xff]  }
 0xc57   : > { %7884 = vmatpush3.bf16.msra.mxu0 %v9008_v6  ;;  %v5146_v37 = vpop.f32.mrb[46].mxu0  ;;  %v9066_v6 = vld [vmem:[%s11138_s4 + $0x3a0] sm:$0xff]  }
 0xc58   : > { %7885 = vmatprep.subr.bf16.mxu0 %v9011_v10  ;;  %v5147_v55 = vpop.f32.mrb[47].mxu0  ;;  %v9069_v10 = vld [vmem:[%s11138_s4 + $0x3e8] sm:$0xff]   ;;  %v9073_v37 = vld [vmem:[%s11138_s4 + $0x3f0] sm:$0xff]  }
 0xc59   : > { %7908 = vmatpush3.bf16.msra.mxu1 %v9014_v60  ;;  %v9064_v60 = vld [vmem:[%s11138_s4 + $0x320] sm:$0xff]   ;;  %v9074_v55 = vld [vmem:[%s11138_s4 + $0x3b0] sm:$0xff]  }
 0xc5a   : > { %7937 = vmatprep.subr.bf16.mxu1 %v9017_v12  ;;  %v9067_v12 = vld [vmem:[%s11138_s4 + $0x368] sm:$0xff]  }
 0xc5b   : > { %7886 = vmatpush3.bf16.msra.mxu0 %v9012_v36  ;;  %v9070_v36 = vld [vmem:[%s11138_s4 + $0x3a8] sm:$0xff]  }
 0xc5c   : > { %7915 = vmatprep.subr.bf16.mxu0 %v9015_v53  ;;  %5840 = vmatmul.mubr.bf16.vlgmr.msra.gmra.mrb[64].mxu1 %v5707_v46  ;;  %v9068_v46 = vld [vmem:[%s11138_s4 + $0x328] sm:$0xff]   ;;  %v9071_v53 = vld [vmem:[%s11138_s4 + $0x370] sm:$0xff]  }
 0xc5d   : > { %7938 = vmatpush3.bf16.msra.mxu1 %v9018_v59  ;;  %6185 = vmatprep.mubr.bf16.mxu1 %v6054_v61  ;;  %v9077_v59 = vld [vmem:[%s11138_s4 + $0x3f8] sm:$0xff]   ;;  %v9072_v61 = vld [vmem:[%s11138_s4 + $0x330] sm:$0xff]  }
 0xc5e   : > { %5664 = vmatmul.mubr.bf16.vlgmr.msra.gmra.mrb[52].mxu0 %v10795_v2  ;;  %7939 = vmatprep.subr.bf16.mxu1 %v9021_v63  ;;  %v9037_v2 = vld [vmem:[%s11138_s4 + $0x2e8] sm:$0xff]   ;;  %v9075_v63 = vld [vmem:[%s11138_s4 + $0x378] sm:$0xff]  }
 0xc5f   : > { %7916 = vmatpush3.bf16.msra.mxu0 %v9016_v3  ;;  %6009 = vmatprep.mubr.bf16.mxu0 %v5154_v52  ;;  %v6400_v52 = vrot.slane %v10852_v20, 4  ;;  %v9078_v3 = vld [vmem:[%s11138_s4 + $0x3b8] sm:$0xff]  }
 0xc60   : > { %7917 = vmatprep.subr.bf16.mxu0 %v9019_v4  ;;  %v9076_v4 = vld [vmem:[%s11138_s4 + $0x338] sm:$0xff]  }
 0xc61   : > { %7940 = vmatpush3.bf16.msra.mxu1 %v9022_v16  ;;  %v6399_v16 = vrot.slane %v10847_v57, 4 }
 0xc62   : > { %7941 = vmatprep.subr.bf16.mxu1 %v9025_v54  ;;  %v9079_v54 = vld [vmem:[%s11138_s4 + $0x440] sm:$0xff]  }
 0xc63   : > { %7918 = vmatpush3.bf16.msra.mxu0 %v9020_v5  ;;  %v9080_v5 = vld [vmem:[%s11138_s4 + $0x400] sm:$0xff]  }
 0xc64   : > { %7919 = vmatprep.subr.bf16.mxu0 %v9023_v7  ;;  %v5158_v7 = vpack.c.bf16 %v10871_v30, %v10871_v30  ;;  %v9084_v30 = vld [vmem:[%s11138_s4 + $0x410] sm:$0xff]  }
 0xc65   : > { %7942 = vmatpush3.bf16.msra.mxu1 %v9026_v8  ;;  %v9081_v8 = vld [vmem:[%s11138_s4 + $0x448] sm:$0xff]  }
 0xc66   : > { %7943 = vmatprep.subr.bf16.mxu1 %v9029_v23  ;;  %v9082_v23 = vld [vmem:[%s11138_s4 + $0x408] sm:$0xff]  }
 0xc67   : > { %7920 = vmatpush3.bf16.msra.mxu0 %v9024_v22  ;;  %v9083_v22 = vld [vmem:[%s11138_s4 + $0x450] sm:$0xff]  }
 0xc68   : > { %7921 = vmatprep.subr.bf16.mxu0 %v9027_v13  ;;  %v9086_v13 = vld [vmem:[%s11138_s4 + $0x418] sm:$0xff]  }
 0xc69   : > { %7944 = vmatpush3.bf16.msra.mxu1 %v9030_v14  ;;  %v9087_v14 = vld [vmem:[%s11138_s4 + $0x460] sm:$0xff]  }
 0xc6a   : > { %7945 = vmatprep.subr.bf16.mxu1 %v9033_v47  ;;  %v9088_v47 = vld [vmem:[%s11138_s4 + $0x420] sm:$0xff]  }
 0xc6b   : > { %7922 = vmatpush3.bf16.msra.mxu0 %v9028_v18  ;;  %v9089_v18 = vld [vmem:[%s11138_s4 + $0x468] sm:$0xff]  }
 0xc6c   : > { %7923 = vmatprep.subr.bf16.mxu0 %v9031_v21  ;;  %v9090_v21 = vld [vmem:[%s11138_s4 + $0x428] sm:$0xff]  }
 0xc6d   : > { %7946 = vmatpush3.bf16.msra.mxu1 %v9034_v15  ;;  %v9091_v15 = vld [vmem:[%s11138_s4 + $0x470] sm:$0xff]  }
 0xc6e   : > { %7947 = vmatprep.subr.bf16.mxu1 %v9037_v2  ;;  %v9092_v2 = vld [vmem:[%s11138_s4 + $0x430] sm:$0xff]  }
 0xc6f   : > { %7924 = vmatpush3.bf16.msra.mxu0 %v9032_v28  ;;  %v9093_v28 = vld [vmem:[%s11138_s4 + $0x478] sm:$0xff]  }
 0xc70   : > { %7925 = vmatprep.subr.bf16.mxu0 %v9035_v35  ;;  %v9094_v35 = vld [vmem:[%s11138_s4 + $0x438] sm:$0xff]  }
 0xc71   : > { %7948 = vmatpush3.bf16.msra.mxu1 %v9038_v49  ;;  %v5157_v49 = vpack.c.bf16 %v10866_v11, %v10866_v11 }
 0xc72   : > { %7949 = vmatprep.subr.bf16.mxu1 %v9041_v24 }
 0xc73   : > { %7926 = vmatpush3.bf16.msra.mxu0 %v9036_v33 }
 0xc74   : > { %7927 = vmatprep.subr.bf16.mxu0 %v9039_v25 }
 0xc75   : > { %7950 = vmatpush3.bf16.msra.mxu1 %v9042_v1 }
 0xc76   : > { %7951 = vmatprep.subr.bf16.mxu1 %v9045_v51 }
 0xc77   : > { %7928 = vmatpush3.bf16.msra.mxu0 %v9040_v19 }
 0xc78   : > { %7929 = vmatprep.subr.bf16.mxu0 %v9043_v0 }
 0xc79   : > { %7952 = vmatpush3.bf16.msra.mxu1 %v9046_v9 }
 0xc7a   : > { %7981 = vmatprep.subr.bf16.mxu1 %v9049_v17 }
 0xc7b   : > { %7930 = vmatpush3.bf16.msra.mxu0 %v9044_v26 }
 0xc7c   : > { %7959 = vmatprep.subr.bf16.mxu0 %v9047_v32  ;;  %6186 = vmatmul.mubr.bf16.vlgmr.msra.gmra.mrb[68].mxu1 %v6053_v27 }
 0xc7d   : > { %7982 = vmatpush3.bf16.msra.mxu1 %v9050_v38  ;;  %6531 = vmatprep.mubr.bf16.mxu1 %v6400_v52 }
 0xc7e   : > { %6010 = vmatmul.mubr.bf16.vlgmr.msra.gmra.mrb[56].mxu0 %v10821_v29  ;;  %7983 = vmatprep.subr.bf16.mxu1 %v9053_v39  ;;  %v9058_v29 = vld [vmem:[%s11138_s4 + $0x390] sm:$0xff]  }
 0xc7f   : > { %7960 = vmatpush3.bf16.msra.mxu0 %v9048_v40  ;;  %6355 = vmatprep.mubr.bf16.mxu0 %v10852_v20  ;;  %v9060_v20 = vld [vmem:[%s11138_s4 + $0x318] sm:$0xff]  }
 0xc80   : > { %7961 = vmatprep.subr.bf16.mxu0 %v9051_v41 }
 0xc81   : > { %7984 = vmatpush3.bf16.msra.mxu1 %v9054_v42 }
 0xc82   : > { %7985 = vmatprep.subr.bf16.mxu1 %v9057_v43 }
 0xc83   : > { %7962 = vmatpush3.bf16.msra.mxu0 %v9052_v44 }
 0xc84   : > { %7963 = vmatprep.subr.bf16.mxu0 %v9055_v48 }
 0xc85   : > { %7986 = vmatpush3.bf16.msra.mxu1 %v9058_v29 }
 0xc86   : > { %7987 = vmatprep.subr.bf16.mxu1 %v9061_v50 }
 0xc87   : > { %7964 = vmatpush3.bf16.msra.mxu0 %v9056_v45 }
 0xc88   : > { %7965 = vmatprep.subr.bf16.mxu0 %v9059_v56 }
 0xc89   : > { %7988 = vmatpush3.bf16.msra.mxu1 %v9062_v58 }
 0xc8a   : > { %7989 = vmatprep.subr.bf16.mxu1 %v9065_v62 }
 0xc8b   : > { %7966 = vmatpush3.bf16.msra.mxu0 %v9060_v20 }
 0xc8c   : > { %7967 = vmatprep.subr.bf16.mxu0 %v9063_v34 }
 0xc8d   : > { %7990 = vmatpush3.bf16.msra.mxu1 %v9066_v6 }
 0xc8e   : > { %7991 = vmatprep.subr.bf16.mxu1 %v9069_v10 }
 0xc8f   : > { %7968 = vmatpush3.bf16.msra.mxu0 %v9064_v60 }
 0xc90   : > { %7969 = vmatprep.subr.bf16.mxu0 %v9067_v12 }
 0xc91   : > { %7992 = vmatpush3.bf16.msra.mxu1 %v9070_v36 }
 0xc92   : > { %7993 = vmatprep.subr.bf16.mxu1 %v9073_v37 }
 0xc93   : > { %7970 = vmatpush3.bf16.msra.mxu0 %v9068_v46 }
 0xc94   : > { %7971 = vmatprep.subr.bf16.mxu0 %v9071_v53 }
 0xc95   : > { %7994 = vmatpush3.bf16.msra.mxu1 %v9074_v55 }
 0xc96   : > { %7995 = vmatprep.subr.bf16.mxu1 %v9077_v59 }
 0xc97   : > { %7972 = vmatpush3.bf16.msra.mxu0 %v9072_v61 }
 0xc98   : > { %7973 = vmatprep.subr.bf16.mxu0 %v9075_v63 }
 0xc99   : > { %7996 = vmatpush3.bf16.msra.mxu1 %v9078_v3 }
 0xc9b   : > { %7974 = vmatpush3.bf16.msra.mxu0 %v9076_v4 }
 0xc9c   : > { %8003 = vmatprep.subr.bf16.mxu0 %v9079_v54  ;;  %6532 = vmatmul.mubr.bf16.vlgmr.msra.gmra.mrb[72].mxu1 %v6399_v16 }
 0xc9e   : > { %6356 = vmatmul.mubr.bf16.vlgmr.msra.gmra.mrb[60].mxu0 %v10847_v57  ;;  %v9085_v57 = vld [vmem:[%s11138_s4 + $0x458] sm:$0xff]  }
 0xc9f   : > { %8004 = vmatpush3.bf16.msra.mxu0 %v9080_v5  ;;  %6701 = vmatprep.mubr.bf16.mxu0 %v5158_v7 }
 0xca0   : > { %8005 = vmatprep.subr.bf16.mxu0 %v9081_v8 }
 0xca3   : > { %8006 = vmatpush3.bf16.msra.mxu0 %v9082_v23 }
 0xca4   : > { %8007 = vmatprep.subr.bf16.mxu0 %v9083_v22 }
 0xca7   : > { %8008 = vmatpush3.bf16.msra.mxu0 %v9084_v30 }
 0xca8   : > { %8009 = vmatprep.subr.bf16.mxu0 %v9085_v57 }
 0xcab   : > { %8010 = vmatpush3.bf16.msra.mxu0 %v9086_v13  ;;  %v6713_v13 = vpop.permute.xlu0 %6712 }
 0xcac   : > { %8011 = vmatprep.subr.bf16.mxu0 %v9087_v14 }
 0xcaf   : > { %8012 = vmatpush3.bf16.msra.mxu0 %v9088_v47  ;;  %v6719_v47 = vpop.permute.xlu1 %6718 }
 0xcb0   : > { %8013 = vmatprep.subr.bf16.mxu0 %v9089_v18 }
 0xcb3   : > { %8014 = vmatpush3.bf16.msra.mxu0 %v9090_v21 }
 0xcb4   : > { %8015 = vmatprep.subr.bf16.mxu0 %v9091_v15 }
 0xcb7   : > { %8016 = vmatpush3.bf16.msra.mxu0 %v9092_v2 }
 0xcb8   : > { %8017 = vmatprep.subr.bf16.mxu0 %v9093_v28 }
 0xcbb   : > { %8018 = vmatpush3.bf16.msra.mxu0 %v9094_v35 }
 0xcbe   : > { %6702 = vmatmul.mubr.bf16.vlgmr.msra.gmra.mrb[64].mxu0 %v5157_v49 }
 0xd0f   : > { %v7865_v24 = vpop.f32.mrb[60].mxu1 }
 0xd10   : > { %v7866_v33 = vpop.f32.mrb[61].mxu1 }
 0xd11   : > { %v7843_v25 = vpop.f32.mrb[48].mxu0  ;;  %v7867_v1 = vadd.f32 %v7866_v33, %v7865_v24  ;;  %v7868_v51 = vpop.f32.mrb[62].mxu1 }
 0xd12   : > { %v7844_v19 = vpop.f32.mrb[49].mxu0  ;;  %v7869_v0 = vpop.f32.mrb[63].mxu1 }
 0xd13   : > { %v7845_v9 = vadd.f32 %v7844_v19, %v7843_v25  ;;  %v7846_v17 = vpop.f32.mrb[50].mxu0 }
 0xd14   : > { %v7847_v26 = vpop.f32.mrb[51].mxu0 }
 0xd15   : > { %v5497_v27 = vadd.f32 %v7867_v1, %v7845_v9 }
 0xd2f   : > { %v7909_v32 = vpop.f32.mrb[64].mxu1 }
 0xd30   : > { %v7910_v38 = vpop.f32.mrb[65].mxu1 }
 0xd31   : > { %v7887_v52 = vpop.f32.mrb[52].mxu0  ;;  %v7911_v39 = vadd.f32 %v7910_v38, %v7909_v32  ;;  %v7912_v40 = vpop.f32.mrb[66].mxu1 }
 0xd32   : > { %v7888_v41 = vpop.f32.mrb[53].mxu0  ;;  %v7913_v42 = vpop.f32.mrb[67].mxu1 }
 0xd33   : > { %v7889_v11 = vadd.f32 %v7888_v41, %v7887_v52  ;;  %v7890_v43 = vpop.f32.mrb[54].mxu0 }
 0xd34   : > { %v7891_v44 = vpop.f32.mrb[55].mxu0 }
 0xd35   : > { %v5671_v48 = vadd.f32 %v7889_v11, %v5497_v27 }
 0xd37   : > { %v5847_v29 = vadd.f32 %v7911_v39, %v5671_v48 }
 0xd4f   : > { %v7953_v50 = vpop.f32.mrb[68].mxu1 }
 0xd50   : > { %v7954_v45 = vpop.f32.mrb[69].mxu1 }
 0xd51   : > { %v7931_v56 = vpop.f32.mrb[56].mxu0  ;;  %v7955_v58 = vadd.f32 %v7954_v45, %v7953_v50  ;;  %v7956_v62 = vpop.f32.mrb[70].mxu1 }
 0xd52   : > { %v7932_v20 = vpop.f32.mrb[57].mxu0  ;;  %v7957_v34 = vpop.f32.mrb[71].mxu1 }
 0xd53   : > { %v7933_v6 = vadd.f32 %v7932_v20, %v7931_v56  ;;  %v7934_v10 = vpop.f32.mrb[58].mxu0 }
 0xd54   : > { %v7935_v60 = vpop.f32.mrb[59].mxu0 }
 0xd55   : > { %v6017_v12 = vadd.f32 %v7933_v6, %v5847_v29 }
 0xd57   : > { %v6193_v36 = vadd.f32 %v7955_v58, %v6017_v12 }
 0xd6f   : > { %v7997_v37 = vpop.f32.mrb[72].mxu1 }
 0xd70   : > { %v7998_v46 = vpop.f32.mrb[73].mxu1 }
 0xd71   : > { %v7975_v53 = vpop.f32.mrb[60].mxu0  ;;  %v7999_v55 = vadd.f32 %v7998_v46, %v7997_v37  ;;  %v8000_v59 = vpop.f32.mrb[74].mxu1 }
 0xd72   : > { %v7976_v61 = vpop.f32.mrb[61].mxu0  ;;  %v8001_v63 = vpop.f32.mrb[75].mxu1 }
 0xd73   : > { %v7977_v3 = vadd.f32 %v7976_v61, %v7975_v53  ;;  %v7978_v4 = vpop.f32.mrb[62].mxu0 }
 0xd74   : > { %v7979_v16 = vpop.f32.mrb[63].mxu0 }
 0xd75   : > { %v6363_v54 = vadd.f32 %v7977_v3, %v6193_v36 }
 0xd77   : > { %v6539_v5 = vadd.f32 %v7999_v55, %v6363_v54 }
 0xd91   : > { %v8019_v7 = vpop.f32.mrb[64].mxu0 }
 0xd92   : > { %v8020_v8 = vpop.f32.mrb[65].mxu0 }
 0xd93   : > { %v8021_v23 = vadd.f32 %v8020_v8, %v8019_v7  ;;  %v8022_v22 = vpop.f32.mrb[66].mxu0 }
 0xd94   : > { %v8023_v30 = vpop.f32.mrb[67].mxu0 }
 0xd95   : > { %v6709_v57 = vadd.f32 %v8021_v23, %v6539_v5 }
 0xd97   : > { %v6715_v14 = vmul.f32 %v6713_v13, %v6709_v57 }
 0xd99   : > { %v6721_v18 = vadd.f32 %v6719_v47, %v6715_v14 }
 0xd9b   : > { %v6722_v21 = vadd.f32 %v6721_v18, %v10569_v31 }
 0xd9d   : > { %v6723_v15 = vmax.f32 %v6722_v21, 0.0 }
 0xd9f   : > { %6724 = vst.msk [vmem:[%s645_s30] sm:$0xff] %vm3632_vm5, %v6723_v15 }
 0xda0 PF: > { %s31_s0 = sadd.s32 1, %s9310_s0  }
 0xda1   : > { %p28_p3 = scmp.ge.s32.totalorder %s31_s0, 4  }
 0xda3   :  { %30 = sbr.rel (!%p28_p3) target bundleno = 6 (0x6), region = 172 }
 0xdaa   :  { %6760 = vsyncpa [#allocation3], 1 }
 0xdab   :  { %6762 = vsyncpa [#allocation3 + $0x1], 1 }

</bundles_post_ra>
